<compile_context>
chip_gen: v5e
topology: v5e:2x2
jax: 0.10.0
libtpu: 0.0.40
codegen_flags: <defaults>
</compile_context>

<pallas_src>
import functools
from types import SimpleNamespace

import jax
import jax.numpy as jnp
from jax import lax
from jax.experimental import pallas as pl
from jax.experimental.pallas import tpu as pltpu


# Sequences up to this length are fully unrolled inside the kernel (static
# slice indices); longer sequences use lax.fori_loop(unroll=4).
_UNROLL_T_MAX = 8


def _sigmoid(x):
    # EUP-friendly sigmoid: exp and the approximate reciprocal both use the EUP
    # slot, keeping the per-step elementwise chain off the VALU critical path.
    return pl.reciprocal(1.0 + jnp.exp(-x), approx=True)


# ---------------------------------------------------------------------------
# Pallas kernel: fused bidirectional LSTM over the full sequence for one batch
# block.  Per-step work is a single (tile_b, 2H) @ (2H, 8H) recurrent matmul
# plus a shared 2H-wide cell update; the x contribution (both directions, bias
# included, backward time reversal baked in) was precomputed in the wrapper.
#   p_ref      : (tile_b, T, 8H)  f32, gate-interleaved x contribution + bias
#   w_ref      : (2H, 8H)         bf16 block-structured recurrent weights
#   h0_ref/c0_ref : (tile_b, 2H)  f32, [fwd | bwd] initial state
#   out_ref    : (tile_b, T, 2H)  fused output [fwd | bwd], original time order
#   h_last_ref : (tile_b, 2H)     final hidden state [h_fwd(T-1) | h_bwd(0)]
# ---------------------------------------------------------------------------
def _bilstm_kernel(p_ref, w_ref, h0_ref, c0_ref, out_ref, h_last_ref):
    tb, T, G = p_ref.shape          # G = 8H
    H2 = h0_ref.shape[1]            # 2H ([fwd | bwd])
    H = H2 // 2

    w = w_ref[...]                  # stays resident in vregs/VMEM for the loop

    def step(t, carry):
        h_cat, c_cat = carry                                      # (tb, 2H) f32
        rt = T - 1 - t
        # Precomputed x contribution for this step (both directions + bias).
        xg = p_ref[:, pl.ds(t, 1), :].reshape(tb, G)               # (tb, 8H)
        rec = jnp.dot(h_cat.astype(jnp.bfloat16), w,
                      preferred_element_type=jnp.float32)          # (tb, 8H)
        gates = xg + rec

        i_g = _sigmoid(gates[:, 0 * H2:1 * H2])                    # (tb, 2H)
        f_g = _sigmoid(gates[:, 1 * H2:2 * H2])
        g_g = jnp.tanh(gates[:, 2 * H2:3 * H2])
        o_g = _sigmoid(gates[:, 3 * H2:4 * H2])

        c_new = f_g * c_cat + i_g * g_g
        h_new = o_g * jnp.tanh(c_new)

        # Fused output: forward half at time t, backward half at original rt.
        out_ref[:, pl.ds(t, 1), 0:H] = h_new[:, :H].reshape(tb, 1, H)
        out_ref[:, pl.ds(rt, 1), H:H2] = h_new[:, H:].reshape(tb, 1, H)
        return h_new, c_new

    carry = (h0_ref[...], c0_ref[...])
    if T <= _UNROLL_T_MAX:
        for t in range(T):                  # small T: fully static slice indices
            carry = step(t, carry)
    else:
        carry = lax.fori_loop(0, T, step, carry, unroll=4)

    # Final hidden state written exactly once.
    h_last_ref[...] = carry[0]


# ---------------------------------------------------------------------------
# Parameter fusion / hoisted input projection.
# ---------------------------------------------------------------------------
def _fuse_hidden_weights(w_hh_f, w_hh_b):
    """(2H, 8H) recurrent weights, block-structured and gate-interleaved:
    columns [i_f|i_b | f_f|f_b | g_f|g_b | o_f|o_b]; rows [h_f ; h_b]."""
    H = w_hh_f.shape[0]
    whf4 = w_hh_f.reshape(H, 4, H)
    whb4 = w_hh_b.reshape(H, 4, H)
    z = jnp.zeros_like(whf4)
    rows_f = jnp.stack([whf4, z], axis=2).reshape(H, 8 * H)   # feeds fwd columns
    rows_b = jnp.stack([z, whb4], axis=2).reshape(H, 8 * H)   # feeds bwd columns
    return jnp.concatenate([rows_f, rows_b], axis=0)


def _precompute_gate_inputs(x_bti, params, H):
    """Hoisted input projection: one big bf16 GEMM over all B*T rows, then the
    backward direction's time reversal and the bias are folded in, producing
    P[b, t] = gate-interleaved x contribution for kernel step t."""
    B, T, I = x_bti.shape
    x_bf = x_bti.astype(jnp.bfloat16)                       # single cast of x
    w_x = jnp.concatenate([params["w_ih_f"], params["w_ih_b"]],
                          axis=1).astype(jnp.bfloat16)      # (I, 8H) dir-major
    p_dm = jnp.dot(x_bf.reshape(B * T, I), w_x,
                   preferred_element_type=jnp.float32).reshape(B, T, 8 * H)
    p_f = p_dm[..., :4 * H].reshape(B, T, 4, H)             # x_t      @ W_ih_f
    p_b = p_dm[..., 4 * H:].reshape(B, T, 4, H)[:, ::-1]    # x_{T-1-t} @ W_ih_b
    b_cat = jnp.stack([params["b_f"].reshape(4, H),
                       params["b_b"].reshape(4, H)], axis=1)          # (4, 2, H)
    p = jnp.stack([p_f, p_b], axis=3) + b_cat[None, None]   # (B, T, 4, 2, H)
    return p.reshape(B, T, 8 * H)


# ---------------------------------------------------------------------------
# Plain-XLA fallback for tiny levels (8H < 128 lanes): the fixed pallas_call +
# DMA overhead dominates there (mega LSTM: H=8, B=1, T<=4).
# ---------------------------------------------------------------------------
def _bilstm_xla(x_bti, params, h0, c0):
    H = h0.shape[-1]

    def run_dir(w_ih, w_hh, b, xs_tbi, h, c):
        pre = jnp.einsum('tbi,ig->tbg', xs_tbi, w_ih) + b          # (T, B, 4H)

        def step(carry, xg):
            h, c = carry
            gates = xg + h @ w_hh
            i = jax.nn.sigmoid(gates[:, :H])
            f = jax.nn.sigmoid(gates[:, H:2 * H])
            g = jnp.tanh(gates[:, 2 * H:3 * H])
            o = jax.nn.sigmoid(gates[:, 3 * H:])
            c = f * c + i * g
            h = o * jnp.tanh(c)
            return (h, c), h

        (h_t, _), ys = lax.scan(step, (h, c), pre)
        return ys, h_t                                             # ys: (T, B, H)

    x_tbi = jnp.transpose(x_bti, (1, 0, 2))
    y_f, h_f = run_dir(params["w_ih_f"], params["w_hh_f"], params["b_f"],
                       x_tbi, h0[0], c0[0])
    y_b_rev, h_b = run_dir(params["w_ih_b"], params["w_hh_b"], params["b_b"],
                           x_tbi[::-1], h0[1], c0[1])
    y_b = y_b_rev[::-1]
    out = jnp.concatenate([jnp.transpose(y_f, (1, 0, 2)),
                           jnp.transpose(y_b, (1, 0, 2))], axis=-1)
    return out, jnp.stack([h_f, h_b], axis=0)


# ---------------------------------------------------------------------------
# Bidirectional batch_first LSTM wrapper.
# ---------------------------------------------------------------------------
def bilstm(x_bti, params, h0, c0):
    """x_bti: (B, T, I); h0, c0: (2, B, H).
    Returns out (B, T, 2H) [fwd ++ bwd] and h_n (2, B, H)."""
    B, T, I = x_bti.shape
    H = h0.shape[-1]
    if 8 * H < 128:
        return _bilstm_xla(x_bti, params, h0, c0)

    G = 8 * H
    H2 = 2 * H

    # Batch blocking: one block if B <= 128, else 128-row blocks. The grid over
    # blocks is "parallel" (v7x megacore) and gives DMA prefetch overlap too.
    tile_b = 128 if B > 128 else max(8, ((B + 7) // 8) * 8)
    Bp = ((B + tile_b - 1) // tile_b) * tile_b
    pad_b = Bp - B

    p = _precompute_gate_inputs(x_bti, params, H)                  # (B, T, 8H)
    w_hh = _fuse_hidden_weights(params["w_hh_f"],
                                params["w_hh_b"]).astype(jnp.bfloat16)
    h0c = jnp.concatenate([h0[0], h0[1]], axis=1)                  # (B, 2H)
    c0c = jnp.concatenate([c0[0], c0[1]], axis=1)
    if pad_b:
        p = jnp.pad(p, ((0, pad_b), (0, 0), (0, 0)))
        h0c = jnp.pad(h0c, ((0, pad_b), (0, 0)))
        c0c = jnp.pad(c0c, ((0, pad_b), (0, 0)))

    # Explicit VMEM budget (double-buffered blocks + weights + carries), clamped
    # to stay valid on v7x's 64 MiB physical VMEM.
    blk_bytes = 4 * (tile_b * T * G + tile_b * T * H2 + 3 * tile_b * H2) + 2 * H2 * G
    vmem_limit = int(min(64 * 1024 * 1024, max(32 * 1024 * 1024, 4 * blk_bytes)))

    out, h_last = pl.pallas_call(
        _bilstm_kernel,
        out_shape=(jax.ShapeDtypeStruct((Bp, T, H2), jnp.float32),
                   jax.ShapeDtypeStruct((Bp, H2), jnp.float32)),
        grid_spec=pltpu.PrefetchScalarGridSpec(
            num_scalar_prefetch=0,
            grid=(Bp // tile_b,),
            in_specs=[
                pl.BlockSpec((tile_b, T, G), lambda i: (i, 0, 0)),     # P
                pl.BlockSpec((H2, G), lambda i: (0, 0)),               # W_hh
                pl.BlockSpec((tile_b, H2), lambda i: (i, 0)),          # h0
                pl.BlockSpec((tile_b, H2), lambda i: (i, 0)),          # c0
            ],
            out_specs=(
                pl.BlockSpec((tile_b, T, H2), lambda i: (i, 0, 0)),    # out [f|b]
                pl.BlockSpec((tile_b, H2), lambda i: (i, 0)),          # h_last
            ),
        ),
        compiler_params=pltpu.CompilerParams(
            dimension_semantics=("parallel",),
            vmem_limit_bytes=vmem_limit),
    )(p, w_hh, h0c, c0c)

    out = out[:B]                                                   # (B, T, 2H)
    h_n = jnp.stack([h_last[:B, :H], h_last[:B, H:]], axis=0)       # (2, B, H)
    return out, h_n


# ---------------------------------------------------------------------------
# Parameter / state initialization (deterministic, in-script).
# ---------------------------------------------------------------------------
def _init_lstm_params(key, in_size, hidden_size):
    ks = jax.random.split(key, 6)
    s = 1.0 / jnp.sqrt(hidden_size)
    u = lambda k, shape: jax.random.uniform(k, shape, jnp.float32, -s, s)
    return {
        "w_ih_f": u(ks[0], (in_size, 4 * hidden_size)),
        "w_hh_f": u(ks[1], (hidden_size, 4 * hidden_size)),
        "b_f":    u(ks[2], (4 * hidden_size,)),
        "w_ih_b": u(ks[3], (in_size, 4 * hidden_size)),
        "w_hh_b": u(ks[4], (hidden_size, 4 * hidden_size)),
        "b_b":    u(ks[5], (4 * hidden_size,)),
    }


def init_seqlstm_params(key, cfg):
    k_emb, k_pos, k_mb, k_mega = jax.random.split(key, 4)
    return {
        "pos_embed": jax.random.normal(
            k_emb, (cfg.genome_len, cfg.hs_pos_lstm), jnp.float32),
        "pos_lstm": _init_lstm_params(k_pos, cfg.hs_pos_lstm, cfg.hs_pos_lstm),
        "mb_lstm":  _init_lstm_params(k_mb, cfg.hs_pos_lstm, cfg.hs_mb_lstm),
        "mega_lstm": _init_lstm_params(k_mega, cfg.hs_mb_lstm, cfg.hs_mega_lstm),
    }


def _init_hidden(key, batch, hidden):
    kh, kc = jax.random.split(key)
    h = jax.random.normal(kh, (2, batch, hidden), jnp.float32)
    c = jax.random.normal(kc, (2, batch, hidden), jnp.float32)
    return h, c


# ---------------------------------------------------------------------------
# SeqLSTM forward (mirrors the PyTorch forward() / combine_reps()).
# ---------------------------------------------------------------------------
def _dir_pair_mean(out_bt2h, hidden_size):
    # Mirrors torch: output.reshape((-1, H, 2)).mean(2)  (inherits that quirk).
    return out_bt2h.reshape(-1, hidden_size, 2).mean(axis=2)


def seqlstm_forward(params, cfg, input_indices, nrows, hidden_key):
    # input.view(-1, sequence_length_pos)
    inp = input_indices.reshape(-1, cfg.sequence_length_pos)
    n_mb = inp.shape[0]

    # Embedding layer
    pos_reps = jnp.take(params["pos_embed"], inp.astype(jnp.int32), axis=0)
    pos_reps = pos_reps.reshape(n_mb, cfg.sequence_length_pos, -1)

    k1, k2, k3 = jax.random.split(hidden_key, 3)

    # --- pos LSTM ---
    h0, c0 = _init_hidden(k1, n_mb, cfg.hs_pos_lstm)
    output_pos, hidden_pos = bilstm(pos_reps, params["pos_lstm"], h0, c0)
    output_pos = _dir_pair_mean(output_pos, cfg.hs_pos_lstm)     # (n_mb*T, H)
    hidden_pos = jnp.mean(hidden_pos, axis=0)                    # (n_mb, H)

    # pad to multiple of sequence_length_mb (torch pads a full chunk if exact)
    pad_len = cfg.sequence_length_mb - hidden_pos.shape[0] % cfg.sequence_length_mb
    hidden_pos = jnp.concatenate(
        [hidden_pos, jnp.zeros((pad_len, cfg.hs_pos_lstm), jnp.float32)], axis=0)
    hidden_pos = hidden_pos.reshape(-1, cfg.sequence_length_mb, cfg.hs_pos_lstm)

    # --- mb LSTM ---
    h0, c0 = _init_hidden(k2, hidden_pos.shape[0], cfg.hs_mb_lstm)
    output_mb, hidden_mb = bilstm(hidden_pos, params["mb_lstm"], h0, c0)
    output_mb = _dir_pair_mean(output_mb, cfg.hs_mb_lstm)
    hidden_mb = jnp.mean(hidden_mb, axis=0)
    n_mega = hidden_mb.shape[0]

    pad_len = cfg.sequence_length_mega - hidden_mb.shape[0] % cfg.sequence_length_mega
    hidden_mb = jnp.concatenate(
        [hidden_mb, jnp.zeros((pad_len, cfg.hs_mb_lstm), jnp.float32)], axis=0)
    hidden_mb = hidden_mb[None, :, :]                            # (1, L, hs_mb)

    # --- mega LSTM (8H < 128 lanes -> plain XLA path inside bilstm) ---
    h0, c0 = _init_hidden(k3, hidden_mb.shape[0], cfg.hs_mega_lstm)
    output_mega, _ = bilstm(hidden_mb, params["mega_lstm"], h0, c0)
    output_mega = _dir_pair_mean(output_mega, cfg.hs_mega_lstm)

    # --- combine_reps ---
    zero_embed = jnp.concatenate(
        [output_pos[-1], output_mb[-1], output_mega[-1]], axis=0)[None, :]
    output_mb_fit = output_mb[:n_mb, :]
    output_mega_fit = output_mega[:n_mega, :]
    output_pos_fit = output_pos[:nrows]
    output_mb_ext = jnp.repeat(output_mb_fit, cfg.sequence_length_pos,
                               axis=0)[:nrows]
    output_mega_ext = jnp.repeat(
        output_mega_fit, cfg.sequence_length_pos * cfg.sequence_length_mb,
        axis=0)[:nrows]
    concat_reps = jnp.concatenate(
        [output_pos_fit, output_mb_ext, output_mega_ext], axis=1)
    full_reps = jnp.concatenate([zero_embed, concat_reps], axis=0)
    return full_reps


# ---------------------------------------------------------------------------
if __name__ == "__main__":
    cfg = SimpleNamespace(
        genome_len=64,
        hs_pos_lstm=16,
        hs_mb_lstm=16,
        hs_mega_lstm=8,
        sequence_length_pos=8,
        sequence_length_mb=4,
        sequence_length_mega=2,
        model_name="seqlstm_pallas",
    )

    root = jax.random.PRNGKey(0)
    k_param, k_input, k_hidden = jax.random.split(root, 3)

    params = init_seqlstm_params(k_param, cfg)

    total_positions = 32                      # 4 pos-sequences of length 8
    nrows = 30
    input_indices = jax.random.randint(
        k_input, (total_positions,), 0, cfg.genome_len, dtype=jnp.int32)

    fwd = functools.partial(seqlstm_forward, params, cfg)
    full_reps = fwd(input_indices, nrows, k_hidden)
    full_reps = jax.block_until_ready(full_reps)

    expected_dim = cfg.hs_pos_lstm + cfg.hs_mb_lstm + cfg.hs_mega_lstm
    assert full_reps.shape == (nrows + 1, expected_dim), full_reps.shape
    assert bool(jnp.all(jnp.isfinite(full_reps)))
    print("KERNEL_OK")
</pallas_src>

<mosaic_0001>
module attributes {stable_mosaic.version = 11 : i64} {
  func.func @_bilstm_kernel(%arg0: i32, %arg1: memref<8x8x128xf32, #tpu.memory_space<vmem>>, %arg2: memref<32x128xbf16, #tpu.memory_space<vmem>>, %arg3: memref<8x32xf32, #tpu.memory_space<vmem>>, %arg4: memref<8x32xf32, #tpu.memory_space<vmem>>, %arg5: memref<8x8x32xf32, #tpu.memory_space<vmem>>, %arg6: memref<8x32xf32, #tpu.memory_space<vmem>>) attributes {dimension_semantics = [#tpu.dimension_semantics<parallel>], iteration_bounds = array<i64: 1>, scalar_prefetch = 0 : i64, scratch_operands = 0 : i64, tpu.core_type = #tpu.core_type<tc>, window_params = [{transform_indices = @transform_0, window_bounds = array<i64: 8, 8, 128>}, {pipeline_mode = #tpu.pipeline_mode<synchronous>, transform_indices = @transform_1, window_bounds = array<i64: 32, 128>}, {transform_indices = @transform_2, window_bounds = array<i64: 8, 32>}, {transform_indices = @transform_3, window_bounds = array<i64: 8, 32>}, {transform_indices = @transform_4, window_bounds = array<i64: 8, 8, 32>}, {transform_indices = @transform_5, window_bounds = array<i64: 8, 32>}]} {
    %c0 = arith.constant 0 : index
    %c0_0 = arith.constant 0 : index
    %0 = vector.load %arg2[%c0, %c0_0] : memref<32x128xbf16, #tpu.memory_space<vmem>>, vector<32x128xbf16>
    %c0_1 = arith.constant 0 : index
    %c0_2 = arith.constant 0 : index
    %1 = vector.load %arg3[%c0_1, %c0_2] : memref<8x32xf32, #tpu.memory_space<vmem>>, vector<8x32xf32>
    %c0_3 = arith.constant 0 : index
    %c0_4 = arith.constant 0 : index
    %2 = vector.load %arg4[%c0_3, %c0_4] : memref<8x32xf32, #tpu.memory_space<vmem>>, vector<8x32xf32>
    %c0_5 = arith.constant 0 : index
    %c0_6 = arith.constant 0 : index
    %c0_7 = arith.constant 0 : index
    %3 = vector.load %arg1[%c0_5, %c0_6, %c0_7] : memref<8x8x128xf32, #tpu.memory_space<vmem>>, vector<8x1x128xf32>
    %4 = vector.shape_cast %3 : vector<8x1x128xf32> to vector<8x128xf32>
    %5 = arith.truncf %1 : vector<8x32xf32> to vector<8x32xbf16>
    %cst = arith.constant dense<0.000000e+00> : vector<8x128xf32>
    %6 = tpu.matmul %5, %0, %cst {dimension_numbers = #tpu.dot_dimension_numbers<[1], [0], [0], [1], [0, 0, 1, 1], [], []>} : vector<8x32xbf16>, vector<32x128xbf16>, vector<8x128xf32> -> vector<8x128xf32>
    %7 = arith.addf %4, %6 : vector<8x128xf32>
    %8 = vector.extract_strided_slice %7 {offsets = [0, 0], sizes = [8, 32], strides = [1, 1]} : vector<8x128xf32> to vector<8x32xf32>
    %cst_8 = arith.constant 0.000000e+00 : f32
    %9 = vector.broadcast %cst_8 : f32 to vector<8x32xf32>
    %10 = arith.subf %9, %8 : vector<8x32xf32>
    %11 = math.exp %10 : vector<8x32xf32>
    %cst_9 = arith.constant 1.000000e+00 : f32
    %12 = vector.broadcast %cst_9 : f32 to vector<8x32xf32>
    %13 = arith.addf %12, %11 : vector<8x32xf32>
    %14 = tpu.reciprocal %13 {approx = true} : vector<8x32xf32> -> vector<8x32xf32>
    %15 = vector.extract_strided_slice %7 {offsets = [0, 32], sizes = [8, 32], strides = [1, 1]} : vector<8x128xf32> to vector<8x32xf32>
    %cst_10 = arith.constant 0.000000e+00 : f32
    %16 = vector.broadcast %cst_10 : f32 to vector<8x32xf32>
    %17 = arith.subf %16, %15 : vector<8x32xf32>
    %18 = math.exp %17 : vector<8x32xf32>
    %cst_11 = arith.constant 1.000000e+00 : f32
    %19 = vector.broadcast %cst_11 : f32 to vector<8x32xf32>
    %20 = arith.addf %19, %18 : vector<8x32xf32>
    %21 = tpu.reciprocal %20 {approx = true} : vector<8x32xf32> -> vector<8x32xf32>
    %22 = vector.extract_strided_slice %7 {offsets = [0, 64], sizes = [8, 32], strides = [1, 1]} : vector<8x128xf32> to vector<8x32xf32>
    %23 = math.tanh %22 : vector<8x32xf32>
    %24 = vector.extract_strided_slice %7 {offsets = [0, 96], sizes = [8, 32], strides = [1, 1]} : vector<8x128xf32> to vector<8x32xf32>
    %cst_12 = arith.constant 0.000000e+00 : f32
    %25 = vector.broadcast %cst_12 : f32 to vector<8x32xf32>
    %26 = arith.subf %25, %24 : vector<8x32xf32>
    %27 = math.exp %26 : vector<8x32xf32>
    %cst_13 = arith.constant 1.000000e+00 : f32
    %28 = vector.broadcast %cst_13 : f32 to vector<8x32xf32>
    %29 = arith.addf %28, %27 : vector<8x32xf32>
    %30 = tpu.reciprocal %29 {approx = true} : vector<8x32xf32> -> vector<8x32xf32>
    %31 = arith.mulf %21, %2 : vector<8x32xf32>
    %32 = arith.mulf %14, %23 : vector<8x32xf32>
    %33 = arith.addf %31, %32 : vector<8x32xf32>
    %34 = math.tanh %33 : vector<8x32xf32>
    %35 = arith.mulf %30, %34 : vector<8x32xf32>
    %36 = vector.extract_strided_slice %35 {offsets = [0, 0], sizes = [8, 16], strides = [1, 1]} : vector<8x32xf32> to vector<8x16xf32>
    %37 = vector.shape_cast %36 : vector<8x16xf32> to vector<8x1x16xf32>
    %c0_14 = arith.constant 0 : index
    %c0_15 = arith.constant 0 : index
    %c0_16 = arith.constant 0 : index
    %38 = vector.load %arg5[%c0_14, %c0_15, %c0_16] : memref<8x8x32xf32, #tpu.memory_space<vmem>>, vector<8x1x16xf32>
    tpu.vector_store %arg5[%c0_14, %c0_15, %c0_16], %37 {strides = array<i32>} : memref<8x8x32xf32, #tpu.memory_space<vmem>>, vector<8x1x16xf32>,
    %39 = vector.extract_strided_slice %35 {offsets = [0, 16], sizes = [8, 16], strides = [1, 1]} : vector<8x32xf32> to vector<8x16xf32>
    %40 = vector.shape_cast %39 : vector<8x16xf32> to vector<8x1x16xf32>
    %c0_17 = arith.constant 0 : index
    %c7 = arith.constant 7 : index
    %c16 = arith.constant 16 : index
    %41 = vector.load %arg5[%c0_17, %c7, %c16] : memref<8x8x32xf32, #tpu.memory_space<vmem>>, vector<8x1x16xf32>
    tpu.vector_store %arg5[%c0_17, %c7, %c16], %40 {strides = array<i32>} : memref<8x8x32xf32, #tpu.memory_space<vmem>>, vector<8x1x16xf32>,
    %c0_18 = arith.constant 0 : index
    %c1 = arith.constant 1 : index
    %c0_19 = arith.constant 0 : index
    %42 = vector.load %arg1[%c0_18, %c1, %c0_19] : memref<8x8x128xf32, #tpu.memory_space<vmem>>, vector<8x1x128xf32>
    %43 = vector.shape_cast %42 : vector<8x1x128xf32> to vector<8x128xf32>
    %44 = arith.truncf %35 : vector<8x32xf32> to vector<8x32xbf16>
    %cst_20 = arith.constant dense<0.000000e+00> : vector<8x128xf32>
    %45 = tpu.matmul %44, %0, %cst_20 {dimension_numbers = #tpu.dot_dimension_numbers<[1], [0], [0], [1], [0, 0, 1, 1], [], []>} : vector<8x32xbf16>, vector<32x128xbf16>, vector<8x128xf32> -> vector<8x128xf32>
    %46 = arith.addf %43, %45 : vector<8x128xf32>
    %47 = vector.extract_strided_slice %46 {offsets = [0, 0], sizes = [8, 32], strides = [1, 1]} : vector<8x128xf32> to vector<8x32xf32>
    %cst_21 = arith.constant 0.000000e+00 : f32
    %48 = vector.broadcast %cst_21 : f32 to vector<8x32xf32>
    %49 = arith.subf %48, %47 : vector<8x32xf32>
    %50 = math.exp %49 : vector<8x32xf32>
    %cst_22 = arith.constant 1.000000e+00 : f32
    %51 = vector.broadcast %cst_22 : f32 to vector<8x32xf32>
    %52 = arith.addf %51, %50 : vector<8x32xf32>
    %53 = tpu.reciprocal %52 {approx = true} : vector<8x32xf32> -> vector<8x32xf32>
    %54 = vector.extract_strided_slice %46 {offsets = [0, 32], sizes = [8, 32], strides = [1, 1]} : vector<8x128xf32> to vector<8x32xf32>
    %cst_23 = arith.constant 0.000000e+00 : f32
    %55 = vector.broadcast %cst_23 : f32 to vector<8x32xf32>
    %56 = arith.subf %55, %54 : vector<8x32xf32>
    %57 = math.exp %56 : vector<8x32xf32>
    %cst_24 = arith.constant 1.000000e+00 : f32
    %58 = vector.broadcast %cst_24 : f32 to vector<8x32xf32>
    %59 = arith.addf %58, %57 : vector<8x32xf32>
    %60 = tpu.reciprocal %59 {approx = true} : vector<8x32xf32> -> vector<8x32xf32>
    %61 = vector.extract_strided_slice %46 {offsets = [0, 64], sizes = [8, 32], strides = [1, 1]} : vector<8x128xf32> to vector<8x32xf32>
    %62 = math.tanh %61 : vector<8x32xf32>
    %63 = vector.extract_strided_slice %46 {offsets = [0, 96], sizes = [8, 32], strides = [1, 1]} : vector<8x128xf32> to vector<8x32xf32>
    %cst_25 = arith.constant 0.000000e+00 : f32
    %64 = vector.broadcast %cst_25 : f32 to vector<8x32xf32>
    %65 = arith.subf %64, %63 : vector<8x32xf32>
    %66 = math.exp %65 : vector<8x32xf32>
    %cst_26 = arith.constant 1.000000e+00 : f32
    %67 = vector.broadcast %cst_26 : f32 to vector<8x32xf32>
    %68 = arith.addf %67, %66 : vector<8x32xf32>
    %69 = tpu.reciprocal %68 {approx = true} : vector<8x32xf32> -> vector<8x32xf32>
    %70 = arith.mulf %60, %33 : vector<8x32xf32>
    %71 = arith.mulf %53, %62 : vector<8x32xf32>
    %72 = arith.addf %70, %71 : vector<8x32xf32>
    %73 = math.tanh %72 : vector<8x32xf32>
    %74 = arith.mulf %69, %73 : vector<8x32xf32>
    %75 = vector.extract_strided_slice %74 {offsets = [0, 0], sizes = [8, 16], strides = [1, 1]} : vector<8x32xf32> to vector<8x16xf32>
    %76 = vector.shape_cast %75 : vector<8x16xf32> to vector<8x1x16xf32>
    %c0_27 = arith.constant 0 : index
    %c1_28 = arith.constant 1 : index
    %c0_29 = arith.constant 0 : index
    %77 = vector.load %arg5[%c0_27, %c1_28, %c0_29] : memref<8x8x32xf32, #tpu.memory_space<vmem>>, vector<8x1x16xf32>
    tpu.vector_store %arg5[%c0_27, %c1_28, %c0_29], %76 {strides = array<i32>} : memref<8x8x32xf32, #tpu.memory_space<vmem>>, vector<8x1x16xf32>,
    %78 = vector.extract_strided_slice %74 {offsets = [0, 16], sizes = [8, 16], strides = [1, 1]} : vector<8x32xf32> to vector<8x16xf32>
    %79 = vector.shape_cast %78 : vector<8x16xf32> to vector<8x1x16xf32>
    %c0_30 = arith.constant 0 : index
    %c6 = arith.constant 6 : index
    %c16_31 = arith.constant 16 : index
    %80 = vector.load %arg5[%c0_30, %c6, %c16_31] : memref<8x8x32xf32, #tpu.memory_space<vmem>>, vector<8x1x16xf32>
    tpu.vector_store %arg5[%c0_30, %c6, %c16_31], %79 {strides = array<i32>} : memref<8x8x32xf32, #tpu.memory_space<vmem>>, vector<8x1x16xf32>,
    %c0_32 = arith.constant 0 : index
    %c2 = arith.constant 2 : index
    %c0_33 = arith.constant 0 : index
    %81 = vector.load %arg1[%c0_32, %c2, %c0_33] : memref<8x8x128xf32, #tpu.memory_space<vmem>>, vector<8x1x128xf32>
    %82 = vector.shape_cast %81 : vector<8x1x128xf32> to vector<8x128xf32>
    %83 = arith.truncf %74 : vector<8x32xf32> to vector<8x32xbf16>
    %cst_34 = arith.constant dense<0.000000e+00> : vector<8x128xf32>
    %84 = tpu.matmul %83, %0, %cst_34 {dimension_numbers = #tpu.dot_dimension_numbers<[1], [0], [0], [1], [0, 0, 1, 1], [], []>} : vector<8x32xbf16>, vector<32x128xbf16>, vector<8x128xf32> -> vector<8x128xf32>
    %85 = arith.addf %82, %84 : vector<8x128xf32>
    %86 = vector.extract_strided_slice %85 {offsets = [0, 0], sizes = [8, 32], strides = [1, 1]} : vector<8x128xf32> to vector<8x32xf32>
    %cst_35 = arith.constant 0.000000e+00 : f32
    %87 = vector.broadcast %cst_35 : f32 to vector<8x32xf32>
    %88 = arith.subf %87, %86 : vector<8x32xf32>
    %89 = math.exp %88 : vector<8x32xf32>
    %cst_36 = arith.constant 1.000000e+00 : f32
    %90 = vector.broadcast %cst_36 : f32 to vector<8x32xf32>
    %91 = arith.addf %90, %89 : vector<8x32xf32>
    %92 = tpu.reciprocal %91 {approx = true} : vector<8x32xf32> -> vector<8x32xf32>
    %93 = vector.extract_strided_slice %85 {offsets = [0, 32], sizes = [8, 32], strides = [1, 1]} : vector<8x128xf32> to vector<8x32xf32>
    %cst_37 = arith.constant 0.000000e+00 : f32
    %94 = vector.broadcast %cst_37 : f32 to vector<8x32xf32>
    %95 = arith.subf %94, %93 : vector<8x32xf32>
    %96 = math.exp %95 : vector<8x32xf32>
    %cst_38 = arith.constant 1.000000e+00 : f32
    %97 = vector.broadcast %cst_38 : f32 to vector<8x32xf32>
    %98 = arith.addf %97, %96 : vector<8x32xf32>
    %99 = tpu.reciprocal %98 {approx = true} : vector<8x32xf32> -> vector<8x32xf32>
    %100 = vector.extract_strided_slice %85 {offsets = [0, 64], sizes = [8, 32], strides = [1, 1]} : vector<8x128xf32> to vector<8x32xf32>
    %101 = math.tanh %100 : vector<8x32xf32>
    %102 = vector.extract_strided_slice %85 {offsets = [0, 96], sizes = [8, 32], strides = [1, 1]} : vector<8x128xf32> to vector<8x32xf32>
    %cst_39 = arith.constant 0.000000e+00 : f32
    %103 = vector.broadcast %cst_39 : f32 to vector<8x32xf32>
    %104 = arith.subf %103, %102 : vector<8x32xf32>
    %105 = math.exp %104 : vector<8x32xf32>
    %cst_40 = arith.constant 1.000000e+00 : f32
    %106 = vector.broadcast %cst_40 : f32 to vector<8x32xf32>
    %107 = arith.addf %106, %105 : vector<8x32xf32>
    %108 = tpu.reciprocal %107 {approx = true} : vector<8x32xf32> -> vector<8x32xf32>
    %109 = arith.mulf %99, %72 : vector<8x32xf32>
    %110 = arith.mulf %92, %101 : vector<8x32xf32>
    %111 = arith.addf %109, %110 : vector<8x32xf32>
    %112 = math.tanh %111 : vector<8x32xf32>
    %113 = arith.mulf %108, %112 : vector<8x32xf32>
    %114 = vector.extract_strided_slice %113 {offsets = [0, 0], sizes = [8, 16], strides = [1, 1]} : vector<8x32xf32> to vector<8x16xf32>
    %115 = vector.shape_cast %114 : vector<8x16xf32> to vector<8x1x16xf32>
    %c0_41 = arith.constant 0 : index
    %c2_42 = arith.constant 2 : index
    %c0_43 = arith.constant 0 : index
    %116 = vector.load %arg5[%c0_41, %c2_42, %c0_43] : memref<8x8x32xf32, #tpu.memory_space<vmem>>, vector<8x1x16xf32>
    tpu.vector_store %arg5[%c0_41, %c2_42, %c0_43], %115 {strides = array<i32>} : memref<8x8x32xf32, #tpu.memory_space<vmem>>, vector<8x1x16xf32>,
    %117 = vector.extract_strided_slice %113 {offsets = [0, 16], sizes = [8, 16], strides = [1, 1]} : vector<8x32xf32> to vector<8x16xf32>
    %118 = vector.shape_cast %117 : vector<8x16xf32> to vector<8x1x16xf32>
    %c0_44 = arith.constant 0 : index
    %c5 = arith.constant 5 : index
    %c16_45 = arith.constant 16 : index
    %119 = vector.load %arg5[%c0_44, %c5, %c16_45] : memref<8x8x32xf32, #tpu.memory_space<vmem>>, vector<8x1x16xf32>
    tpu.vector_store %arg5[%c0_44, %c5, %c16_45], %118 {strides = array<i32>} : memref<8x8x32xf32, #tpu.memory_space<vmem>>, vector<8x1x16xf32>,
    %c0_46 = arith.constant 0 : index
    %c3 = arith.constant 3 : index
    %c0_47 = arith.constant 0 : index
    %120 = vector.load %arg1[%c0_46, %c3, %c0_47] : memref<8x8x128xf32, #tpu.memory_space<vmem>>, vector<8x1x128xf32>
    %121 = vector.shape_cast %120 : vector<8x1x128xf32> to vector<8x128xf32>
    %122 = arith.truncf %113 : vector<8x32xf32> to vector<8x32xbf16>
    %cst_48 = arith.constant dense<0.000000e+00> : vector<8x128xf32>
    %123 = tpu.matmul %122, %0, %cst_48 {dimension_numbers = #tpu.dot_dimension_numbers<[1], [0], [0], [1], [0, 0, 1, 1], [], []>} : vector<8x32xbf16>, vector<32x128xbf16>, vector<8x128xf32> -> vector<8x128xf32>
    %124 = arith.addf %121, %123 : vector<8x128xf32>
    %125 = vector.extract_strided_slice %124 {offsets = [0, 0], sizes = [8, 32], strides = [1, 1]} : vector<8x128xf32> to vector<8x32xf32>
    %cst_49 = arith.constant 0.000000e+00 : f32
    %126 = vector.broadcast %cst_49 : f32 to vector<8x32xf32>
    %127 = arith.subf %126, %125 : vector<8x32xf32>
    %128 = math.exp %127 : vector<8x32xf32>
    %cst_50 = arith.constant 1.000000e+00 : f32
    %129 = vector.broadcast %cst_50 : f32 to vector<8x32xf32>
    %130 = arith.addf %129, %128 : vector<8x32xf32>
    %131 = tpu.reciprocal %130 {approx = true} : vector<8x32xf32> -> vector<8x32xf32>
    %132 = vector.extract_strided_slice %124 {offsets = [0, 32], sizes = [8, 32], strides = [1, 1]} : vector<8x128xf32> to vector<8x32xf32>
    %cst_51 = arith.constant 0.000000e+00 : f32
    %133 = vector.broadcast %cst_51 : f32 to vector<8x32xf32>
    %134 = arith.subf %133, %132 : vector<8x32xf32>
    %135 = math.exp %134 : vector<8x32xf32>
    %cst_52 = arith.constant 1.000000e+00 : f32
    %136 = vector.broadcast %cst_52 : f32 to vector<8x32xf32>
    %137 = arith.addf %136, %135 : vector<8x32xf32>
    %138 = tpu.reciprocal %137 {approx = true} : vector<8x32xf32> -> vector<8x32xf32>
    %139 = vector.extract_strided_slice %124 {offsets = [0, 64], sizes = [8, 32], strides = [1, 1]} : vector<8x128xf32> to vector<8x32xf32>
    %140 = math.tanh %139 : vector<8x32xf32>
    %141 = vector.extract_strided_slice %124 {offsets = [0, 96], sizes = [8, 32], strides = [1, 1]} : vector<8x128xf32> to vector<8x32xf32>
    %cst_53 = arith.constant 0.000000e+00 : f32
    %142 = vector.broadcast %cst_53 : f32 to vector<8x32xf32>
    %143 = arith.subf %142, %141 : vector<8x32xf32>
    %144 = math.exp %143 : vector<8x32xf32>
    %cst_54 = arith.constant 1.000000e+00 : f32
    %145 = vector.broadcast %cst_54 : f32 to vector<8x32xf32>
    %146 = arith.addf %145, %144 : vector<8x32xf32>
    %147 = tpu.reciprocal %146 {approx = true} : vector<8x32xf32> -> vector<8x32xf32>
    %148 = arith.mulf %138, %111 : vector<8x32xf32>
    %149 = arith.mulf %131, %140 : vector<8x32xf32>
    %150 = arith.addf %148, %149 : vector<8x32xf32>
    %151 = math.tanh %150 : vector<8x32xf32>
    %152 = arith.mulf %147, %151 : vector<8x32xf32>
    %153 = vector.extract_strided_slice %152 {offsets = [0, 0], sizes = [8, 16], strides = [1, 1]} : vector<8x32xf32> to vector<8x16xf32>
    %154 = vector.shape_cast %153 : vector<8x16xf32> to vector<8x1x16xf32>
    %c0_55 = arith.constant 0 : index
    %c3_56 = arith.constant 3 : index
    %c0_57 = arith.constant 0 : index
    %155 = vector.load %arg5[%c0_55, %c3_56, %c0_57] : memref<8x8x32xf32, #tpu.memory_space<vmem>>, vector<8x1x16xf32>
    tpu.vector_store %arg5[%c0_55, %c3_56, %c0_57], %154 {strides = array<i32>} : memref<8x8x32xf32, #tpu.memory_space<vmem>>, vector<8x1x16xf32>,
    %156 = vector.extract_strided_slice %152 {offsets = [0, 16], sizes = [8, 16], strides = [1, 1]} : vector<8x32xf32> to vector<8x16xf32>
    %157 = vector.shape_cast %156 : vector<8x16xf32> to vector<8x1x16xf32>
    %c0_58 = arith.constant 0 : index
    %c4 = arith.constant 4 : index
    %c16_59 = arith.constant 16 : index
    %158 = vector.load %arg5[%c0_58, %c4, %c16_59] : memref<8x8x32xf32, #tpu.memory_space<vmem>>, vector<8x1x16xf32>
    tpu.vector_store %arg5[%c0_58, %c4, %c16_59], %157 {strides = array<i32>} : memref<8x8x32xf32, #tpu.memory_space<vmem>>, vector<8x1x16xf32>,
    %c0_60 = arith.constant 0 : index
    %c4_61 = arith.constant 4 : index
    %c0_62 = arith.constant 0 : index
    %159 = vector.load %arg1[%c0_60, %c4_61, %c0_62] : memref<8x8x128xf32, #tpu.memory_space<vmem>>, vector<8x1x128xf32>
    %160 = vector.shape_cast %159 : vector<8x1x128xf32> to vector<8x128xf32>
    %161 = arith.truncf %152 : vector<8x32xf32> to vector<8x32xbf16>
    %cst_63 = arith.constant dense<0.000000e+00> : vector<8x128xf32>
    %162 = tpu.matmul %161, %0, %cst_63 {dimension_numbers = #tpu.dot_dimension_numbers<[1], [0], [0], [1], [0, 0, 1, 1], [], []>} : vector<8x32xbf16>, vector<32x128xbf16>, vector<8x128xf32> -> vector<8x128xf32>
    %163 = arith.addf %160, %162 : vector<8x128xf32>
    %164 = vector.extract_strided_slice %163 {offsets = [0, 0], sizes = [8, 32], strides = [1, 1]} : vector<8x128xf32> to vector<8x32xf32>
    %cst_64 = arith.constant 0.000000e+00 : f32
    %165 = vector.broadcast %cst_64 : f32 to vector<8x32xf32>
    %166 = arith.subf %165, %164 : vector<8x32xf32>
    %167 = math.exp %166 : vector<8x32xf32>
    %cst_65 = arith.constant 1.000000e+00 : f32
    %168 = vector.broadcast %cst_65 : f32 to vector<8x32xf32>
    %169 = arith.addf %168, %167 : vector<8x32xf32>
    %170 = tpu.reciprocal %169 {approx = true} : vector<8x32xf32> -> vector<8x32xf32>
    %171 = vector.extract_strided_slice %163 {offsets = [0, 32], sizes = [8, 32], strides = [1, 1]} : vector<8x128xf32> to vector<8x32xf32>
    %cst_66 = arith.constant 0.000000e+00 : f32
    %172 = vector.broadcast %cst_66 : f32 to vector<8x32xf32>
    %173 = arith.subf %172, %171 : vector<8x32xf32>
    %174 = math.exp %173 : vector<8x32xf32>
    %cst_67 = arith.constant 1.000000e+00 : f32
    %175 = vector.broadcast %cst_67 : f32 to vector<8x32xf32>
    %176 = arith.addf %175, %174 : vector<8x32xf32>
    %177 = tpu.reciprocal %176 {approx = true} : vector<8x32xf32> -> vector<8x32xf32>
    %178 = vector.extract_strided_slice %163 {offsets = [0, 64], sizes = [8, 32], strides = [1, 1]} : vector<8x128xf32> to vector<8x32xf32>
    %179 = math.tanh %178 : vector<8x32xf32>
    %180 = vector.extract_strided_slice %163 {offsets = [0, 96], sizes = [8, 32], strides = [1, 1]} : vector<8x128xf32> to vector<8x32xf32>
    %cst_68 = arith.constant 0.000000e+00 : f32
    %181 = vector.broadcast %cst_68 : f32 to vector<8x32xf32>
    %182 = arith.subf %181, %180 : vector<8x32xf32>
    %183 = math.exp %182 : vector<8x32xf32>
    %cst_69 = arith.constant 1.000000e+00 : f32
    %184 = vector.broadcast %cst_69 : f32 to vector<8x32xf32>
    %185 = arith.addf %184, %183 : vector<8x32xf32>
    %186 = tpu.reciprocal %185 {approx = true} : vector<8x32xf32> -> vector<8x32xf32>
    %187 = arith.mulf %177, %150 : vector<8x32xf32>
    %188 = arith.mulf %170, %179 : vector<8x32xf32>
    %189 = arith.addf %187, %188 : vector<8x32xf32>
    %190 = math.tanh %189 : vector<8x32xf32>
    %191 = arith.mulf %186, %190 : vector<8x32xf32>
    %192 = vector.extract_strided_slice %191 {offsets = [0, 0], sizes = [8, 16], strides = [1, 1]} : vector<8x32xf32> to vector<8x16xf32>
    %193 = vector.shape_cast %192 : vector<8x16xf32> to vector<8x1x16xf32>
    %c0_70 = arith.constant 0 : index
    %c4_71 = arith.constant 4 : index
    %c0_72 = arith.constant 0 : index
    %194 = vector.load %arg5[%c0_70, %c4_71, %c0_72] : memref<8x8x32xf32, #tpu.memory_space<vmem>>, vector<8x1x16xf32>
    tpu.vector_store %arg5[%c0_70, %c4_71, %c0_72], %193 {strides = array<i32>} : memref<8x8x32xf32, #tpu.memory_space<vmem>>, vector<8x1x16xf32>,
    %195 = vector.extract_strided_slice %191 {offsets = [0, 16], sizes = [8, 16], strides = [1, 1]} : vector<8x32xf32> to vector<8x16xf32>
    %196 = vector.shape_cast %195 : vector<8x16xf32> to vector<8x1x16xf32>
    %c0_73 = arith.constant 0 : index
    %c3_74 = arith.constant 3 : index
    %c16_75 = arith.constant 16 : index
    %197 = vector.load %arg5[%c0_73, %c3_74, %c16_75] : memref<8x8x32xf32, #tpu.memory_space<vmem>>, vector<8x1x16xf32>
    tpu.vector_store %arg5[%c0_73, %c3_74, %c16_75], %196 {strides = array<i32>} : memref<8x8x32xf32, #tpu.memory_space<vmem>>, vector<8x1x16xf32>,
    %c0_76 = arith.constant 0 : index
    %c5_77 = arith.constant 5 : index
    %c0_78 = arith.constant 0 : index
    %198 = vector.load %arg1[%c0_76, %c5_77, %c0_78] : memref<8x8x128xf32, #tpu.memory_space<vmem>>, vector<8x1x128xf32>
    %199 = vector.shape_cast %198 : vector<8x1x128xf32> to vector<8x128xf32>
    %200 = arith.truncf %191 : vector<8x32xf32> to vector<8x32xbf16>
    %cst_79 = arith.constant dense<0.000000e+00> : vector<8x128xf32>
    %201 = tpu.matmul %200, %0, %cst_79 {dimension_numbers = #tpu.dot_dimension_numbers<[1], [0], [0], [1], [0, 0, 1, 1], [], []>} : vector<8x32xbf16>, vector<32x128xbf16>, vector<8x128xf32> -> vector<8x128xf32>
    %202 = arith.addf %199, %201 : vector<8x128xf32>
    %203 = vector.extract_strided_slice %202 {offsets = [0, 0], sizes = [8, 32], strides = [1, 1]} : vector<8x128xf32> to vector<8x32xf32>
    %cst_80 = arith.constant 0.000000e+00 : f32
    %204 = vector.broadcast %cst_80 : f32 to vector<8x32xf32>
    %205 = arith.subf %204, %203 : vector<8x32xf32>
    %206 = math.exp %205 : vector<8x32xf32>
    %cst_81 = arith.constant 1.000000e+00 : f32
    %207 = vector.broadcast %cst_81 : f32 to vector<8x32xf32>
    %208 = arith.addf %207, %206 : vector<8x32xf32>
    %209 = tpu.reciprocal %208 {approx = true} : vector<8x32xf32> -> vector<8x32xf32>
    %210 = vector.extract_strided_slice %202 {offsets = [0, 32], sizes = [8, 32], strides = [1, 1]} : vector<8x128xf32> to vector<8x32xf32>
    %cst_82 = arith.constant 0.000000e+00 : f32
    %211 = vector.broadcast %cst_82 : f32 to vector<8x32xf32>
    %212 = arith.subf %211, %210 : vector<8x32xf32>
    %213 = math.exp %212 : vector<8x32xf32>
    %cst_83 = arith.constant 1.000000e+00 : f32
    %214 = vector.broadcast %cst_83 : f32 to vector<8x32xf32>
    %215 = arith.addf %214, %213 : vector<8x32xf32>
    %216 = tpu.reciprocal %215 {approx = true} : vector<8x32xf32> -> vector<8x32xf32>
    %217 = vector.extract_strided_slice %202 {offsets = [0, 64], sizes = [8, 32], strides = [1, 1]} : vector<8x128xf32> to vector<8x32xf32>
    %218 = math.tanh %217 : vector<8x32xf32>
    %219 = vector.extract_strided_slice %202 {offsets = [0, 96], sizes = [8, 32], strides = [1, 1]} : vector<8x128xf32> to vector<8x32xf32>
    %cst_84 = arith.constant 0.000000e+00 : f32
    %220 = vector.broadcast %cst_84 : f32 to vector<8x32xf32>
    %221 = arith.subf %220, %219 : vector<8x32xf32>
    %222 = math.exp %221 : vector<8x32xf32>
    %cst_85 = arith.constant 1.000000e+00 : f32
    %223 = vector.broadcast %cst_85 : f32 to vector<8x32xf32>
    %224 = arith.addf %223, %222 : vector<8x32xf32>
    %225 = tpu.reciprocal %224 {approx = true} : vector<8x32xf32> -> vector<8x32xf32>
    %226 = arith.mulf %216, %189 : vector<8x32xf32>
    %227 = arith.mulf %209, %218 : vector<8x32xf32>
    %228 = arith.addf %226, %227 : vector<8x32xf32>
    %229 = math.tanh %228 : vector<8x32xf32>
    %230 = arith.mulf %225, %229 : vector<8x32xf32>
    %231 = vector.extract_strided_slice %230 {offsets = [0, 0], sizes = [8, 16], strides = [1, 1]} : vector<8x32xf32> to vector<8x16xf32>
    %232 = vector.shape_cast %231 : vector<8x16xf32> to vector<8x1x16xf32>
    %c0_86 = arith.constant 0 : index
    %c5_87 = arith.constant 5 : index
    %c0_88 = arith.constant 0 : index
    %233 = vector.load %arg5[%c0_86, %c5_87, %c0_88] : memref<8x8x32xf32, #tpu.memory_space<vmem>>, vector<8x1x16xf32>
    tpu.vector_store %arg5[%c0_86, %c5_87, %c0_88], %232 {strides = array<i32>} : memref<8x8x32xf32, #tpu.memory_space<vmem>>, vector<8x1x16xf32>,
    %234 = vector.extract_strided_slice %230 {offsets = [0, 16], sizes = [8, 16], strides = [1, 1]} : vector<8x32xf32> to vector<8x16xf32>
    %235 = vector.shape_cast %234 : vector<8x16xf32> to vector<8x1x16xf32>
    %c0_89 = arith.constant 0 : index
    %c2_90 = arith.constant 2 : index
    %c16_91 = arith.constant 16 : index
    %236 = vector.load %arg5[%c0_89, %c2_90, %c16_91] : memref<8x8x32xf32, #tpu.memory_space<vmem>>, vector<8x1x16xf32>
    tpu.vector_store %arg5[%c0_89, %c2_90, %c16_91], %235 {strides = array<i32>} : memref<8x8x32xf32, #tpu.memory_space<vmem>>, vector<8x1x16xf32>,
    %c0_92 = arith.constant 0 : index
    %c6_93 = arith.constant 6 : index
    %c0_94 = arith.constant 0 : index
    %237 = vector.load %arg1[%c0_92, %c6_93, %c0_94] : memref<8x8x128xf32, #tpu.memory_space<vmem>>, vector<8x1x128xf32>
    %238 = vector.shape_cast %237 : vector<8x1x128xf32> to vector<8x128xf32>
    %239 = arith.truncf %230 : vector<8x32xf32> to vector<8x32xbf16>
    %cst_95 = arith.constant dense<0.000000e+00> : vector<8x128xf32>
    %240 = tpu.matmul %239, %0, %cst_95 {dimension_numbers = #tpu.dot_dimension_numbers<[1], [0], [0], [1], [0, 0, 1, 1], [], []>} : vector<8x32xbf16>, vector<32x128xbf16>, vector<8x128xf32> -> vector<8x128xf32>
    %241 = arith.addf %238, %240 : vector<8x128xf32>
    %242 = vector.extract_strided_slice %241 {offsets = [0, 0], sizes = [8, 32], strides = [1, 1]} : vector<8x128xf32> to vector<8x32xf32>
    %cst_96 = arith.constant 0.000000e+00 : f32
    %243 = vector.broadcast %cst_96 : f32 to vector<8x32xf32>
    %244 = arith.subf %243, %242 : vector<8x32xf32>
    %245 = math.exp %244 : vector<8x32xf32>
    %cst_97 = arith.constant 1.000000e+00 : f32
    %246 = vector.broadcast %cst_97 : f32 to vector<8x32xf32>
    %247 = arith.addf %246, %245 : vector<8x32xf32>
    %248 = tpu.reciprocal %247 {approx = true} : vector<8x32xf32> -> vector<8x32xf32>
    %249 = vector.extract_strided_slice %241 {offsets = [0, 32], sizes = [8, 32], strides = [1, 1]} : vector<8x128xf32> to vector<8x32xf32>
    %cst_98 = arith.constant 0.000000e+00 : f32
    %250 = vector.broadcast %cst_98 : f32 to vector<8x32xf32>
    %251 = arith.subf %250, %249 : vector<8x32xf32>
    %252 = math.exp %251 : vector<8x32xf32>
    %cst_99 = arith.constant 1.000000e+00 : f32
    %253 = vector.broadcast %cst_99 : f32 to vector<8x32xf32>
    %254 = arith.addf %253, %252 : vector<8x32xf32>
    %255 = tpu.reciprocal %254 {approx = true} : vector<8x32xf32> -> vector<8x32xf32>
    %256 = vector.extract_strided_slice %241 {offsets = [0, 64], sizes = [8, 32], strides = [1, 1]} : vector<8x128xf32> to vector<8x32xf32>
    %257 = math.tanh %256 : vector<8x32xf32>
    %258 = vector.extract_strided_slice %241 {offsets = [0, 96], sizes = [8, 32], strides = [1, 1]} : vector<8x128xf32> to vector<8x32xf32>
    %cst_100 = arith.constant 0.000000e+00 : f32
    %259 = vector.broadcast %cst_100 : f32 to vector<8x32xf32>
    %260 = arith.subf %259, %258 : vector<8x32xf32>
    %261 = math.exp %260 : vector<8x32xf32>
    %cst_101 = arith.constant 1.000000e+00 : f32
    %262 = vector.broadcast %cst_101 : f32 to vector<8x32xf32>
    %263 = arith.addf %262, %261 : vector<8x32xf32>
    %264 = tpu.reciprocal %263 {approx = true} : vector<8x32xf32> -> vector<8x32xf32>
    %265 = arith.mulf %255, %228 : vector<8x32xf32>
    %266 = arith.mulf %248, %257 : vector<8x32xf32>
    %267 = arith.addf %265, %266 : vector<8x32xf32>
    %268 = math.tanh %267 : vector<8x32xf32>
    %269 = arith.mulf %264, %268 : vector<8x32xf32>
    %270 = vector.extract_strided_slice %269 {offsets = [0, 0], sizes = [8, 16], strides = [1, 1]} : vector<8x32xf32> to vector<8x16xf32>
    %271 = vector.shape_cast %270 : vector<8x16xf32> to vector<8x1x16xf32>
    %c0_102 = arith.constant 0 : index
    %c6_103 = arith.constant 6 : index
    %c0_104 = arith.constant 0 : index
    %272 = vector.load %arg5[%c0_102, %c6_103, %c0_104] : memref<8x8x32xf32, #tpu.memory_space<vmem>>, vector<8x1x16xf32>
    tpu.vector_store %arg5[%c0_102, %c6_103, %c0_104], %271 {strides = array<i32>} : memref<8x8x32xf32, #tpu.memory_space<vmem>>, vector<8x1x16xf32>,
    %273 = vector.extract_strided_slice %269 {offsets = [0, 16], sizes = [8, 16], strides = [1, 1]} : vector<8x32xf32> to vector<8x16xf32>
    %274 = vector.shape_cast %273 : vector<8x16xf32> to vector<8x1x16xf32>
    %c0_105 = arith.constant 0 : index
    %c1_106 = arith.constant 1 : index
    %c16_107 = arith.constant 16 : index
    %275 = vector.load %arg5[%c0_105, %c1_106, %c16_107] : memref<8x8x32xf32, #tpu.memory_space<vmem>>, vector<8x1x16xf32>
    tpu.vector_store %arg5[%c0_105, %c1_106, %c16_107], %274 {strides = array<i32>} : memref<8x8x32xf32, #tpu.memory_space<vmem>>, vector<8x1x16xf32>,
    %c0_108 = arith.constant 0 : index
    %c7_109 = arith.constant 7 : index
    %c0_110 = arith.constant 0 : index
    %276 = vector.load %arg1[%c0_108, %c7_109, %c0_110] : memref<8x8x128xf32, #tpu.memory_space<vmem>>, vector<8x1x128xf32>
    %277 = vector.shape_cast %276 : vector<8x1x128xf32> to vector<8x128xf32>
    %278 = arith.truncf %269 : vector<8x32xf32> to vector<8x32xbf16>
    %cst_111 = arith.constant dense<0.000000e+00> : vector<8x128xf32>
    %279 = tpu.matmul %278, %0, %cst_111 {dimension_numbers = #tpu.dot_dimension_numbers<[1], [0], [0], [1], [0, 0, 1, 1], [], []>} : vector<8x32xbf16>, vector<32x128xbf16>, vector<8x128xf32> -> vector<8x128xf32>
    %280 = arith.addf %277, %279 : vector<8x128xf32>
    %281 = vector.extract_strided_slice %280 {offsets = [0, 0], sizes = [8, 32], strides = [1, 1]} : vector<8x128xf32> to vector<8x32xf32>
    %cst_112 = arith.constant 0.000000e+00 : f32
    %282 = vector.broadcast %cst_112 : f32 to vector<8x32xf32>
    %283 = arith.subf %282, %281 : vector<8x32xf32>
    %284 = math.exp %283 : vector<8x32xf32>
    %cst_113 = arith.constant 1.000000e+00 : f32
    %285 = vector.broadcast %cst_113 : f32 to vector<8x32xf32>
    %286 = arith.addf %285, %284 : vector<8x32xf32>
    %287 = tpu.reciprocal %286 {approx = true} : vector<8x32xf32> -> vector<8x32xf32>
    %288 = vector.extract_strided_slice %280 {offsets = [0, 32], sizes = [8, 32], strides = [1, 1]} : vector<8x128xf32> to vector<8x32xf32>
    %cst_114 = arith.constant 0.000000e+00 : f32
    %289 = vector.broadcast %cst_114 : f32 to vector<8x32xf32>
    %290 = arith.subf %289, %288 : vector<8x32xf32>
    %291 = math.exp %290 : vector<8x32xf32>
    %cst_115 = arith.constant 1.000000e+00 : f32
    %292 = vector.broadcast %cst_115 : f32 to vector<8x32xf32>
    %293 = arith.addf %292, %291 : vector<8x32xf32>
    %294 = tpu.reciprocal %293 {approx = true} : vector<8x32xf32> -> vector<8x32xf32>
    %295 = vector.extract_strided_slice %280 {offsets = [0, 64], sizes = [8, 32], strides = [1, 1]} : vector<8x128xf32> to vector<8x32xf32>
    %296 = math.tanh %295 : vector<8x32xf32>
    %297 = vector.extract_strided_slice %280 {offsets = [0, 96], sizes = [8, 32], strides = [1, 1]} : vector<8x128xf32> to vector<8x32xf32>
    %cst_116 = arith.constant 0.000000e+00 : f32
    %298 = vector.broadcast %cst_116 : f32 to vector<8x32xf32>
    %299 = arith.subf %298, %297 : vector<8x32xf32>
    %300 = math.exp %299 : vector<8x32xf32>
    %cst_117 = arith.constant 1.000000e+00 : f32
    %301 = vector.broadcast %cst_117 : f32 to vector<8x32xf32>
    %302 = arith.addf %301, %300 : vector<8x32xf32>
    %303 = tpu.reciprocal %302 {approx = true} : vector<8x32xf32> -> vector<8x32xf32>
    %304 = arith.mulf %294, %267 : vector<8x32xf32>
    %305 = arith.mulf %287, %296 : vector<8x32xf32>
    %306 = arith.addf %304, %305 : vector<8x32xf32>
    %307 = math.tanh %306 : vector<8x32xf32>
    %308 = arith.mulf %303, %307 : vector<8x32xf32>
    %309 = vector.extract_strided_slice %308 {offsets = [0, 0], sizes = [8, 16], strides = [1, 1]} : vector<8x32xf32> to vector<8x16xf32>
    %310 = vector.shape_cast %309 : vector<8x16xf32> to vector<8x1x16xf32>
    %c0_118 = arith.constant 0 : index
    %c7_119 = arith.constant 7 : index
    %c0_120 = arith.constant 0 : index
    %311 = vector.load %arg5[%c0_118, %c7_119, %c0_120] : memref<8x8x32xf32, #tpu.memory_space<vmem>>, vector<8x1x16xf32>
    tpu.vector_store %arg5[%c0_118, %c7_119, %c0_120], %310 {strides = array<i32>} : memref<8x8x32xf32, #tpu.memory_space<vmem>>, vector<8x1x16xf32>,
    %312 = vector.extract_strided_slice %308 {offsets = [0, 16], sizes = [8, 16], strides = [1, 1]} : vector<8x32xf32> to vector<8x16xf32>
    %313 = vector.shape_cast %312 : vector<8x16xf32> to vector<8x1x16xf32>
    %c0_121 = arith.constant 0 : index
    %c0_122 = arith.constant 0 : index
    %c16_123 = arith.constant 16 : index
    %314 = vector.load %arg5[%c0_121, %c0_122, %c16_123] : memref<8x8x32xf32, #tpu.memory_space<vmem>>, vector<8x1x16xf32>
    tpu.vector_store %arg5[%c0_121, %c0_122, %c16_123], %313 {strides = array<i32>} : memref<8x8x32xf32, #tpu.memory_space<vmem>>, vector<8x1x16xf32>,
    %c0_124 = arith.constant 0 : index
    %c0_125 = arith.constant 0 : index
    %315 = vector.load %arg6[%c0_124, %c0_125] : memref<8x32xf32, #tpu.memory_space<vmem>>, vector<8x32xf32>
    tpu.vector_store %arg6[%c0_124, %c0_125], %308 {strides = array<i32>} : memref<8x32xf32, #tpu.memory_space<vmem>>, vector<8x32xf32>,
    return
  }
  func.func @transform_0(%arg0: i32) -> (i32, i32, i32) {
    %c0_i32 = arith.constant 0 : i32
    %c0_i32_0 = arith.constant 0 : i32
    %c0_i32_1 = arith.constant 0 : i32
    return %arg0, %c0_i32, %c0_i32_0 : i32, i32, i32
  }
  func.func @transform_1(%arg0: i32) -> (i32, i32) {
    %c0_i32 = arith.constant 0 : i32
    %c0_i32_0 = arith.constant 0 : i32
    %c0_i32_1 = arith.constant 0 : i32
    return %c0_i32, %c0_i32_0 : i32, i32
  }
  func.func @transform_2(%arg0: i32) -> (i32, i32) {
    %c0_i32 = arith.constant 0 : i32
    %c0_i32_0 = arith.constant 0 : i32
    return %arg0, %c0_i32 : i32, i32
  }
  func.func @transform_3(%arg0: i32) -> (i32, i32) {
    %c0_i32 = arith.constant 0 : i32
    %c0_i32_0 = arith.constant 0 : i32
    return %arg0, %c0_i32 : i32, i32
  }
  func.func @transform_4(%arg0: i32) -> (i32, i32, i32) {
    %c0_i32 = arith.constant 0 : i32
    %c0_i32_0 = arith.constant 0 : i32
    %c0_i32_1 = arith.constant 0 : i32
    return %arg0, %c0_i32, %c0_i32_0 : i32, i32, i32
  }
  func.func @transform_5(%arg0: i32) -> (i32, i32) {
    %c0_i32 = arith.constant 0 : i32
    %c0_i32_0 = arith.constant 0 : i32
    return %arg0, %c0_i32 : i32, i32
  }
}

</mosaic_0001>

<bundles_post_ra>
// kernel: tpu_custom_call.1
= control target key start
LH: loop header
LB: loop body
LE: loop exit
PB: predicated region body
PF: predicated region fallthrough
CT: control target
= control target key end

     0   :  { %11 = vsyncpa [#allocation3], 0  ;;  %s4803_s0 = inlined_call_operand.hbm [shape: f32[8,8,128], index: 0, kind: input, shape index: {}]   ;;  %s4804_s1 = inlined_call_operand.hbm [shape: bf16[32,128], index: 1, kind: input, shape index: {}]   ;;  %s4805_s2 = inlined_call_operand.hbm [shape: f32[8,32], index: 2, kind: input, shape index: {}]   ;;  %s4806_s3 = inlined_call_operand.hbm [shape: f32[8,32], index: 3, kind: input, shape index: {}]   ;;  %s4807_s4 = inlined_call_operand.hbm [shape: f32[8,8,32], index: 4, kind: output, shape index: {0}]   ;;  %s4808_s5 = inlined_call_operand.hbm [shape: f32[8,32], index: 5, kind: output, shape index: {1}]  }
   0x1   :  { %12 = vsyncpa [#allocation6], 0 }
   0x2   :  { %13 = vsyncpa [#allocation9], 0 }
   0x3   :  { %14 = vsyncpa [#allocation4], 0  ;;  %s33_s20 = sshll.u32 %s4804_s1, 4  ;;  %s34_s20 = int_to_ptr.hbm [resolvable:$true] %s33_s20 }
   0x4   :  { %15 = vsyncpa [#allocation12], 0  ;;  %s3419_s21 = smov [#allocation5]   ;;  %s20_s25 = sshll.u32 %s4803_s0, 4  ;;  %s21_s25 = int_to_ptr.hbm [resolvable:$true] %s20_s25 }
   0x5   :  { %s35_s22 = sshll.u32 %s3419_s21, 4  ;;  %s3420_s26 = smov 64   ;;  %s36_s22 = int_to_ptr.vmem [resolvable:$true] %s35_s22 }
   0x6   :  { %s3421_s27 = smov 4   ;;  %s3422_s28 = smov [#allocation2]  }
   0x7   :  { %41 = dma.hbm_to_vmem [thread:$0]  %s34_s20, 256, %s36_s22, [#allocation6], %s3420_s26, %s3420_s26, %s3421_s27  }
   0x8   :  { %s22_s29 = sshll.u32 %s3422_s28, 4  ;;  %s3423_s30 = smov 128   ;;  %s23_s29 = int_to_ptr.vmem [resolvable:$true] %s22_s29 }
   0x9   :  { %s3424_s1 = smov 8   ;;  %s47_s8 = sshll.u32 %s4805_s2, 4  ;;  %s48_s8 = int_to_ptr.hbm [resolvable:$true] %s47_s8 }
   0xa   :  { %28 = dma.hbm_to_vmem [thread:$0]  %s21_s25, 1024, %s23_s29, [#allocation3], %s3423_s30, %s3423_s30, %s3424_s1  }
   0xb   :  { %s3425_s0 = smov [#allocation7]   ;;  %s58_s12 = sshll.u32 %s4806_s3, 4  ;;  %s59_s12 = int_to_ptr.hbm [resolvable:$true] %s58_s12 }
   0xc   :  { %s49_s9 = sshll.u32 %s3425_s0, 4  ;;  %s3426_s13 = smov [#allocation8]   ;;  %s50_s9 = int_to_ptr.vmem [resolvable:$true] %s49_s9 }
   0xd   :  { %52 = dma.hbm_to_vmem [thread:$0]  %s48_s8, 128, %s50_s9, [#allocation6]  }
   0xe   :  { %s60_s14 = sshll.u32 %s3426_s13, 4  ;;  %s61_s14 = int_to_ptr.vmem [resolvable:$true] %s60_s14 }
   0xf   :  { %63 = dma.hbm_to_vmem [thread:$0]  %s59_s12, 128, %s61_s14, [#allocation9]  }
  0x10   :  { %3409 = dma.done.wait [#allocation3], 1024  }
  0x11   :  { %3410 = vsyncadd [#allocation3], 4294966272 }
  0x12   :  { %3411 = dma.done.wait [#allocation6], 384  }
  0x13   :  { %3412 = vsyncadd [#allocation6], 4294966912 }
  0x14   :  { %3413 = dma.done.wait [#allocation9], 128  }
  0x15   :  { %3414 = vsyncadd [#allocation9], 4294967168  ;;  %v2741_v0 = vld [vmem:[#allocation5 + $0x8] sm:$0xff]  ;;  %v2740_v1 = vld [vmem:[#allocation5] sm:$0xff]  ;;  %vm108_vm0 = vcmask 261120   ;;  %s3427_s2 = smov 32  }
  0x16   :  { %118 = vmatpush.bf16.msra.mxu0 %v2741_v0  ;;  %v85_v2 = vld [vmem:[#allocation7] sm:$0xff]  ;;  %480 = vmatpush.bf16.msra.mxu1 %v2741_v0  ;;  %v87_v4 = vld [vmem:[#allocation2] sm:$0x1]  ;;  %v88_v7 = vld [vmem:[#allocation2 + $0x8] sm:$0x1]  ;;  %vm448_vm1 = vcmask 1041409  }
  0x17   :  { %801 = vmatpush.bf16.msra.mxu2 %v2741_v0  ;;  %1122 = vmatpush.bf16.msra.mxu3 %v2741_v0  ;;  %v95_v3 = vpack.c.bf16 %v85_v2, %v85_v2  ;;  %v91_v6 = vld [vmem:[#allocation2 + $0x20] sm:$0x1]  ;;  %v90_v14 = vld [vmem:[#allocation2 + $0x18] sm:$0x1]  ;;  %v92_v16 = vld [vmem:[#allocation2 + $0x28] sm:$0x1] }
  0x18   :  { %v89_v20 = vld [vmem:[#allocation2 + $0x10] sm:$0x1]  ;;  %v94_v27 = vld [vmem:[#allocation2 + $0x38] sm:$0x1]  ;;  %vm451_vm2 = vcmask 1042434   ;;  %vm454_vm3 = vcmask 1043459  }
  0x19   :  { %v93_v31 = vld [vmem:[#allocation2 + $0x30] sm:$0x1]  ;;  %v86_v34 = vld [vmem:[#allocation8] sm:$0xff]  ;;  %vm457_vm4 = vcmask 1044484   ;;  %vm460_vm5 = vcmask 1045509   ;;  %vm463_vm6 = vcmask 1046534  }
  0x1a   :  { %119 = vmatpush.bf16.msra.mxu0 %v2740_v1  ;;  %481 = vmatpush.bf16.msra.mxu1 %v2740_v1  ;;  %v198_v36 = vrot.slane %v86_v34, 1  ;;  %v200_v39 = vrot.slane %v86_v34, 3  ;;  %v199_v40 = vrot.slane %v86_v34, 2  ;;  %v204_v41 = vrot.slane %v86_v34, 7  ;;  %s3428_s3 = smov [#allocation10]   ;;  %s2693_s18 = sshll.u32 %s4807_s4, 4  ;;  %s2694_s18 = int_to_ptr.hbm [resolvable:$true] %s2693_s18 }
  0x1b   :  { %802 = vmatpush.bf16.msra.mxu2 %v2740_v1  ;;  %1123 = vmatpush.bf16.msra.mxu3 %v2740_v1  ;;  %v201_v42 = vrot.slane %v86_v34, 4  ;;  %v202_v43 = vrot.slane %v86_v34, 5  ;;  %v203_v44 = vrot.slane %v86_v34, 6  ;;  %vm466_vm7 = vcmask 1047559   ;;  %s2691_s15 = sshll.u32 %s3428_s3, 4  ;;  %s3429_s19 = smov [#allocation11]   ;;  %s2692_s15 = int_to_ptr.vmem [resolvable:$true] %s2691_s15 }
  0x1c   :  { %vm397_vm8 = vcmask 122880   ;;  %vm406_vm9 = vcmask 254080   ;;  %s2705_s20 = sshll.u32 %s3429_s19, 4  ;;  %s2707_s23 = sshll.u32 %s4808_s5, 4  ;;  %s2706_s20 = int_to_ptr.vmem [resolvable:$true] %s2705_s20  ;;  %s2708_s23 = int_to_ptr.hbm [resolvable:$true] %s2707_s23 }
  0x1d   :  { %2732 = vmatmul.msk.bf16.vlgmr.msra.gmra.mxu0 %vm108_vm0, %v95_v3 }
  0x1e   :  { %1443 = vmatpush.bf16.msrb.mxu0 %v2741_v0  ;;  %1764 = vmatpush.bf16.msrb.mxu1 %v2741_v0 }
  0x1f   :  { %2085 = vmatpush.bf16.msrb.mxu2 %v2741_v0  ;;  %2406 = vmatpush.bf16.msrb.mxu3 %v2741_v0 }
  0x22   :  { %1444 = vmatpush.bf16.msrb.mxu0 %v2740_v1  ;;  %1765 = vmatpush.bf16.msrb.mxu1 %v2740_v1 }
  0x23   :  { %2086 = vmatpush.bf16.msrb.mxu2 %v2740_v1  ;;  %2407 = vmatpush.bf16.msrb.mxu3 %v2740_v1 }
  0x9a   :  { %v121_v5 = vpop.f32.mrf.mxu0 }
  0x9b   :  { %v3478_v8 = vadd.f32 %v121_v5, %v87_v4  ;;  %v129_v9 = vrot.slane %v121_v5, 4  ;;  %v126_v10 = vrot.slane %v121_v5, 1  ;;  %v128_v13 = vrot.slane %v121_v5, 3 }
  0x9c   :  { %v130_v15 = vrot.slane %v121_v5, 5  ;;  %v127_v18 = vrot.slane %v121_v5, 2  ;;  %v132_v26 = vrot.slane %v121_v5, 7  ;;  %v131_v29 = vrot.slane %v121_v5, 6 }
  0x9d   :  { %2753 = vtanh.f32 %v3478_v8  ;;  %v3481_v11 = vadd.f32 %v129_v9, %v91_v6  ;;  %v142_v12 = vadd.f32 %v126_v10, %v88_v7  ;;  %v3484_v17 = vadd.f32 %v128_v13, %v90_v14 }
  0x9e   :  { %v146_v22 = vadd.f32 %v130_v15, %v92_v16  ;;  %v143_v24 = vadd.f32 %v127_v18, %v89_v20  ;;  %v3491_v30 = vadd.f32 %v132_v26, %v94_v27  ;;  %v147_v35 = vadd.f32 %v131_v29, %v93_v31 }
  0x9f   :  { %2755 = vtanh.f32 %v3481_v11  ;;  %v149_v45 = vsub.f32 0.0, %v3478_v8  ;;  %v150_v46 = vsub.f32 0.0, %v142_v12  ;;  %v153_v49 = vsub.f32 0.0, %v3481_v11 }
  0xa0   :  { %2757 = vtanh.f32 %v142_v12  ;;  %v154_v50 = vsub.f32 0.0, %v146_v22  ;;  %v151_v52 = vsub.f32 0.0, %v143_v24  ;;  %v152_v59 = vsub.f32 0.0, %v3484_v17 }
  0xa1   :  { %2759 = vtanh.f32 %v3484_v17  ;;  %v157_v47 = vmul.f32 1.442695, %v149_v45  ;;  %v159_v48 = vmul.f32 1.442695, %v150_v46  ;;  %v165_v51 = vmul.f32 1.442695, %v153_v49 }
  0xa2   :  { %v123_v19 = vpop.f32.mrf.mxu0  ;;  %2761 = vtanh.f32 %v146_v22  ;;  %v167_v54 = vmul.f32 1.442695, %v154_v50  ;;  %v161_v55 = vmul.f32 1.442695, %v151_v52  ;;  %v155_v61 = vsub.f32 0.0, %v147_v35 }
  0xa3   :  { %v2754_v21 = vpop.eup %2753  ;;  %2763 = vtanh.f32 %v143_v24  ;;  %v163_v62 = vmul.f32 1.442695, %v152_v59  ;;  %v156_v7 = vsub.f32 0.0, %v3491_v30 }
  0xa4   :  { %245 = vrot.lane.b32.xlu1 %v2754_v21, %s3420_s26  ;;  %2765 = vtanh.f32 %v3491_v30  ;;  %v169_v2 = vmul.f32 1.442695, %v155_v61 }
  0xa5   :  { %v2756_v23 = vpop.eup %2755  ;;  %2767 = vtanh.f32 %v147_v35  ;;  %v171_v13 = vmul.f32 1.442695, %v156_v7 }
  0xa6   :  { %v2758_v25 = vpop.eup %2757  ;;  %253 = vrot.lane.b32.xlu2 %v2756_v23, %s3420_s26  ;;  %2769 = vpow2.f32 %v157_v47 }
  0xa7   :  { %247 = vrot.lane.b32.xlu0 %v2758_v25, %s3420_s26  ;;  %v2760_v28 = vpop.eup %2759  ;;  %2771 = vpow2.f32 %v159_v48 }
  0xa8   :  { %v2762_v32 = vpop.eup %2761  ;;  %2773 = vpow2.f32 %v165_v51 }
  0xa9   :  { %v2764_v33 = vpop.eup %2763  ;;  %2775 = vpow2.f32 %v167_v54 }
  0xaa   :  { %v2766_v37 = vpop.eup %2765  ;;  %2777 = vpow2.f32 %v161_v55 }
  0xab   :  { %v2768_v38 = vpop.eup %2767 }
  0xac   :  { %251 = vrot.lane.b32.xlu1 %v2760_v28, %s3420_s26  ;;  %v2770_v53 = vpop.eup %2769 }
  0xad   :  { %v2772_v56 = vpop.eup %2771  ;;  %v173_v57 = vadd.f32 1.0, %v2770_v53 }
  0xae   :  { %255 = vrot.lane.b32.xlu2 %v2762_v32, %s3420_s26  ;;  %v174_v58 = vadd.f32 1.0, %v2772_v56  ;;  %v2774_v60 = vpop.eup %2773 }
  0xaf   :  { %249 = vrot.lane.b32.xlu0 %v2764_v33, %s3420_s26  ;;  %2779 = vrcp.f32 %v173_v57  ;;  %v2776_v63 = vpop.eup %2775  ;;  %v177_v0 = vadd.f32 1.0, %v2774_v60 }
  0xb0   :  { %2781 = vrcp.f32 %v174_v58  ;;  %v2778_v1 = vpop.eup %2777  ;;  %v178_v6 = vadd.f32 1.0, %v2776_v63 }
  0xb1   :  { %2783 = vpow2.f32 %v163_v62  ;;  %v175_v9 = vadd.f32 1.0, %v2778_v1 }
  0xb2   :  { %2785 = vrcp.f32 %v177_v0 }
  0xb3   :  { %2787 = vpow2.f32 %v169_v2 }
  0xb4   :  { %259 = vrot.lane.b32.xlu1 %v2766_v37, %s3420_s26  ;;  %2789 = vrcp.f32 %v178_v6 }
  0xb5   :  { %v3509_v4 = vpop.eup %2779  ;;  %2791 = vrcp.f32 %v175_v9 }
  0xb6   :  { %207 = vrot.lane.b32.xlu2 %v198_v36, %s3427_s2  ;;  %v3513_v10 = vpop.eup %2781  ;;  %2793 = vpow2.f32 %v171_v13 }
  0xb7   :  { %257 = vrot.lane.b32.xlu0 %v2768_v38, %s3420_s26  ;;  %v2784_v14 = vpop.eup %2783 }
  0xb8   :  { %v3518_v15 = vpop.eup %2785  ;;  %v176_v19 = vadd.f32 1.0, %v2784_v14 }
  0xb9   :  { %v2788_v16 = vpop.eup %2787 }
  0xba   :  { %v3521_v20 = vpop.eup %2789  ;;  %v179_v22 = vadd.f32 1.0, %v2788_v16  ;;  %2795 = vrcp.f32 %v176_v19 }
  0xbb   :  { %v3524_v21 = vpop.eup %2791 }
  0xbc   :  { %205 = vrot.lane.b32.xlu1 %v86_v34, %s3427_s2  ;;  %v2794_v26 = vpop.eup %2793  ;;  %2797 = vrcp.f32 %v179_v22 }
  0xbd   :  { %v180_v28 = vadd.f32 1.0, %v2794_v26 }
  0xbe   :  { %211 = vrot.lane.b32.xlu2 %v200_v39, %s3427_s2 }
  0xbf   :  { %209 = vrot.lane.b32.xlu0 %v199_v40, %s3427_s2  ;;  %2799 = vrcp.f32 %v180_v28 }
  0xc0   :  { %v3530_v29 = vpop.eup %2795 }
  0xc2   :  { %v3533_v31 = vpop.eup %2797 }
  0xc4   :  { %213 = vrot.lane.b32.xlu1 %v201_v42, %s3427_s2 }
  0xc5   :  { %v3538_v35 = vpop.eup %2799 }
  0xc6   :  { %219 = vrot.lane.b32.xlu2 %v204_v41, %s3427_s2 }
  0xc7   :  { %215 = vrot.lane.b32.xlu0 %v202_v43, %s3427_s2 }
  0xcf   :  { %217 = vrot.lane.b32.xlu0 %v203_v44, %s3427_s2 }
 0x100   :  { %v254_v3 = vpop.permute.xlu2 %253 }
 0x101   :  { %v273_v17 = vmul.f32 %v3518_v15, %v254_v3 }
 0x108   :  { %v256_v18 = vpop.permute.xlu2 %255 }
 0x109   :  { %v274_v23 = vmul.f32 %v3521_v20, %v256_v18 }
 0x110   :  { %v208_v37 = vpop.permute.xlu2 %207 }
 0x111   :  { %v230_v52 = vmul.f32 %v3513_v10, %v208_v37 }
 0x116   :  { %v246_v5 = vpop.permute.xlu1 %245 }
 0x117   :  { %v269_v8 = vmul.f32 %v3509_v4, %v246_v5 }
 0x118   :  { %v212_v38 = vpop.permute.xlu2 %211 }
 0x119   :  { %v248_v11 = vpop.permute.xlu0 %247  ;;  %285 = vrot.lane.b32.xlu1 %v269_v8, %s3427_s2  ;;  %v232_v56 = vmul.f32 %v3530_v29, %v212_v38 }
 0x11a   :  { %v270_v12 = vmul.f32 %v3513_v10, %v248_v11 }
 0x11c   :  { %287 = vrot.lane.b32.xlu0 %v270_v12, %s3427_s2 }
 0x11e   :  { %v252_v27 = vpop.permute.xlu1 %251 }
 0x11f   :  { %v272_v30 = vmul.f32 %v3530_v29, %v252_v27 }
 0x120   :  { %v220_v40 = vpop.permute.xlu2 %219 }
 0x121   :  { %293 = vrot.lane.b32.xlu1 %v273_v17, %s3427_s2  ;;  %v250_v24 = vpop.permute.xlu0 %249  ;;  %v236_v3 = vmul.f32 %v3538_v35, %v220_v40 }
 0x122   :  { %v271_v25 = vmul.f32 %v3524_v21, %v250_v24 }
 0x124   :  { %295 = vrot.lane.b32.xlu0 %v274_v23, %s3427_s2  ;;  %289 = vrot.lane.b32.xlu2 %v271_v25, %s3427_s2 }
 0x126   :  { %v260_v34 = vpop.permute.xlu1 %259 }
 0x127   :  { %v276_v36 = vmul.f32 %v3538_v35, %v260_v34 }
 0x129   :  { %v258_v32 = vpop.permute.xlu0 %257 }
 0x12a   :  { %v275_v33 = vmul.f32 %v3533_v31, %v258_v32 }
 0x12c   :  { %291 = vrot.lane.b32.xlu2 %v272_v30, %s3427_s2  ;;  %297 = vrot.lane.b32.xlu1 %v275_v33, %s3427_s2 }
 0x12e   :  { %v206_v41 = vpop.permute.xlu1 %205 }
 0x12f   :  { %v229_v49 = vmul.f32 %v3509_v4, %v206_v41 }
 0x131   :  { %v210_v39 = vpop.permute.xlu0 %209 }
 0x132   :  { %v231_v43 = vmul.f32 %v3524_v21, %v210_v39 }
 0x134   :  { %299 = vrot.lane.b32.xlu2 %v276_v36, %s3427_s2 }
 0x136   :  { %v214_v46 = vpop.permute.xlu1 %213 }
 0x137   :  { %v233_v57 = vmul.f32 %v3518_v15, %v214_v46 }
 0x139   :  { %v216_v42 = vpop.permute.xlu0 %215 }
 0x13a   :  { %v234_v62 = vmul.f32 %v3521_v20, %v216_v42 }
 0x141   :  { %v218_v47 = vpop.permute.xlu0 %217 }
 0x142   :  { %v235_v9 = vmul.f32 %v3533_v31, %v218_v47 }
 0x17e   :  { %v290_v44 = vpop.permute.xlu2 %289 }
 0x17f   :  { %v3543_v45 = vadd.f32 %v290_v44, %v231_v43 }
 0x181   :  { %2801 = vtanh.f32 %v3543_v45 }
 0x186   :  { %v292_v53 = vpop.permute.xlu2 %291 }
 0x187   :  { %v2802_v48 = vpop.eup %2801  ;;  %v3557_v60 = vadd.f32 %v292_v53, %v232_v56 }
 0x188   :  { %337 = vrot.lane.b32.xlu1 %v2802_v48, %s3420_s26 }
 0x18b   :  { %v286_v50 = vpop.permute.xlu1 %285 }
 0x18c   :  { %v3548_v51 = vadd.f32 %v286_v50, %v229_v49 }
 0x18e   :  { %2803 = vtanh.f32 %v3548_v51  ;;  %v288_v54 = vpop.permute.xlu0 %287  ;;  %v300_v1 = vpop.permute.xlu2 %299 }
 0x18f   :  { %v3552_v55 = vadd.f32 %v288_v54, %v230_v52  ;;  %v3570_v5 = vadd.f32 %v300_v1, %v236_v3  ;;  %v415_v3 = vld [vmem:[#allocation2 + $0x1] sm:$0x1] }
 0x191   :  { %2805 = vtanh.f32 %v3552_v55 }
 0x193   :  { %v294_v58 = vpop.permute.xlu1 %293 }
 0x194   :  { %v2804_v59 = vpop.eup %2803  ;;  %v3559_v61 = vadd.f32 %v294_v58, %v233_v57 }
 0x195   :  { %333 = vrot.lane.b32.xlu2 %v2804_v59, %s3420_s26 }
 0x196   :  { %2807 = vtanh.f32 %v3559_v61  ;;  %v296_v63 = vpop.permute.xlu0 %295 }
 0x197   :  { %v2806_v0 = vpop.eup %2805  ;;  %v3564_v2 = vadd.f32 %v296_v63, %v234_v62  ;;  %2809 = vtanh.f32 %v3557_v60 }
 0x198   :  { %335 = vrot.lane.b32.xlu0 %v2806_v0, %s3420_s26 }
 0x199   :  { %2811 = vtanh.f32 %v3564_v2 }
 0x19a   :  { %2813 = vtanh.f32 %v3570_v5 }
 0x19c   :  { %v2808_v6 = vpop.eup %2807 }
 0x19d   :  { %341 = vrot.lane.b32.xlu1 %v2808_v6, %s3420_s26  ;;  %v2810_v7 = vpop.eup %2809 }
 0x19e   :  { %v298_v11 = vpop.permute.xlu1 %297 }
 0x19f   :  { %v2812_v8 = vpop.eup %2811  ;;  %v3577_v12 = vadd.f32 %v298_v11, %v235_v9 }
 0x1a0   :  { %343 = vrot.lane.b32.xlu2 %v2812_v8, %s3420_s26  ;;  %339 = vrot.lane.b32.xlu0 %v2810_v7, %s3420_s26  ;;  %v2814_v13 = vpop.eup %2813  ;;  %v417_v7 = vld [vmem:[#allocation2 + $0x11] sm:$0x1]  ;;  %v416_v8 = vld [vmem:[#allocation2 + $0x9] sm:$0x1] }
 0x1a1   :  { %2815 = vtanh.f32 %v3577_v12 }
 0x1a5   :  { %347 = vrot.lane.b32.xlu1 %v2814_v13, %s3420_s26 }
 0x1a7   :  { %v2816_v14 = vpop.eup %2815 }
 0x1a8   :  { %345 = vrot.lane.b32.xlu0 %v2816_v14, %s3420_s26 }
 0x1ef   :  { %v334_v19 = vpop.permute.xlu2 %333 }
 0x1f0   :  { %v3591_v25 = vmul.f32 %v3509_v4, %v334_v19  ;;  %v420_v19 = vld [vmem:[#allocation2 + $0x29] sm:$0x1] }
 0x1f2   :  { %v423_v33 = vpack.c.bf16 %v3591_v25, %v3591_v25 }
 0x1f4   :  { %v439_v39 = vunpack.c.l.b16 %v423_v33 }
 0x1fa   :  { %v338_v16 = vpop.permute.xlu1 %337  ;;  %v344_v30 = vpop.permute.xlu2 %343 }
 0x1fb   :  { %v3588_v24 = vmul.f32 %v3524_v21, %v338_v16  ;;  %v3606_v4 = vmul.f32 %v3521_v20, %v344_v30  ;;  %v418_v30 = vld [vmem:[#allocation2 + $0x19] sm:$0x1] }
 0x1fd   :  { %v428_v40 = vpack.c.bf16 %v3606_v4, %v3606_v4 }
 0x20a   :  { %v336_v17 = vpop.permute.xlu0 %335 }
 0x20b   :  { %v3583_v18 = vmul.f32 %v3513_v10, %v336_v17  ;;  %v425_v10 = vpack.c.bf16 %v3588_v24, %v3588_v24 }
 0x20d   :  { %v424_v22 = vpack.c.bf16 %v3583_v18, %v3583_v18  ;;  %v441_v37 = vunpack.c.l.b16 %v425_v10 }
 0x20f   :  { %v342_v23 = vpop.permute.xlu1 %341  ;;  %v440_v27 = vunpack.c.l.b16 %v424_v22  ;;  %v450_v42 = vrot.slane %v441_v37, 6 }
 0x210   :  { %v3599_v32 = vmul.f32 %v3518_v15, %v342_v23  ;;  %v419_v23 = vld [vmem:[#allocation2 + $0x21] sm:$0x1] }
 0x211   :  { %v447_v34 = vrot.slane %v440_v27, 7 }
 0x212   :  { %v340_v26 = vpop.permute.xlu0 %339  ;;  %v427_v38 = vpack.c.bf16 %v3599_v32, %v3599_v32 }
 0x213   :  { %v3594_v28 = vmul.f32 %v3530_v29, %v340_v26  ;;  %v449_v41 = vsel %vm448_vm1, %v447_v34, %v439_v39 }
 0x214   :  { %v443_v43 = vunpack.c.l.b16 %v427_v38  ;;  %v452_v47 = vsel %vm451_vm2, %v450_v42, %v449_v41  ;;  %v422_v38 = vld [vmem:[#allocation2 + $0x39] sm:$0x1] }
 0x215   :  { %v426_v21 = vpack.c.bf16 %v3594_v28, %v3594_v28 }
 0x216   :  { %v456_v50 = vrot.slane %v443_v43, 4 }
 0x217   :  { %v442_v36 = vunpack.c.l.b16 %v426_v21  ;;  %v348_v29 = vpop.permute.xlu1 %347 }
 0x218   :  { %v3611_v15 = vmul.f32 %v3538_v35, %v348_v29  ;;  %v444_v35 = vunpack.c.l.b16 %v428_v40 }
 0x219   :  { %v453_v20 = vrot.slane %v442_v36, 5 }
 0x21a   :  { %v430_v44 = vpack.c.bf16 %v3611_v15, %v3611_v15  ;;  %v346_v46 = vpop.permute.xlu0 %345  ;;  %v459_v57 = vrot.slane %v444_v35, 3 }
 0x21b   :  { %v3620_v48 = vmul.f32 %v3533_v31, %v346_v46  ;;  %v455_v49 = vsel %vm454_vm3, %v453_v20, %v452_v47  ;;  %v421_v20 = vld [vmem:[#allocation2 + $0x31] sm:$0x1] }
 0x21c   :  { %v446_v53 = vunpack.c.l.b16 %v430_v44  ;;  %v458_v56 = vsel %vm457_vm4, %v456_v50, %v455_v49 }
 0x21d   :  { %v429_v52 = vpack.c.bf16 %v3620_v48, %v3620_v48  ;;  %v461_v31 = vsel %vm460_vm5, %v459_v57, %v458_v56 }
 0x21e   :  { %v465_v59 = vrot.slane %v446_v53, 1 }
 0x21f   :  { %v445_v54 = vunpack.c.l.b16 %v429_v52 }
 0x221   :  { %v462_v58 = vrot.slane %v445_v54, 2 }
 0x223   :  { %v464_v62 = vsel %vm463_vm6, %v462_v58, %v461_v31 }
 0x224   :  { %v467_v63 = vsel %vm466_vm7, %v465_v59, %v464_v62 }
 0x225   :  { %v468_v0 = vpack.c.b16 %v467_v63, %v467_v63 }
 0x227   :  { %469 = vrot.lane.b32.xlu2 %v468_v0, %s3427_s2 }
 0x281   :  { %v470_v1 = vpop.permute.xlu2 %469 }
 0x282   :  { %2733 = vmatmul.msk.bf16.vlgmr.msra.gmra.mxu1 %vm108_vm0, %v470_v1 }
 0x2ff   :  { %v483_v6 = vpop.f32.mrf.mxu1 }
 0x300   :  { %v503_v9 = vadd.f32 %v483_v6, %v415_v3  ;;  %v489_v11 = vrot.slane %v483_v6, 2  ;;  %v488_v13 = vrot.slane %v483_v6, 1  ;;  %v492_v17 = vrot.slane %v483_v6, 5 }
 0x301   :  { %v491_v22 = vrot.slane %v483_v6, 4  ;;  %v490_v27 = vrot.slane %v483_v6, 3  ;;  %v494_v37 = vrot.slane %v483_v6, 7  ;;  %v493_v40 = vrot.slane %v483_v6, 6 }
 0x302   :  { %2817 = vtanh.f32 %v503_v9  ;;  %v505_v14 = vadd.f32 %v489_v11, %v417_v7  ;;  %v504_v16 = vadd.f32 %v488_v13, %v416_v8  ;;  %v508_v26 = vadd.f32 %v492_v17, %v420_v19 }
 0x303   :  { %v507_v21 = vadd.f32 %v491_v22, %v419_v23  ;;  %v506_v36 = vadd.f32 %v490_v27, %v418_v30  ;;  %v510_v41 = vadd.f32 %v494_v37, %v422_v38  ;;  %v509_v44 = vadd.f32 %v493_v40, %v421_v20 }
 0x304   :  { %2819 = vtanh.f32 %v505_v14  ;;  %v511_v35 = vsub.f32 0.0, %v503_v9  ;;  %v516_v50 = vsub.f32 0.0, %v508_v26  ;;  %v513_v58 = vsub.f32 0.0, %v505_v14 }
 0x305   :  { %2821 = vtanh.f32 %v504_v16  ;;  %v512_v31 = vsub.f32 0.0, %v504_v16  ;;  %v515_v3 = vsub.f32 0.0, %v507_v21  ;;  %v514_v8 = vsub.f32 0.0, %v506_v36 }
 0x306   :  { %2823 = vtanh.f32 %v508_v26  ;;  %v519_v49 = vmul.f32 1.442695, %v511_v35  ;;  %v529_v52 = vmul.f32 1.442695, %v516_v50  ;;  %v523_v0 = vmul.f32 1.442695, %v513_v58 }
 0x307   :  { %v485_v10 = vpop.f32.mrf.mxu1  ;;  %2825 = vtanh.f32 %v507_v21  ;;  %v521_v1 = vmul.f32 1.442695, %v512_v31  ;;  %v527_v11 = vmul.f32 1.442695, %v515_v3  ;;  %v525_v14 = vmul.f32 1.442695, %v514_v8 }
 0x308   :  { %v2818_v33 = vpop.eup %2817  ;;  %2827 = vtanh.f32 %v506_v36  ;;  %v518_v19 = vsub.f32 0.0, %v510_v41  ;;  %v517_v23 = vsub.f32 0.0, %v509_v44 }
 0x309   :  { %575 = vrot.lane.b32.xlu2 %v2818_v33, %s3420_s26  ;;  %2829 = vtanh.f32 %v510_v41 }
 0x30a   :  { %v2820_v34 = vpop.eup %2819  ;;  %2831 = vtanh.f32 %v509_v44  ;;  %v533_v26 = vmul.f32 1.442695, %v518_v19  ;;  %v531_v30 = vmul.f32 1.442695, %v517_v23 }
 0x30b   :  { %v2822_v29 = vpop.eup %2821  ;;  %579 = vrot.lane.b32.xlu1 %v2820_v34, %s3420_s26  ;;  %2833 = vpow2.f32 %v519_v49 }
 0x30c   :  { %577 = vrot.lane.b32.xlu0 %v2822_v29, %s3420_s26  ;;  %v2824_v39 = vpop.eup %2823  ;;  %2835 = vpow2.f32 %v529_v52 }
 0x30d   :  { %v2826_v42 = vpop.eup %2825 }
 0x30e   :  { %v2828_v43 = vpop.eup %2827 }
 0x30f   :  { %v2830_v46 = vpop.eup %2829 }
 0x310   :  { %v2832_v47 = vpop.eup %2831 }
 0x311   :  { %585 = vrot.lane.b32.xlu2 %v2824_v39, %s3420_s26  ;;  %v2834_v53 = vpop.eup %2833 }
 0x312   :  { %v535_v54 = vadd.f32 1.0, %v2834_v53  ;;  %v2836_v56 = vpop.eup %2835 }
 0x313   :  { %583 = vrot.lane.b32.xlu1 %v2826_v42, %s3420_s26  ;;  %v540_v57 = vadd.f32 1.0, %v2836_v56 }
 0x314   :  { %581 = vrot.lane.b32.xlu0 %v2828_v43, %s3420_s26  ;;  %2837 = vrcp.f32 %v535_v54 }
 0x315   :  { %2839 = vrcp.f32 %v540_v57 }
 0x316   :  { %2841 = vpow2.f32 %v523_v0 }
 0x317   :  { %2843 = vpow2.f32 %v521_v1 }
 0x318   :  { %2845 = vpow2.f32 %v527_v11 }
 0x319   :  { %2847 = vpow2.f32 %v525_v14 }
 0x31a   :  { %v3639_v59 = vpop.eup %2837 }
 0x31b   :  { %589 = vrot.lane.b32.xlu1 %v2830_v46, %s3420_s26  ;;  %v3643_v6 = vpop.eup %2839  ;;  %v559_v58 = vmul.f32 %v3639_v59, %v3548_v51 }
 0x31c   :  { %587 = vrot.lane.b32.xlu0 %v2832_v47, %s3420_s26  ;;  %v2842_v13 = vpop.eup %2841  ;;  %v564_v3 = vmul.f32 %v3643_v6, %v3564_v2 }
 0x31d   :  { %v2844_v16 = vpop.eup %2843  ;;  %v537_v17 = vadd.f32 1.0, %v2842_v13 }
 0x31e   :  { %v536_v22 = vadd.f32 1.0, %v2844_v16  ;;  %v2846_v27 = vpop.eup %2845 }
 0x31f   :  { %2849 = vrcp.f32 %v537_v17  ;;  %v2848_v10 = vpop.eup %2847  ;;  %v539_v33 = vadd.f32 1.0, %v2846_v27 }
 0x320   :  { %2851 = vrcp.f32 %v536_v22  ;;  %v538_v34 = vadd.f32 1.0, %v2848_v10 }
 0x321   :  { %2853 = vpow2.f32 %v533_v26 }
 0x322   :  { %2855 = vpow2.f32 %v531_v30 }
 0x323   :  { %2857 = vrcp.f32 %v539_v33 }
 0x324   :  { %2859 = vrcp.f32 %v538_v34 }
 0x325   :  { %v3647_v21 = vpop.eup %2849 }
 0x326   :  { %v3649_v29 = vpop.eup %2851 }
 0x327   :  { %v2854_v40 = vpop.eup %2853 }
 0x328   :  { %v2856_v41 = vpop.eup %2855  ;;  %v542_v20 = vadd.f32 1.0, %v2854_v40 }
 0x329   :  { %v3655_v42 = vpop.eup %2857  ;;  %v541_v47 = vadd.f32 1.0, %v2856_v41 }
 0x32a   :  { %v3658_v46 = vpop.eup %2859  ;;  %2861 = vrcp.f32 %v542_v20 }
 0x32b   :  { %2863 = vrcp.f32 %v541_v47  ;;  %v562_v51 = vmul.f32 %v3658_v46, %v3557_v60  ;;  %v561_v60 = vmul.f32 %v3647_v21, %v3543_v45 }
 0x330   :  { %v3663_v50 = vpop.eup %2861 }
 0x331   :  { %v3666_v54 = vpop.eup %2863  ;;  %v566_v45 = vmul.f32 %v3663_v50, %v3570_v5 }
 0x332   :  { %v565_v16 = vmul.f32 %v3666_v54, %v3577_v12  ;;  %v563_v12 = vmul.f32 %v3655_v42, %v3559_v61 }
 0x363   :  { %v576_v62 = vpop.permute.xlu2 %575 }
 0x364   :  { %v599_v63 = vmul.f32 %v3639_v59, %v576_v62 }
 0x366   :  { %615 = vrot.lane.b32.xlu1 %v599_v63, %s3427_s2  ;;  %v560_v63 = vmul.f32 %v3649_v29, %v3552_v55 }
 0x36b   :  { %v586_v7 = vpop.permute.xlu2 %585 }
 0x36c   :  { %v604_v9 = vmul.f32 %v3643_v6, %v586_v7 }
 0x36e   :  { %625 = vrot.lane.b32.xlu1 %v604_v9, %s3427_s2 }
 0x37d   :  { %v580_v36 = vpop.permute.xlu1 %579 }
 0x37e   :  { %v601_v37 = vmul.f32 %v3647_v21, %v580_v36  ;;  %v578_v38 = vpop.permute.xlu0 %577 }
 0x37f   :  { %v600_v39 = vmul.f32 %v3649_v29, %v578_v38 }
 0x380   :  { %619 = vrot.lane.b32.xlu0 %v601_v37, %s3427_s2 }
 0x381   :  { %617 = vrot.lane.b32.xlu2 %v600_v39, %s3427_s2 }
 0x385   :  { %v584_v43 = vpop.permute.xlu1 %583 }
 0x386   :  { %v603_v44 = vmul.f32 %v3655_v42, %v584_v43  ;;  %v582_v35 = vpop.permute.xlu0 %581 }
 0x387   :  { %v602_v49 = vmul.f32 %v3658_v46, %v582_v35 }
 0x388   :  { %623 = vrot.lane.b32.xlu0 %v603_v44, %s3427_s2 }
 0x389   :  { %621 = vrot.lane.b32.xlu2 %v602_v49, %s3427_s2 }
 0x38d   :  { %v590_v52 = vpop.permute.xlu1 %589 }
 0x38e   :  { %v606_v53 = vmul.f32 %v3663_v50, %v590_v52  ;;  %v588_v56 = vpop.permute.xlu0 %587 }
 0x38f   :  { %v605_v57 = vmul.f32 %v3666_v54, %v588_v56 }
 0x390   :  { %629 = vrot.lane.b32.xlu0 %v606_v53, %s3427_s2 }
 0x391   :  { %627 = vrot.lane.b32.xlu2 %v605_v57, %s3427_s2 }
 0x3d8   :  { %v616_v31 = vpop.permute.xlu1 %615 }
 0x3d9   :  { %v3673_v62 = vadd.f32 %v616_v31, %v559_v58 }
 0x3db   :  { %2865 = vtanh.f32 %v3673_v62  ;;  %v618_v0 = vpop.permute.xlu2 %617 }
 0x3dc   :  { %v3678_v1 = vadd.f32 %v618_v0, %v560_v63 }
 0x3de   :  { %2867 = vtanh.f32 %v3678_v1 }
 0x3e0   :  { %v626_v7 = vpop.permute.xlu1 %625 }
 0x3e1   :  { %v2866_v8 = vpop.eup %2865  ;;  %v3683_v9 = vadd.f32 %v626_v7, %v564_v3 }
 0x3e2   :  { %663 = vrot.lane.b32.xlu0 %v2866_v8, %s3420_s26 }
 0x3e3   :  { %2869 = vtanh.f32 %v3683_v9  ;;  %v622_v11 = vpop.permute.xlu2 %621 }
 0x3e4   :  { %v2868_v55 = vpop.eup %2867  ;;  %v3689_v13 = vadd.f32 %v622_v11, %v562_v51 }
 0x3e5   :  { %665 = vrot.lane.b32.xlu1 %v2868_v55, %s3420_s26 }
 0x3e6   :  { %2871 = vtanh.f32 %v3689_v13 }
 0x3e9   :  { %v2870_v2 = vpop.eup %2869 }
 0x3ea   :  { %673 = vrot.lane.b32.xlu0 %v2870_v2, %s3420_s26 }
 0x3eb   :  { %v628_v17 = vpop.permute.xlu2 %627 }
 0x3ec   :  { %v2872_v14 = vpop.eup %2871  ;;  %v3697_v19 = vadd.f32 %v628_v17, %v565_v16 }
 0x3ed   :  { %669 = vrot.lane.b32.xlu1 %v2872_v14, %s3420_s26 }
 0x3ee   :  { %2873 = vtanh.f32 %v3697_v19 }
 0x3f2   :  { %v620_v22 = vpop.permute.xlu0 %619 }
 0x3f3   :  { %v3702_v23 = vadd.f32 %v620_v22, %v561_v60 }
 0x3f4   :  { %v2874_v26 = vpop.eup %2873 }
 0x3f5   :  { %2875 = vtanh.f32 %v3702_v23  ;;  %675 = vrot.lane.b32.xlu1 %v2874_v26, %s3420_s26 }
 0x3fa   :  { %v624_v27 = vpop.permute.xlu0 %623 }
 0x3fb   :  { %v2876_v10 = vpop.eup %2875  ;;  %v3708_v30 = vadd.f32 %v624_v27, %v563_v12 }
 0x3fc   :  { %667 = vrot.lane.b32.xlu2 %v2876_v10, %s3420_s26 }
 0x3fd   :  { %2877 = vtanh.f32 %v3708_v30 }
 0x402   :  { %v630_v34 = vpop.permute.xlu0 %629 }
 0x403   :  { %v2878_v33 = vpop.eup %2877  ;;  %v3714_v36 = vadd.f32 %v630_v34, %v566_v45 }
 0x404   :  { %671 = vrot.lane.b32.xlu2 %v2878_v33, %s3420_s26 }
 0x405   :  { %2879 = vtanh.f32 %v3714_v36 }
 0x40b   :  { %v2880_v61 = vpop.eup %2879 }
 0x40c   :  { %677 = vrot.lane.b32.xlu2 %v2880_v61, %s3420_s26 }
 0x454   :  { %v664_v38 = vpop.permute.xlu0 %663 }
 0x455   :  { %v3728_v20 = vmul.f32 %v3639_v59, %v664_v38 }
 0x456   :  { %v668_v37 = vpop.permute.xlu2 %667 }
 0x457   :  { %v666_v39 = vpop.permute.xlu1 %665  ;;  %v3723_v41 = vmul.f32 %v3647_v21, %v668_v37  ;;  %v751_v21 = vpack.c.bf16 %v3728_v20, %v3728_v20  ;;  %v743_v37 = vld [vmem:[#allocation2 + $0x2] sm:$0x1] }
 0x458   :  { %v3720_v40 = vmul.f32 %v3649_v29, %v666_v39  ;;  %v745_v39 = vld [vmem:[#allocation2 + $0x12] sm:$0x1] }
 0x459   :  { %v753_v44 = vpack.c.bf16 %v3723_v41, %v3723_v41  ;;  %v767_v31 = vunpack.c.l.b16 %v751_v21 }
 0x45a   :  { %v752_v5 = vpack.c.bf16 %v3720_v40, %v3720_v40 }
 0x45b   :  { %v769_v53 = vunpack.c.l.b16 %v753_v44 }
 0x45c   :  { %v768_v35 = vunpack.c.l.b16 %v752_v5  ;;  %v674_v29 = vpop.permute.xlu0 %673  ;;  %v744_v5 = vld [vmem:[#allocation2 + $0xa] sm:$0x1] }
 0x45d   :  { %v777_v63 = vrot.slane %v769_v53, 6  ;;  %v748_v53 = vld [vmem:[#allocation2 + $0x2a] sm:$0x1] }
 0x45e   :  { %v672_v43 = vpop.permute.xlu2 %671  ;;  %v775_v57 = vrot.slane %v768_v35, 7 }
 0x45f   :  { %v3733_v47 = vmul.f32 %v3655_v42, %v672_v43  ;;  %v670_v49 = vpop.permute.xlu1 %669  ;;  %v3745_v42 = vmul.f32 %v3643_v6, %v674_v29 }
 0x460   :  { %v3736_v52 = vmul.f32 %v3658_v46, %v670_v49  ;;  %v776_v3 = vsel %vm448_vm1, %v775_v57, %v767_v31 }
 0x461   :  { %v755_v59 = vpack.c.bf16 %v3733_v47, %v3733_v47  ;;  %v756_v7 = vpack.c.bf16 %v3745_v42, %v3745_v42  ;;  %v778_v2 = vsel %vm451_vm2, %v777_v63, %v776_v3  ;;  %v746_v63 = vld [vmem:[#allocation2 + $0x1a] sm:$0x1] }
 0x462   :  { %v754_v56 = vpack.c.bf16 %v3736_v52, %v3736_v52 }
 0x463   :  { %v771_v0 = vunpack.c.l.b16 %v755_v59  ;;  %v772_v16 = vunpack.c.l.b16 %v756_v7 }
 0x464   :  { %v770_v58 = vunpack.c.l.b16 %v754_v56  ;;  %v747_v56 = vld [vmem:[#allocation2 + $0x22] sm:$0x1] }
 0x465   :  { %v781_v6 = vrot.slane %v771_v0, 4  ;;  %v783_v12 = vrot.slane %v772_v16, 3 }
 0x466   :  { %v678_v46 = vpop.permute.xlu2 %677  ;;  %v779_v8 = vrot.slane %v770_v58, 5 }
 0x467   :  { %v3751_v51 = vmul.f32 %v3663_v50, %v678_v46  ;;  %v676_v11 = vpop.permute.xlu1 %675 }
 0x468   :  { %v3757_v14 = vmul.f32 %v3666_v54, %v676_v11  ;;  %v780_v17 = vsel %vm454_vm3, %v779_v8, %v778_v2  ;;  %v750_v11 = vld [vmem:[#allocation2 + $0x3a] sm:$0x1] }
 0x469   :  { %v758_v55 = vpack.c.bf16 %v3751_v51, %v3751_v51  ;;  %v782_v50 = vsel %vm457_vm4, %v781_v6, %v780_v17  ;;  %v749_v17 = vld [vmem:[#allocation2 + $0x32] sm:$0x1] }
 0x46a   :  { %v757_v22 = vpack.c.bf16 %v3757_v14, %v3757_v14  ;;  %v784_v45 = vsel %vm460_vm5, %v783_v12, %v782_v50 }
 0x46b   :  { %v774_v60 = vunpack.c.l.b16 %v758_v55 }
 0x46c   :  { %v773_v26 = vunpack.c.l.b16 %v757_v22 }
 0x46d   :  { %v787_v27 = vrot.slane %v774_v60, 1 }
 0x46e   :  { %v785_v10 = vrot.slane %v773_v26, 2 }
 0x470   :  { %v786_v33 = vsel %vm463_vm6, %v785_v10, %v784_v45 }
 0x471   :  { %v788_v54 = vsel %vm466_vm7, %v787_v27, %v786_v33 }
 0x472   :  { %v789_v34 = vpack.c.b16 %v788_v54, %v788_v54 }
 0x474   :  { %790 = vrot.lane.b32.xlu0 %v789_v34, %s3427_s2 }
 0x4e6   :  { %v791_v61 = vpop.permute.xlu0 %790 }
 0x4e7   :  { %2734 = vmatmul.msk.bf16.vlgmr.msra.gmra.mxu2 %vm108_vm0, %v791_v61 }
 0x56a   :  { %v804_v38 = vpop.f32.mrf.mxu2 }
 0x56b   :  { %v824_v43 = vadd.f32 %v804_v38, %v743_v37  ;;  %v810_v44 = vrot.slane %v804_v38, 2  ;;  %v809_v35 = vrot.slane %v804_v38, 1  ;;  %v813_v21 = vrot.slane %v804_v38, 5 }
 0x56c   :  { %v812_v59 = vrot.slane %v804_v38, 4  ;;  %v811_v58 = vrot.slane %v804_v38, 3  ;;  %v815_v55 = vrot.slane %v804_v38, 7  ;;  %v814_v2 = vrot.slane %v804_v38, 6 }
 0x56d   :  { %2881 = vtanh.f32 %v824_v43  ;;  %v826_v49 = vadd.f32 %v810_v44, %v745_v39  ;;  %v825_v29 = vadd.f32 %v809_v35, %v744_v5  ;;  %v829_v57 = vadd.f32 %v813_v21, %v748_v53 }
 0x56e   :  { %v828_v46 = vadd.f32 %v812_v59, %v747_v56  ;;  %v827_v7 = vadd.f32 %v811_v58, %v746_v63  ;;  %v831_v16 = vadd.f32 %v815_v55, %v750_v11  ;;  %v830_v26 = vadd.f32 %v814_v2, %v749_v17 }
 0x56f   :  { %2883 = vtanh.f32 %v826_v49  ;;  %v834_v27 = vsub.f32 0.0, %v826_v49  ;;  %v832_v39 = vsub.f32 0.0, %v824_v43  ;;  %v833_v5 = vsub.f32 0.0, %v825_v29 }
 0x570   :  { %2885 = vtanh.f32 %v825_v29  ;;  %v836_v45 = vsub.f32 0.0, %v828_v46  ;;  %v839_v61 = vsub.f32 0.0, %v831_v16  ;;  %v837_v56 = vsub.f32 0.0, %v829_v57 }
 0x571   :  { %2887 = vtanh.f32 %v829_v57  ;;  %v844_v10 = vmul.f32 1.442695, %v834_v27  ;;  %v840_v35 = vmul.f32 1.442695, %v832_v39  ;;  %v842_v59 = vmul.f32 1.442695, %v833_v5 }
 0x572   :  { %v806_v31 = vpop.f32.mrf.mxu2  ;;  %2889 = vtanh.f32 %v828_v46  ;;  %v848_v33 = vmul.f32 1.442695, %v836_v45  ;;  %v854_v37 = vmul.f32 1.442695, %v839_v61  ;;  %v835_v63 = vsub.f32 0.0, %v827_v7 }
 0x573   :  { %v2882_v0 = vpop.eup %2881  ;;  %2891 = vtanh.f32 %v827_v7  ;;  %v850_v31 = vmul.f32 1.442695, %v837_v56  ;;  %v838_v7 = vsub.f32 0.0, %v830_v26 }
 0x574   :  { %896 = vrot.lane.b32.xlu0 %v2882_v0, %s3420_s26  ;;  %2893 = vtanh.f32 %v831_v16 }
 0x575   :  { %v2884_v3 = vpop.eup %2883  ;;  %2895 = vtanh.f32 %v830_v26 }
 0x576   :  { %v2886_v8 = vpop.eup %2885  ;;  %900 = vrot.lane.b32.xlu2 %v2884_v3, %s3420_s26  ;;  %2897 = vpow2.f32 %v844_v10 }
 0x577   :  { %898 = vrot.lane.b32.xlu1 %v2886_v8, %s3420_s26  ;;  %v2888_v6 = vpop.eup %2887  ;;  %2899 = vpow2.f32 %v848_v33  ;;  %v846_v8 = vmul.f32 1.442695, %v835_v63 }
 0x578   :  { %v2890_v60 = vpop.eup %2889 }
 0x579   :  { %v2892_v22 = vpop.eup %2891 }
 0x57a   :  { %v2894_v50 = vpop.eup %2893 }
 0x57b   :  { %v2896_v12 = vpop.eup %2895 }
 0x57c   :  { %906 = vrot.lane.b32.xlu0 %v2888_v6, %s3420_s26  ;;  %v2898_v54 = vpop.eup %2897 }
 0x57d   :  { %v858_v34 = vadd.f32 1.0, %v2898_v54  ;;  %v2900_v38 = vpop.eup %2899 }
 0x57e   :  { %904 = vrot.lane.b32.xlu2 %v2890_v60, %s3420_s26  ;;  %v860_v44 = vadd.f32 1.0, %v2900_v38 }
 0x57f   :  { %902 = vrot.lane.b32.xlu1 %v2892_v22, %s3420_s26  ;;  %2901 = vrcp.f32 %v858_v34 }
 0x580   :  { %2903 = vpow2.f32 %v854_v37 }
 0x581   :  { %2905 = vrcp.f32 %v860_v44 }
 0x582   :  { %2907 = vpow2.f32 %v840_v35 }
 0x583   :  { %2909 = vpow2.f32 %v842_v59 }
 0x584   :  { %2911 = vpow2.f32 %v850_v31 }
 0x585   :  { %v3776_v21 = vpop.eup %2901 }
 0x586   :  { %910 = vrot.lane.b32.xlu2 %v2894_v50, %s3420_s26  ;;  %v2904_v58 = vpop.eup %2903  ;;  %v852_v50 = vmul.f32 1.442695, %v838_v7  ;;  %v882_v63 = vmul.f32 %v3776_v21, %v3702_v23 }
 0x587   :  { %908 = vrot.lane.b32.xlu1 %v2896_v12, %s3420_s26  ;;  %v863_v43 = vadd.f32 1.0, %v2904_v58  ;;  %v3780_v29 = vpop.eup %2905 }
 0x588   :  { %v2908_v46 = vpop.eup %2907 }
 0x589   :  { %2913 = vrcp.f32 %v863_v43  ;;  %v2910_v57 = vpop.eup %2909  ;;  %v856_v55 = vadd.f32 1.0, %v2908_v46 }
 0x58a   :  { %v857_v11 = vadd.f32 1.0, %v2910_v57  ;;  %2915 = vpow2.f32 %v846_v8  ;;  %v2912_v6 = vpop.eup %2911 }
 0x58b   :  { %2917 = vrcp.f32 %v856_v55  ;;  %v861_v60 = vadd.f32 1.0, %v2912_v6 }
 0x58c   :  { %2919 = vrcp.f32 %v857_v11 }
 0x58d   :  { %2921 = vrcp.f32 %v861_v60 }
 0x58e   :  { %2923 = vpow2.f32 %v852_v50 }
 0x58f   :  { %v3784_v2 = vpop.eup %2913 }
 0x590   :  { %v2916_v22 = vpop.eup %2915  ;;  %v887_v6 = vmul.f32 %v3784_v2, %v3714_v36 }
 0x591   :  { %v3788_v12 = vpop.eup %2917  ;;  %v859_v45 = vadd.f32 1.0, %v2916_v22 }
 0x592   :  { %v3791_v33 = vpop.eup %2919  ;;  %v880_v56 = vmul.f32 %v3788_v12, %v3673_v62  ;;  %v884_v62 = vmul.f32 %v3780_v29, %v3708_v30 }
 0x593   :  { %2925 = vrcp.f32 %v859_v45  ;;  %v3796_v34 = vpop.eup %2921 }
 0x594   :  { %v2924_v37 = vpop.eup %2923  ;;  %v885_v46 = vmul.f32 %v3796_v34, %v3683_v9 }
 0x595   :  { %v862_v5 = vadd.f32 1.0, %v2924_v37 }
 0x597   :  { %2927 = vrcp.f32 %v862_v5 }
 0x599   :  { %v3800_v39 = vpop.eup %2925 }
 0x59a   :  { %v883_v36 = vmul.f32 %v3800_v39, %v3689_v13 }
 0x5d0   :  { %v901_v53 = vpop.permute.xlu2 %900 }
 0x5d1   :  { %v922_v49 = vmul.f32 %v3776_v21, %v901_v53  ;;  %v3804_v53 = vpop.eup %2927 }
 0x5d3   :  { %940 = vrot.lane.b32.xlu1 %v922_v49, %s3427_s2 }
 0x5d8   :  { %v905_v0 = vpop.permute.xlu2 %904 }
 0x5d9   :  { %v924_v3 = vmul.f32 %v3780_v29, %v905_v0 }
 0x5db   :  { %944 = vrot.lane.b32.xlu1 %v924_v3, %s3427_s2 }
 0x5e0   :  { %v911_v16 = vpop.permute.xlu2 %910 }
 0x5e1   :  { %v927_v17 = vmul.f32 %v3784_v2, %v911_v16 }
 0x5e3   :  { %950 = vrot.lane.b32.xlu1 %v927_v17, %s3427_s2  ;;  %v881_v17 = vmul.f32 %v3791_v33, %v3678_v1 }
 0x5e6   :  { %v897_v27 = vpop.permute.xlu0 %896 }
 0x5e7   :  { %v920_v10 = vmul.f32 %v3788_v12, %v897_v27 }
 0x5e9   :  { %v899_v26 = vpop.permute.xlu1 %898  ;;  %936 = vrot.lane.b32.xlu2 %v920_v10, %s3427_s2 }
 0x5ea   :  { %v921_v54 = vmul.f32 %v3791_v33, %v899_v26  ;;  %v886_v26 = vmul.f32 %v3804_v53, %v3697_v19 }
 0x5ec   :  { %938 = vrot.lane.b32.xlu0 %v921_v54, %s3427_s2 }
 0x5ee   :  { %v907_v61 = vpop.permute.xlu0 %906 }
 0x5ef   :  { %v925_v38 = vmul.f32 %v3796_v34, %v907_v61 }
 0x5f1   :  { %946 = vrot.lane.b32.xlu2 %v925_v38, %s3427_s2  ;;  %v903_v44 = vpop.permute.xlu1 %902 }
 0x5f2   :  { %v923_v35 = vmul.f32 %v3800_v39, %v903_v44 }
 0x5f4   :  { %942 = vrot.lane.b32.xlu0 %v923_v35, %s3427_s2 }
 0x5f9   :  { %v909_v49 = vpop.permute.xlu1 %908 }
 0x5fa   :  { %v926_v59 = vmul.f32 %v3804_v53, %v909_v49 }
 0x5fc   :  { %948 = vrot.lane.b32.xlu0 %v926_v59, %s3427_s2 }
 0x643   :  { %v937_v58 = vpop.permute.xlu2 %936 }
 0x644   :  { %v3810_v31 = vadd.f32 %v937_v58, %v880_v56 }
 0x645   :  { %v941_v43 = vpop.permute.xlu1 %940 }
 0x646   :  { %2929 = vtanh.f32 %v3810_v31  ;;  %v3815_v0 = vadd.f32 %v941_v43, %v882_v63 }
 0x648   :  { %2931 = vtanh.f32 %v3815_v0 }
 0x64b   :  { %v947_v3 = vpop.permute.xlu2 %946 }
 0x64c   :  { %v2930_v8 = vpop.eup %2929  ;;  %v3820_v57 = vadd.f32 %v947_v3, %v885_v46 }
 0x64d   :  { %984 = vrot.lane.b32.xlu1 %v2930_v8, %s3420_s26  ;;  %v945_v23 = vpop.permute.xlu1 %944 }
 0x64e   :  { %v2932_v55 = vpop.eup %2931  ;;  %2933 = vtanh.f32 %v3820_v57  ;;  %v3826_v11 = vadd.f32 %v945_v23, %v884_v62 }
 0x64f   :  { %988 = vrot.lane.b32.xlu0 %v2932_v55, %s3420_s26 }
 0x650   :  { %2935 = vtanh.f32 %v3826_v11 }
 0x654   :  { %v2934_v9 = vpop.eup %2933 }
 0x655   :  { %994 = vrot.lane.b32.xlu1 %v2934_v9, %s3420_s26  ;;  %v951_v30 = vpop.permute.xlu1 %950 }
 0x656   :  { %v2936_v7 = vpop.eup %2935  ;;  %v3833_v16 = vadd.f32 %v951_v30, %v887_v6 }
 0x657   :  { %992 = vrot.lane.b32.xlu0 %v2936_v7, %s3420_s26 }
 0x658   :  { %2937 = vtanh.f32 %v3833_v16 }
 0x65e   :  { %v939_v60 = vpop.permute.xlu0 %938  ;;  %v2938_v22 = vpop.eup %2937 }
 0x65f   :  { %v3839_v50 = vadd.f32 %v939_v60, %v881_v17  ;;  %998 = vrot.lane.b32.xlu0 %v2938_v22, %s3420_s26 }
 0x661   :  { %2939 = vtanh.f32 %v3839_v50 }
 0x666   :  { %v943_v10 = vpop.permute.xlu0 %942 }
 0x667   :  { %v2940_v27 = vpop.eup %2939  ;;  %v3845_v45 = vadd.f32 %v943_v10, %v883_v36 }
 0x668   :  { %986 = vrot.lane.b32.xlu2 %v2940_v27, %s3420_s26 }
 0x669   :  { %2941 = vtanh.f32 %v3845_v45 }
 0x66e   :  { %v949_v54 = vpop.permute.xlu0 %948 }
 0x66f   :  { %v2942_v1 = vpop.eup %2941  ;;  %v3852_v61 = vadd.f32 %v949_v54, %v886_v26 }
 0x670   :  { %990 = vrot.lane.b32.xlu2 %v2942_v1, %s3420_s26 }
 0x671   :  { %2943 = vtanh.f32 %v3852_v61 }
 0x677   :  { %v2944_v13 = vpop.eup %2943 }
 0x678   :  { %996 = vrot.lane.b32.xlu2 %v2944_v13, %s3420_s26 }
 0x6bf   :  { %v985_v38 = vpop.permute.xlu1 %984 }
 0x6c0   :  { %v3865_v49 = vmul.f32 %v3788_v12, %v985_v38 }
 0x6c1   :  { %v989_v37 = vpop.permute.xlu0 %988 }
 0x6c2   :  { %v987_v5 = vpop.permute.xlu2 %986  ;;  %v3860_v35 = vmul.f32 %v3776_v21, %v989_v37  ;;  %v1072_v21 = vpack.c.bf16 %v3865_v49, %v3865_v49 }
 0x6c3   :  { %v3857_v44 = vmul.f32 %v3791_v33, %v987_v5 }
 0x6c4   :  { %v1074_v56 = vpack.c.bf16 %v3860_v35, %v3860_v35  ;;  %v1088_v55 = vunpack.c.l.b16 %v1072_v21 }
 0x6c5   :  { %v1073_v19 = vpack.c.bf16 %v3857_v44, %v3857_v44 }
 0x6c6   :  { %v1090_v3 = vunpack.c.l.b16 %v1074_v56 }
 0x6c7   :  { %v1089_v63 = vunpack.c.l.b16 %v1073_v19  ;;  %v995_v33 = vpop.permute.xlu1 %994 }
 0x6c8   :  { %v1098_v9 = vrot.slane %v1090_v3, 6  ;;  %v1066_v3 = vld [vmem:[#allocation2 + $0x13] sm:$0x1] }
 0x6c9   :  { %v993_v59 = vpop.permute.xlu0 %992  ;;  %v1096_v62 = vrot.slane %v1089_v63, 7 }
 0x6ca   :  { %v3870_v58 = vmul.f32 %v3780_v29, %v993_v59  ;;  %v991_v43 = vpop.permute.xlu2 %990  ;;  %v3882_v29 = vmul.f32 %v3796_v34, %v995_v33  ;;  %v1064_v33 = vld [vmem:[#allocation2 + $0x3] sm:$0x1] }
 0x6cb   :  { %v3873_v46 = vmul.f32 %v3800_v39, %v991_v43  ;;  %v1097_v7 = vsel %vm448_vm1, %v1096_v62, %v1088_v55 }
 0x6cc   :  { %v1076_v12 = vpack.c.bf16 %v3870_v58, %v3870_v58  ;;  %v1077_v30 = vpack.c.bf16 %v3882_v29, %v3882_v29  ;;  %v1099_v27 = vsel %vm451_vm2, %v1098_v9, %v1097_v7 }
 0x6cd   :  { %v1075_v8 = vpack.c.bf16 %v3873_v46, %v3873_v46 }
 0x6ce   :  { %v1092_v6 = vunpack.c.l.b16 %v1076_v12  ;;  %v1093_v1 = vunpack.c.l.b16 %v1077_v30  ;;  %v1065_v12 = vld [vmem:[#allocation2 + $0xb] sm:$0x1]  ;;  %v1068_v30 = vld [vmem:[#allocation2 + $0x23] sm:$0x1] }
 0x6cf   :  { %v1091_v23 = vunpack.c.l.b16 %v1075_v8 }
 0x6d0   :  { %v1102_v34 = vrot.slane %v1092_v6, 4  ;;  %v1104_v38 = vrot.slane %v1093_v1, 3 }
 0x6d1   :  { %v999_v39 = vpop.permute.xlu0 %998  ;;  %v1100_v17 = vrot.slane %v1091_v23, 5 }
 0x6d2   :  { %v3888_v60 = vmul.f32 %v3784_v2, %v999_v39  ;;  %v997_v36 = vpop.permute.xlu2 %996  ;;  %v1069_v39 = vld [vmem:[#allocation2 + $0x2b] sm:$0x1] }
 0x6d3   :  { %v3894_v10 = vmul.f32 %v3804_v53, %v997_v36  ;;  %v1101_v26 = vsel %vm454_vm3, %v1100_v17, %v1099_v27 }
 0x6d4   :  { %v1079_v22 = vpack.c.bf16 %v3888_v60, %v3888_v60  ;;  %v1103_v2 = vsel %vm457_vm4, %v1102_v34, %v1101_v26  ;;  %v1067_v34 = vld [vmem:[#allocation2 + $0x1b] sm:$0x1] }
 0x6d5   :  { %v1078_v13 = vpack.c.bf16 %v3894_v10, %v3894_v10  ;;  %v1105_v59 = vsel %vm460_vm5, %v1104_v38, %v1103_v2  ;;  %v1071_v2 = vld [vmem:[#allocation2 + $0x3b] sm:$0x1] }
 0x6d6   :  { %v1095_v54 = vunpack.c.l.b16 %v1079_v22 }
 0x6d7   :  { %v1094_v37 = vunpack.c.l.b16 %v1078_v13 }
 0x6d8   :  { %v1108_v5 = vrot.slane %v1095_v54, 1 }
 0x6d9   :  { %v1106_v19 = vrot.slane %v1094_v37, 2 }
 0x6db   :  { %v1107_v56 = vsel %vm463_vm6, %v1106_v19, %v1105_v59  ;;  %v1070_v59 = vld [vmem:[#allocation2 + $0x33] sm:$0x1] }
 0x6dc   :  { %v1109_v53 = vsel %vm466_vm7, %v1108_v5, %v1107_v56 }
 0x6dd   :  { %v1110_v63 = vpack.c.b16 %v1109_v53, %v1109_v53 }
 0x6df   :  { %1111 = vrot.lane.b32.xlu1 %v1110_v63, %s3427_s2 }
 0x751   :  { %v1112_v43 = vpop.permute.xlu1 %1111 }
 0x752   :  { %2735 = vmatmul.msk.bf16.vlgmr.msra.gmra.mxu3 %vm108_vm0, %v1112_v43 }
 0x7d5   :  { %v1125_v21 = vpop.f32.mrf.mxu3 }
 0x7d6   :  { %v1145_v8 = vadd.f32 %v1125_v21, %v1064_v33  ;;  %v1131_v62 = vrot.slane %v1125_v21, 2  ;;  %v1130_v23 = vrot.slane %v1125_v21, 1  ;;  %v1134_v6 = vrot.slane %v1125_v21, 5 }
 0x7d7   :  { %v1133_v7 = vrot.slane %v1125_v21, 4  ;;  %v1132_v22 = vrot.slane %v1125_v21, 3  ;;  %v1136_v37 = vrot.slane %v1125_v21, 7  ;;  %v1135_v5 = vrot.slane %v1125_v21, 6 }
 0x7d8   :  { %2945 = vtanh.f32 %v1145_v8  ;;  %v1147_v55 = vadd.f32 %v1131_v62, %v1066_v3  ;;  %v1146_v9 = vadd.f32 %v1130_v23, %v1065_v12  ;;  %v1150_v17 = vadd.f32 %v1134_v6, %v1069_v39 }
 0x7d9   :  { %v1149_v1 = vadd.f32 %v1133_v7, %v1068_v30  ;;  %v1148_v54 = vadd.f32 %v1132_v22, %v1067_v34  ;;  %v1152_v19 = vadd.f32 %v1136_v37, %v1071_v2  ;;  %v1151_v63 = vadd.f32 %v1135_v5, %v1070_v59 }
 0x7da   :  { %2947 = vtanh.f32 %v1147_v55  ;;  %v1154_v21 = vsub.f32 0.0, %v1146_v9  ;;  %v1153_v7 = vsub.f32 0.0, %v1145_v8  ;;  %v1155_v22 = vsub.f32 0.0, %v1147_v55 }
 0x7db   :  { %2949 = vtanh.f32 %v1146_v9  ;;  %v1156_v12 = vsub.f32 0.0, %v1148_v54  ;;  %v1159_v39 = vsub.f32 0.0, %v1151_v63  ;;  %v1157_v8 = vsub.f32 0.0, %v1149_v1 }
 0x7dc   :  { %2951 = vtanh.f32 %v1150_v17  ;;  %v1163_v3 = vmul.f32 1.442695, %v1154_v21  ;;  %v1161_v34 = vmul.f32 1.442695, %v1153_v7  ;;  %v1160_v21 = vsub.f32 0.0, %v1152_v19 }
 0x7dd   :  { %v1127_v36 = vpop.f32.mrf.mxu3  ;;  %2953 = vtanh.f32 %v1149_v1  ;;  %v1167_v62 = vmul.f32 1.442695, %v1156_v12  ;;  %v1169_v5 = vmul.f32 1.442695, %v1157_v8 }
 0x7de   :  { %v2946_v27 = vpop.eup %2945  ;;  %2955 = vtanh.f32 %v1148_v54  ;;  %v1173_v36 = vmul.f32 1.442695, %v1159_v39  ;;  %v1158_v54 = vsub.f32 0.0, %v1150_v17 }
 0x7df   :  { %1217 = vrot.lane.b32.xlu1 %v2946_v27, %s3420_s26  ;;  %2957 = vtanh.f32 %v1152_v19 }
 0x7e0   :  { %v2948_v26 = vpop.eup %2947  ;;  %2959 = vtanh.f32 %v1151_v63 }
 0x7e1   :  { %v2950_v13 = vpop.eup %2949  ;;  %1221 = vrot.lane.b32.xlu0 %v2948_v26, %s3420_s26  ;;  %2961 = vpow2.f32 %v1163_v3  ;;  %v1175_v3 = vmul.f32 1.442695, %v1160_v21 }
 0x7e2   :  { %1219 = vrot.lane.b32.xlu2 %v2950_v13, %s3420_s26  ;;  %v2952_v38 = vpop.eup %2951  ;;  %2963 = vpow2.f32 %v1167_v62  ;;  %v1165_v13 = vmul.f32 1.442695, %v1155_v22 }
 0x7e3   :  { %v2954_v56 = vpop.eup %2953 }
 0x7e4   :  { %v2956_v53 = vpop.eup %2955 }
 0x7e5   :  { %v2958_v43 = vpop.eup %2957 }
 0x7e6   :  { %v2960_v33 = vpop.eup %2959 }
 0x7e7   :  { %1227 = vrot.lane.b32.xlu1 %v2952_v38, %s3420_s26  ;;  %v2962_v23 = vpop.eup %2961  ;;  %v1171_v38 = vmul.f32 1.442695, %v1158_v54 }
 0x7e8   :  { %v1178_v6 = vadd.f32 1.0, %v2962_v23  ;;  %v2964_v30 = vpop.eup %2963 }
 0x7e9   :  { %1225 = vrot.lane.b32.xlu0 %v2954_v56, %s3420_s26  ;;  %v1180_v27 = vadd.f32 1.0, %v2964_v30 }
 0x7ea   :  { %1223 = vrot.lane.b32.xlu2 %v2956_v53, %s3420_s26  ;;  %2965 = vrcp.f32 %v1178_v6 }
 0x7eb   :  { %2967 = vpow2.f32 %v1173_v36 }
 0x7ec   :  { %2969 = vpow2.f32 %v1161_v34 }
 0x7ed   :  { %2971 = vrcp.f32 %v1180_v27 }
 0x7ee   :  { %2973 = vpow2.f32 %v1165_v13 }
 0x7ef   :  { %2975 = vpow2.f32 %v1171_v38 }
 0x7f0   :  { %v3913_v26 = vpop.eup %2965  ;;  %2977 = vpow2.f32 %v1169_v5 }
 0x7f1   :  { %1231 = vrot.lane.b32.xlu0 %v2958_v43, %s3420_s26  ;;  %v2968_v2 = vpop.eup %2967 }
 0x7f2   :  { %1229 = vrot.lane.b32.xlu2 %v2960_v33, %s3420_s26  ;;  %v2970_v55 = vpop.eup %2969  ;;  %v1183_v56 = vadd.f32 1.0, %v2968_v2 }
 0x7f3   :  { %v3917_v59 = vpop.eup %2971  ;;  %v1177_v33 = vadd.f32 1.0, %v2970_v55 }
 0x7f4   :  { %v2974_v63 = vpop.eup %2973  ;;  %2979 = vrcp.f32 %v1183_v56 }
 0x7f5   :  { %v1179_v17 = vadd.f32 1.0, %v2974_v63  ;;  %2981 = vrcp.f32 %v1177_v33  ;;  %v2976_v1 = vpop.eup %2975  ;;  %v1202_v33 = vmul.f32 %v3913_v26, %v3839_v50 }
 0x7f6   :  { %v2978_v12 = vpop.eup %2977  ;;  %v1182_v23 = vadd.f32 1.0, %v2976_v1 }
 0x7f7   :  { %2983 = vrcp.f32 %v1179_v17  ;;  %v1181_v30 = vadd.f32 1.0, %v2978_v12 }
 0x7f8   :  { %2985 = vpow2.f32 %v1175_v3 }
 0x7f9   :  { %2987 = vrcp.f32 %v1182_v23 }
 0x7fa   :  { %v3921_v62 = vpop.eup %2979  ;;  %2989 = vrcp.f32 %v1181_v30 }
 0x7fb   :  { %v3924_v7 = vpop.eup %2981 }
 0x7fd   :  { %v3928_v36 = vpop.eup %2983 }
 0x7fe   :  { %v2986_v13 = vpop.eup %2985  ;;  %v1203_v63 = vmul.f32 %v3928_v36, %v3815_v0  ;;  %v1204_v0 = vmul.f32 %v3917_v59, %v3845_v45 }
 0x7ff   :  { %v1184_v54 = vadd.f32 1.0, %v2986_v13 }
 0x801   :  { %2991 = vrcp.f32 %v1184_v54 }
 0x83c   :  { %v1220_v9 = vpop.permute.xlu2 %1219 }
 0x83d   :  { %v1242_v37 = vmul.f32 %v3913_v26, %v1220_v9  ;;  %v3933_v9 = vpop.eup %2987 }
 0x83e   :  { %v3936_v2 = vpop.eup %2989 }
 0x83f   :  { %1259 = vrot.lane.b32.xlu1 %v1242_v37, %s3427_s2  ;;  %v3941_v5 = vpop.eup %2991  ;;  %v1205_v3 = vmul.f32 %v3936_v2, %v3826_v11 }
 0x840   :  { %v1208_v11 = vmul.f32 %v3941_v5, %v3833_v16  ;;  %v1201_v16 = vmul.f32 %v3924_v7, %v3810_v31 }
 0x844   :  { %v1224_v53 = vpop.permute.xlu2 %1223 }
 0x845   :  { %v1244_v43 = vmul.f32 %v3917_v59, %v1224_v53 }
 0x847   :  { %1263 = vrot.lane.b32.xlu1 %v1244_v43, %s3427_s2 }
 0x84c   :  { %v1230_v6 = vpop.permute.xlu2 %1229 }
 0x84d   :  { %v1247_v39 = vmul.f32 %v3921_v62, %v1230_v6 }
 0x84f   :  { %1269 = vrot.lane.b32.xlu1 %v1247_v39, %s3427_s2 }
 0x851   :  { %v1218_v22 = vpop.permute.xlu1 %1217 }
 0x852   :  { %v1241_v19 = vmul.f32 %v3924_v7, %v1218_v22 }
 0x853   :  { %v1222_v34 = vpop.permute.xlu0 %1221 }
 0x854   :  { %v1243_v27 = vmul.f32 %v3928_v36, %v1222_v34  ;;  %1257 = vrot.lane.b32.xlu0 %v1241_v19, %s3427_s2 }
 0x856   :  { %1261 = vrot.lane.b32.xlu2 %v1243_v27, %s3427_s2  ;;  %v1207_v27 = vmul.f32 %v3921_v62, %v3852_v61 }
 0x859   :  { %v1228_v37 = vpop.permute.xlu1 %1227 }
 0x85a   :  { %v1246_v8 = vmul.f32 %v3933_v9, %v1228_v37 }
 0x85b   :  { %v1226_v38 = vpop.permute.xlu0 %1225 }
 0x85c   :  { %v1245_v55 = vmul.f32 %v3936_v2, %v1226_v38  ;;  %1267 = vrot.lane.b32.xlu0 %v1246_v8, %s3427_s2 }
 0x85e   :  { %1265 = vrot.lane.b32.xlu2 %v1245_v55, %s3427_s2  ;;  %v1206_v55 = vmul.f32 %v3933_v9, %v3820_v57 }
 0x863   :  { %v1232_v56 = vpop.permute.xlu0 %1231 }
 0x864   :  { %v1248_v53 = vmul.f32 %v3941_v5, %v1232_v56 }
 0x866   :  { %1271 = vrot.lane.b32.xlu2 %v1248_v53, %s3427_s2 }
 0x8b0   :  { %v1262_v43 = vpop.permute.xlu2 %1261 }
 0x8b1   :  { %v3949_v17 = vadd.f32 %v1262_v43, %v1203_v63  ;;  %v1260_v21 = vpop.permute.xlu1 %1259 }
 0x8b2   :  { %v3951_v1 = vadd.f32 %v1260_v21, %v1202_v33 }
 0x8b3   :  { %2993 = vtanh.f32 %v3949_v17 }
 0x8b4   :  { %2995 = vtanh.f32 %v3951_v1 }
 0x8b8   :  { %v1266_v12 = vpop.permute.xlu2 %1265 }
 0x8b9   :  { %v2994_v23 = vpop.eup %2993  ;;  %v3957_v6 = vadd.f32 %v1266_v12, %v1205_v3  ;;  %v1264_v39 = vpop.permute.xlu1 %1263 }
 0x8ba   :  { %v2996_v50 = vpop.eup %2995  ;;  %1309 = vrot.lane.b32.xlu1 %v2994_v23, %s3420_s26  ;;  %v3963_v30 = vadd.f32 %v1264_v39, %v1204_v0 }
 0x8bb   :  { %2997 = vtanh.f32 %v3957_v6  ;;  %1307 = vrot.lane.b32.xlu0 %v2996_v50, %s3420_s26 }
 0x8bc   :  { %2999 = vtanh.f32 %v3963_v30 }
 0x8c0   :  { %v1272_v19 = vpop.permute.xlu2 %1271 }
 0x8c1   :  { %v2998_v22 = vpop.eup %2997  ;;  %v3969_v34 = vadd.f32 %v1272_v19, %v1208_v11  ;;  %v1270_v13 = vpop.permute.xlu1 %1269 }
 0x8c2   :  { %1313 = vrot.lane.b32.xlu1 %v2998_v22, %s3420_s26  ;;  %v3000_v45 = vpop.eup %2999  ;;  %v3976_v37 = vadd.f32 %v1270_v13, %v1207_v27 }
 0x8c3   :  { %3001 = vtanh.f32 %v3969_v34  ;;  %1311 = vrot.lane.b32.xlu0 %v3000_v45, %s3420_s26 }
 0x8c4   :  { %3003 = vtanh.f32 %v3976_v37 }
 0x8c6   :  { %v1258_v54 = vpop.permute.xlu0 %1257 }
 0x8c7   :  { %v3981_v8 = vadd.f32 %v1258_v54, %v1201_v16 }
 0x8c9   :  { %3005 = vtanh.f32 %v3981_v8  ;;  %v3002_v38 = vpop.eup %3001 }
 0x8ca   :  { %1319 = vrot.lane.b32.xlu1 %v3002_v38, %s3420_s26  ;;  %v3004_v61 = vpop.eup %3003 }
 0x8cb   :  { %1317 = vrot.lane.b32.xlu0 %v3004_v61, %s3420_s26 }
 0x8ce   :  { %v1268_v56 = vpop.permute.xlu0 %1267 }
 0x8cf   :  { %v3006_v53 = vpop.eup %3005  ;;  %v3988_v63 = vadd.f32 %v1268_v56, %v1206_v55 }
 0x8d0   :  { %1305 = vrot.lane.b32.xlu2 %v3006_v53, %s3420_s26 }
 0x8d1   :  { %3007 = vtanh.f32 %v3988_v63 }
 0x8d7   :  { %v3008_v31 = vpop.eup %3007 }
 0x8d8   :  { %1315 = vrot.lane.b32.xlu2 %v3008_v31, %s3420_s26 }
 0x92a   :  { %v1306_v33 = vpop.permute.xlu2 %1305 }
 0x92b   :  { %v4002_v23 = vmul.f32 %v3924_v7, %v1306_v33 }
 0x92c   :  { %v1310_v43 = vpop.permute.xlu1 %1309 }
 0x92d   :  { %v1308_v21 = vpop.permute.xlu0 %1307  ;;  %v3997_v57 = vmul.f32 %v3928_v36, %v1310_v43  ;;  %v1393_v36 = vpack.c.bf16 %v4002_v23, %v4002_v23 }
 0x92e   :  { %v3994_v3 = vmul.f32 %v3913_v26, %v1308_v21 }
 0x92f   :  { %v1395_v50 = vpack.c.bf16 %v3997_v57, %v3997_v57  ;;  %v1409_v54 = vunpack.c.l.b16 %v1393_v36 }
 0x930   :  { %v1394_v12 = vpack.c.bf16 %v3994_v3, %v3994_v3 }
 0x931   :  { %v1411_v45 = vunpack.c.l.b16 %v1395_v50 }
 0x932   :  { %v1410_v11 = vunpack.c.l.b16 %v1394_v12  ;;  %v1316_v26 = vpop.permute.xlu2 %1315 }
 0x933   :  { %v1419_v38 = vrot.slane %v1411_v45, 6 }
 0x934   :  { %v1314_v0 = vpop.permute.xlu1 %1313  ;;  %v1417_v13 = vrot.slane %v1410_v11, 7 }
 0x935   :  { %v4007_v39 = vmul.f32 %v3936_v2, %v1314_v0  ;;  %v1312_v22 = vpop.permute.xlu0 %1311  ;;  %v4019_v2 = vmul.f32 %v3933_v9, %v1316_v26 }
 0x936   :  { %v4010_v19 = vmul.f32 %v3917_v59, %v1312_v22  ;;  %v1418_v55 = vsel %vm448_vm1, %v1417_v13, %v1409_v54 }
 0x937   :  { %v1397_v7 = vpack.c.bf16 %v4007_v39, %v4007_v39  ;;  %v1398_v56 = vpack.c.bf16 %v4019_v2, %v4019_v2  ;;  %v1420_v21 = vsel %vm451_vm2, %v1419_v38, %v1418_v55  ;;  %v1385_v38 = vld [vmem:[#allocation2 + $0x4] sm:$0x1]  ;;  %v1386_v55 = vld [vmem:[#allocation2 + $0xc] sm:$0x1] }
 0x938   :  { %v1396_v27 = vpack.c.bf16 %v4010_v19, %v4010_v19 }
 0x939   :  { %v1413_v61 = vunpack.c.l.b16 %v1397_v7  ;;  %v1414_v0 = vunpack.c.l.b16 %v1398_v56 }
 0x93a   :  { %v1412_v16 = vunpack.c.l.b16 %v1396_v27 }
 0x93b   :  { %v1423_v9 = vrot.slane %v1413_v61, 4  ;;  %v1425_v36 = vrot.slane %v1414_v0, 3  ;;  %v1390_v0 = vld [vmem:[#allocation2 + $0x2c] sm:$0x1] }
 0x93c   :  { %v1320_v59 = vpop.permute.xlu1 %1319  ;;  %v1421_v53 = vrot.slane %v1412_v16, 5 }
 0x93d   :  { %v4025_v31 = vmul.f32 %v3941_v5, %v1320_v59  ;;  %v1318_v33 = vpop.permute.xlu0 %1317  ;;  %v1387_v59 = vld [vmem:[#allocation2 + $0x14] sm:$0x1] }
 0x93e   :  { %v4031_v12 = vmul.f32 %v3921_v62, %v1318_v33  ;;  %v1422_v50 = vsel %vm454_vm3, %v1421_v53, %v1420_v21 }
 0x93f   :  { %4824 = vst [vmem:[#allocation18_spill] sm:$0xff] %v4025_v31  ;;  %v1400_v43 = vpack.c.bf16 %v4025_v31, %v4025_v31  ;;  %v1424_v5 = vsel %vm457_vm4, %v1423_v9, %v1422_v50 }
 0x940   :  { %v1399_v22 = vpack.c.bf16 %v4031_v12, %v4031_v12  ;;  %v1426_v27 = vsel %vm460_vm5, %v1425_v36, %v1424_v5  ;;  %v1388_v36 = vld [vmem:[#allocation2 + $0x1c] sm:$0x1] }
 0x941   :  { %v1416_v11 = vunpack.c.l.b16 %v1400_v43 }
 0x942   :  { %v1415_v26 = vunpack.c.l.b16 %v1399_v22 }
 0x943   :  { %v1429_v45 = vrot.slane %v1416_v11, 1  ;;  %v1389_v11 = vld [vmem:[#allocation2 + $0x24] sm:$0x1] }
 0x944   :  { %v1427_v7 = vrot.slane %v1415_v26, 2 }
 0x946   :  { %v1428_v13 = vsel %vm463_vm6, %v1427_v7, %v1426_v27 }
 0x947   :  { %v1430_v62 = vsel %vm466_vm7, %v1429_v45, %v1428_v13 }
 0x948   :  { %v1431_v16 = vpack.c.b16 %v1430_v62, %v1430_v62 }
 0x94a   :  { %1432 = vrot.lane.b32.xlu2 %v1431_v16, %s3427_s2 }
 0x9a4   :  { %v1433_v54 = vpop.permute.xlu2 %1432 }
 0x9a5   :  { %2736 = vmatmul.msk.bf16.vlgmr.msrb.gmra.mxu0 %vm108_vm0, %v1433_v54  ;;  %v1392_v54 = vld [vmem:[#allocation2 + $0x3c] sm:$0x1] }
 0xa22   :  { %v1446_v61 = vpop.f32.mrf.mxu0 }
 0xa23   :  { %v1466_v56 = vadd.f32 %v1446_v61, %v1385_v38  ;;  %v1452_v53 = vrot.slane %v1446_v61, 2  ;;  %v1451_v43 = vrot.slane %v1446_v61, 1  ;;  %v1455_v21 = vrot.slane %v1446_v61, 5 }
 0xa24   :  { %v1454_v50 = vrot.slane %v1446_v61, 4  ;;  %v1453_v26 = vrot.slane %v1446_v61, 3  ;;  %v1457_v16 = vrot.slane %v1446_v61, 7 }
 0xa25   :  { %3009 = vtanh.f32 %v1466_v56  ;;  %v1468_v33 = vadd.f32 %v1452_v53, %v1387_v59  ;;  %v1467_v9 = vadd.f32 %v1451_v43, %v1386_v55  ;;  %v1471_v22 = vadd.f32 %v1455_v21, %v1390_v0  ;;  %v1391_v53 = vld [vmem:[#allocation2 + $0x34] sm:$0x1] }
 0xa26   :  { %v1470_v7 = vadd.f32 %v1454_v50, %v1389_v11  ;;  %v1469_v13 = vadd.f32 %v1453_v26, %v1388_v36  ;;  %v1456_v59 = vrot.slane %v1446_v61, 6  ;;  %v1473_v55 = vadd.f32 %v1457_v16, %v1392_v54 }
 0xa27   :  { %3011 = vtanh.f32 %v1468_v33  ;;  %v1474_v61 = vsub.f32 0.0, %v1466_v56  ;;  %v1476_v54 = vsub.f32 0.0, %v1468_v33 }
 0xa28   :  { %3013 = vtanh.f32 %v1467_v9  ;;  %v1472_v0 = vadd.f32 %v1456_v59, %v1391_v53  ;;  %v1475_v59 = vsub.f32 0.0, %v1467_v9 }
 0xa29   :  { %3015 = vtanh.f32 %v1471_v22  ;;  %v1482_v26 = vmul.f32 1.442695, %v1474_v61  ;;  %v1477_v61 = vsub.f32 0.0, %v1469_v13 }
 0xa2a   :  { %v1448_v5 = vpop.f32.mrf.mxu0  ;;  %3017 = vtanh.f32 %v1470_v7  ;;  %v1484_v56 = vmul.f32 1.442695, %v1475_v59 }
 0xa2b   :  { %v3010_v45 = vpop.eup %3009  ;;  %3019 = vtanh.f32 %v1469_v13  ;;  %v1479_v5 = vsub.f32 0.0, %v1471_v22  ;;  %v1478_v22 = vsub.f32 0.0, %v1470_v7 }
 0xa2c   :  { %1538 = vrot.lane.b32.xlu2 %v3010_v45, %s3420_s26  ;;  %3021 = vtanh.f32 %v1473_v55 }
 0xa2d   :  { %v3012_v27 = vpop.eup %3011  ;;  %3023 = vtanh.f32 %v1472_v0  ;;  %v1492_v36 = vmul.f32 1.442695, %v1479_v5  ;;  %v1488_v5 = vmul.f32 1.442695, %v1477_v61 }
 0xa2e   :  { %v3014_v62 = vpop.eup %3013  ;;  %1542 = vrot.lane.b32.xlu1 %v3012_v27, %s3420_s26  ;;  %3025 = vpow2.f32 %v1482_v26  ;;  %v1490_v26 = vmul.f32 1.442695, %v1478_v22 }
 0xa2f   :  { %1540 = vrot.lane.b32.xlu0 %v3014_v62, %s3420_s26  ;;  %v3016_v38 = vpop.eup %3015  ;;  %3027 = vpow2.f32 %v1492_v36 }
 0xa30   :  { %v3018_v43 = vpop.eup %3017 }
 0xa31   :  { %v3020_v21 = vpop.eup %3019 }
 0xa32   :  { %v3022_v50 = vpop.eup %3021 }
 0xa33   :  { %v3024_v11 = vpop.eup %3023 }
 0xa34   :  { %1548 = vrot.lane.b32.xlu2 %v3016_v38, %s3420_s26  ;;  %v3026_v45 = vpop.eup %3025 }
 0xa35   :  { %v1498_v27 = vadd.f32 1.0, %v3026_v45  ;;  %v3028_v62 = vpop.eup %3027 }
 0xa36   :  { %1546 = vrot.lane.b32.xlu1 %v3018_v43, %s3420_s26  ;;  %v1503_v16 = vadd.f32 1.0, %v3028_v62 }
 0xa37   :  { %1544 = vrot.lane.b32.xlu0 %v3020_v21, %s3420_s26  ;;  %3029 = vrcp.f32 %v1498_v27  ;;  %v1486_v21 = vmul.f32 1.442695, %v1476_v54  ;;  %v1481_v27 = vsub.f32 0.0, %v1473_v55 }
 0xa38   :  { %3031 = vrcp.f32 %v1503_v16  ;;  %v1480_v16 = vsub.f32 0.0, %v1472_v0 }
 0xa39   :  { %3033 = vpow2.f32 %v1486_v21  ;;  %v1496_v7 = vmul.f32 1.442695, %v1481_v27 }
 0xa3a   :  { %3035 = vpow2.f32 %v1484_v56  ;;  %v1494_v13 = vmul.f32 1.442695, %v1480_v16 }
 0xa3b   :  { %3037 = vpow2.f32 %v1490_v26 }
 0xa3c   :  { %3039 = vpow2.f32 %v1488_v5 }
 0xa3d   :  { %v4050_v38 = vpop.eup %3029 }
 0xa3e   :  { %1552 = vrot.lane.b32.xlu1 %v3022_v50, %s3420_s26  ;;  %v4054_v50 = vpop.eup %3031 }
 0xa3f   :  { %1550 = vrot.lane.b32.xlu0 %v3024_v11, %s3420_s26  ;;  %v3034_v9 = vpop.eup %3033 }
 0xa40   :  { %v3036_v36 = vpop.eup %3035  ;;  %v1500_v45 = vadd.f32 1.0, %v3034_v9 }
 0xa41   :  { %v1499_v62 = vadd.f32 1.0, %v3036_v36  ;;  %v3038_v54 = vpop.eup %3037 }
 0xa42   :  { %3041 = vrcp.f32 %v1500_v45  ;;  %v3040_v59 = vpop.eup %3039 }
 0xa43   :  { %3043 = vrcp.f32 %v1499_v62  ;;  %v1501_v21 = vadd.f32 1.0, %v3040_v59 }
 0xa44   :  { %3045 = vpow2.f32 %v1496_v7 }
 0xa45   :  { %3047 = vpow2.f32 %v1494_v13 }
 0xa86   :  { %v1539_v53 = vpop.permute.xlu2 %1538 }
 0xa87   :  { %v1562_v43 = vmul.f32 %v4050_v38, %v1539_v53  ;;  %v1502_v53 = vadd.f32 1.0, %v3038_v54 }
 0xa89   :  { %1578 = vrot.lane.b32.xlu1 %v1562_v43, %s3427_s2  ;;  %v4058_v43 = vpop.eup %3041  ;;  %3049 = vrcp.f32 %v1502_v53 }
 0xa8a   :  { %v4060_v22 = vpop.eup %3043  ;;  %3051 = vrcp.f32 %v1501_v21 }
 0xa8b   :  { %v3046_v61 = vpop.eup %3045 }
 0xa8c   :  { %v1505_v26 = vadd.f32 1.0, %v3046_v61 }
 0xa8e   :  { %v1549_v11 = vpop.permute.xlu2 %1548  ;;  %3053 = vrcp.f32 %v1505_v26  ;;  %v1527_v26 = vmul.f32 %v4054_v50, %v3988_v63 }
 0xa8f   :  { %v1567_v33 = vmul.f32 %v4054_v50, %v1549_v11 }
 0xa91   :  { %1588 = vrot.lane.b32.xlu1 %v1567_v33, %s3427_s2  ;;  %v3048_v33 = vpop.eup %3047 }
 0xa92   :  { %v4066_v9 = vpop.eup %3049  ;;  %v1504_v27 = vadd.f32 1.0, %v3048_v33 }
 0xa93   :  { %v4069_v45 = vpop.eup %3051 }
 0xa94   :  { %3055 = vrcp.f32 %v1504_v27  ;;  %v4074_v7 = vpop.eup %3053 }
 0xa9a   :  { %v4077_v13 = vpop.eup %3055 }
 0xaa0   :  { %v1543_v56 = vpop.permute.xlu1 %1542 }
 0xaa1   :  { %v1564_v55 = vmul.f32 %v4058_v43, %v1543_v56  ;;  %v1541_v11 = vpop.permute.xlu0 %1540  ;;  %v1522_v56 = vmul.f32 %v4050_v38, %v3981_v8 }
 0xaa2   :  { %v1563_v0 = vmul.f32 %v4060_v22, %v1541_v11 }
 0xaa3   :  { %1582 = vrot.lane.b32.xlu0 %v1564_v55, %s3427_s2 }
 0xaa4   :  { %1580 = vrot.lane.b32.xlu2 %v1563_v0, %s3427_s2  ;;  %v1523_v0 = vmul.f32 %v4060_v22, %v3951_v1  ;;  %v1525_v1 = vmul.f32 %v4069_v45, %v3963_v30  ;;  %v1524_v30 = vmul.f32 %v4058_v43, %v3949_v17  ;;  %v1529_v17 = vmul.f32 %v4074_v7, %v3969_v34 }
 0xaa8   :  { %v1547_v5 = vpop.permute.xlu1 %1546 }
 0xaa9   :  { %v1566_v36 = vmul.f32 %v4066_v9, %v1547_v5  ;;  %v1545_v62 = vpop.permute.xlu0 %1544 }
 0xaaa   :  { %v1565_v16 = vmul.f32 %v4069_v45, %v1545_v62 }
 0xaab   :  { %1586 = vrot.lane.b32.xlu0 %v1566_v36, %s3427_s2 }
 0xaac   :  { %1584 = vrot.lane.b32.xlu2 %v1565_v16, %s3427_s2 }
 0xab0   :  { %v1553_v54 = vpop.permute.xlu1 %1552 }
 0xab1   :  { %v1569_v59 = vmul.f32 %v4074_v7, %v1553_v54  ;;  %v1551_v53 = vpop.permute.xlu0 %1550 }
 0xab2   :  { %v1568_v21 = vmul.f32 %v4077_v13, %v1551_v53 }
 0xab3   :  { %1592 = vrot.lane.b32.xlu0 %v1569_v59, %s3427_s2  ;;  %v1528_v59 = vmul.f32 %v4077_v13, %v3976_v37  ;;  %v1526_v37 = vmul.f32 %v4066_v9, %v3957_v6 }
 0xab4   :  { %1590 = vrot.lane.b32.xlu2 %v1568_v21, %s3427_s2 }
 0xafb   :  { %v1579_v55 = vpop.permute.xlu1 %1578 }
 0xafc   :  { %v4084_v11 = vadd.f32 %v1579_v55, %v1522_v56 }
 0xafe   :  { %3057 = vtanh.f32 %v4084_v11  ;;  %v1581_v61 = vpop.permute.xlu2 %1580 }
 0xaff   :  { %v4089_v33 = vadd.f32 %v1581_v61, %v1523_v0 }
 0xb01   :  { %3059 = vtanh.f32 %v4089_v33 }
 0xb03   :  { %v1589_v5 = vpop.permute.xlu1 %1588 }
 0xb04   :  { %v3058_v36 = vpop.eup %3057  ;;  %v4094_v27 = vadd.f32 %v1589_v5, %v1527_v26 }
 0xb05   :  { %1626 = vrot.lane.b32.xlu0 %v3058_v36, %s3420_s26 }
 0xb06   :  { %3061 = vtanh.f32 %v4094_v27  ;;  %v1585_v62 = vpop.permute.xlu2 %1584 }
 0xb07   :  { %v3060_v8 = vpop.eup %3059  ;;  %v4100_v16 = vadd.f32 %v1585_v62, %v1525_v1 }
 0xb08   :  { %1628 = vrot.lane.b32.xlu1 %v3060_v8, %s3420_s26 }
 0xb09   :  { %3063 = vtanh.f32 %v4100_v16 }
 0xb0c   :  { %v3062_v63 = vpop.eup %3061 }
 0xb0d   :  { %1636 = vrot.lane.b32.xlu0 %v3062_v63, %s3420_s26 }
 0xb0e   :  { %v1591_v53 = vpop.permute.xlu2 %1590 }
 0xb0f   :  { %v3064_v54 = vpop.eup %3063  ;;  %v4108_v21 = vadd.f32 %v1591_v53, %v1528_v59 }
 0xb10   :  { %1632 = vrot.lane.b32.xlu1 %v3064_v54, %s3420_s26 }
 0xb11   :  { %3065 = vtanh.f32 %v4108_v21 }
 0xb15   :  { %v1583_v56 = vpop.permute.xlu0 %1582 }
 0xb16   :  { %v4113_v55 = vadd.f32 %v1583_v56, %v1524_v30 }
 0xb17   :  { %v3066_v0 = vpop.eup %3065 }
 0xb18   :  { %3067 = vtanh.f32 %v4113_v55  ;;  %1638 = vrot.lane.b32.xlu1 %v3066_v0, %s3420_s26 }
 0xb1d   :  { %v1587_v61 = vpop.permute.xlu0 %1586 }
 0xb1e   :  { %v3068_v26 = vpop.eup %3067  ;;  %v4119_v5 = vadd.f32 %v1587_v61, %v1526_v37 }
 0xb1f   :  { %1630 = vrot.lane.b32.xlu2 %v3068_v26, %s3420_s26 }
 0xb20   :  { %3069 = vtanh.f32 %v4119_v5 }
 0xb25   :  { %v1593_v1 = vpop.permute.xlu0 %1592 }
 0xb26   :  { %v3070_v36 = vpop.eup %3069  ;;  %v4125_v8 = vadd.f32 %v1593_v1, %v1529_v17 }
 0xb27   :  { %1634 = vrot.lane.b32.xlu2 %v3070_v36, %s3420_s26 }
 0xb28   :  { %3071 = vtanh.f32 %v4125_v8 }
 0xb2e   :  { %v3072_v6 = vpop.eup %3071 }
 0xb2f   :  { %1640 = vrot.lane.b32.xlu2 %v3072_v6, %s3420_s26 }
 0xb77   :  { %v1627_v63 = vpop.permute.xlu0 %1626 }
 0xb78   :  { %v4139_v30 = vmul.f32 %v4050_v38, %v1627_v63 }
 0xb79   :  { %v1631_v62 = vpop.permute.xlu2 %1630 }
 0xb7a   :  { %v1629_v54 = vpop.permute.xlu1 %1628  ;;  %v4134_v53 = vmul.f32 %v4058_v43, %v1631_v62  ;;  %v1714_v43 = vpack.c.bf16 %v4139_v30, %v4139_v30 }
 0xb7b   :  { %v4131_v59 = vmul.f32 %v4060_v22, %v1629_v54 }
 0xb7c   :  { %4825 = vst [vmem:[#allocation19_spill] sm:$0xff] %v4134_v53  ;;  %v1716_v0 = vpack.c.bf16 %v4134_v53, %v4134_v53  ;;  %v1730_v63 = vunpack.c.l.b16 %v1714_v43 }
 0xb7d   :  { %v1715_v34 = vpack.c.bf16 %v4131_v59, %v4131_v59 }
 0xb7e   :  { %v1732_v36 = vunpack.c.l.b16 %v1716_v0 }
 0xb7f   :  { %v1731_v61 = vunpack.c.l.b16 %v1715_v34  ;;  %v1637_v22 = vpop.permute.xlu0 %1636 }
 0xb80   :  { %v1740_v54 = vrot.slane %v1732_v36, 6 }
 0xb81   :  { %v1635_v56 = vpop.permute.xlu2 %1634  ;;  %v1738_v6 = vrot.slane %v1731_v61, 7 }
 0xb82   :  { %v4144_v37 = vmul.f32 %v4066_v9, %v1635_v56  ;;  %v1633_v26 = vpop.permute.xlu1 %1632  ;;  %v4156_v9 = vmul.f32 %v4054_v50, %v1637_v22 }
 0xb83   :  { %v4147_v17 = vmul.f32 %v4069_v45, %v1633_v26  ;;  %v1739_v56 = vsel %vm448_vm1, %v1738_v6, %v1730_v63 }
 0xb84   :  { %4826 = vst [vmem:[#allocation20_spill] sm:$0xff] %v4144_v37  ;;  %v1718_v38 = vpack.c.bf16 %v4144_v37, %v4144_v37  ;;  %v1719_v0 = vpack.c.bf16 %v4156_v9, %v4156_v9  ;;  %v1741_v22 = vsel %vm451_vm2, %v1740_v54, %v1739_v56 }
 0xb85   :  { %4827 = vst [vmem:[#allocation21_spill] sm:$0xff] %v4147_v17  ;;  %v1717_v1 = vpack.c.bf16 %v4147_v17, %v4147_v17 }
 0xb86   :  { %4828 = vst [vmem:[#allocation22_spill] sm:$0xff] %v4156_v9  ;;  %v1734_v34 = vunpack.c.l.b16 %v1718_v38  ;;  %v1735_v36 = vunpack.c.l.b16 %v1719_v0  ;;  %v1706_v0 = vld [vmem:[#allocation2 + $0x5] sm:$0x1] }
 0xb87   :  { %v1733_v62 = vunpack.c.l.b16 %v1717_v1 }
 0xb88   :  { %v1744_v50 = vrot.slane %v1734_v34, 4  ;;  %v1746_v63 = vrot.slane %v1735_v36, 3 }
 0xb89   :  { %v1641_v45 = vpop.permute.xlu2 %1640  ;;  %v1742_v26 = vrot.slane %v1733_v62, 5 }
 0xb8a   :  { %v4162_v53 = vmul.f32 %v4074_v7, %v1641_v45  ;;  %v1639_v17 = vpop.permute.xlu1 %1638 }
 0xb8b   :  { %v4168_v43 = vmul.f32 %v4077_v13, %v1639_v17  ;;  %v1743_v38 = vsel %vm454_vm3, %v1742_v26, %v1741_v22 }
 0xb8c   :  { %4829 = vst [vmem:[#allocation23_spill] sm:$0xff] %v4162_v53  ;;  %v1721_v61 = vpack.c.bf16 %v4162_v53, %v4162_v53  ;;  %v1745_v7 = vsel %vm457_vm4, %v1744_v50, %v1743_v38  ;;  %v1707_v50 = vld [vmem:[#allocation2 + $0xd] sm:$0x1] }
 0xb8d   :  { %4830 = vst [vmem:[#allocation24_spill] sm:$0xff] %v4168_v43  ;;  %v1720_v6 = vpack.c.bf16 %v4168_v43, %v4168_v43  ;;  %v1747_v34 = vsel %vm460_vm5, %v1746_v63, %v1745_v7  ;;  %v1710_v63 = vld [vmem:[#allocation2 + $0x25] sm:$0x1] }
 0xb8e   :  { %v1737_v1 = vunpack.c.l.b16 %v1721_v61  ;;  %v1708_v61 = vld [vmem:[#allocation2 + $0x15] sm:$0x1] }
 0xb8f   :  { %v1736_v62 = vunpack.c.l.b16 %v1720_v6 }
 0xb90   :  { %v1750_v45 = vrot.slane %v1737_v1, 1 }
 0xb91   :  { %v1748_v53 = vrot.slane %v1736_v62, 2 }
 0xb93   :  { %v1749_v54 = vsel %vm463_vm6, %v1748_v53, %v1747_v34  ;;  %v1711_v53 = vld [vmem:[#allocation2 + $0x2d] sm:$0x1] }
 0xb94   :  { %v1751_v13 = vsel %vm466_vm7, %v1750_v45, %v1749_v54 }
 0xb95   :  { %v1752_v17 = vpack.c.b16 %v1751_v13, %v1751_v13  ;;  %v1709_v13 = vld [vmem:[#allocation2 + $0x1d] sm:$0x1] }
 0xb97   :  { %1753 = vrot.lane.b32.xlu0 %v1752_v17, %s3427_s2 }
 0xc09   :  { %v1754_v56 = vpop.permute.xlu0 %1753 }
 0xc0a   :  { %2737 = vmatmul.msk.bf16.vlgmr.msrb.gmra.mxu1 %vm108_vm0, %v1754_v56 }
 0xc87   :  { %v1767_v26 = vpop.f32.mrf.mxu1 }
 0xc88   :  { %v1787_v22 = vadd.f32 %v1767_v26, %v1706_v0  ;;  %v1773_v36 = vrot.slane %v1767_v26, 2  ;;  %v1772_v38 = vrot.slane %v1767_v26, 1  ;;  %v1776_v7 = vrot.slane %v1767_v26, 5 }
 0xc89   :  { %v1775_v62 = vrot.slane %v1767_v26, 4  ;;  %v1774_v34 = vrot.slane %v1767_v26, 3 }
 0xc8a   :  { %3073 = vtanh.f32 %v1787_v22  ;;  %v1789_v1 = vadd.f32 %v1773_v36, %v1708_v61  ;;  %v1788_v6 = vadd.f32 %v1772_v38, %v1707_v50  ;;  %v1792_v45 = vadd.f32 %v1776_v7, %v1711_v53  ;;  %v1713_v50 = vld [vmem:[#allocation2 + $0x3d] sm:$0x1]  ;;  %v1712_v53 = vld [vmem:[#allocation2 + $0x35] sm:$0x1] }
 0xc8b   :  { %v1791_v56 = vadd.f32 %v1775_v62, %v1710_v63  ;;  %v1790_v9 = vadd.f32 %v1774_v34, %v1709_v13  ;;  %v1778_v61 = vrot.slane %v1767_v26, 7  ;;  %v1777_v38 = vrot.slane %v1767_v26, 6 }
 0xc8c   :  { %3075 = vtanh.f32 %v1789_v1  ;;  %v1797_v26 = vsub.f32 0.0, %v1789_v1 }
 0xc8d   :  { %3077 = vtanh.f32 %v1788_v6  ;;  %v1794_v7 = vadd.f32 %v1778_v61, %v1713_v50  ;;  %v1793_v34 = vadd.f32 %v1777_v38, %v1712_v53 }
 0xc8e   :  { %3079 = vtanh.f32 %v1792_v45  ;;  %v1807_v13 = vmul.f32 1.442695, %v1797_v26 }
 0xc8f   :  { %v1769_v54 = vpop.f32.mrf.mxu1  ;;  %3081 = vtanh.f32 %v1791_v56 }
 0xc90   :  { %v3074_v17 = vpop.eup %3073  ;;  %3083 = vtanh.f32 %v1790_v9 }
 0xc91   :  { %1859 = vrot.lane.b32.xlu0 %v3074_v17, %s3420_s26  ;;  %3085 = vtanh.f32 %v1794_v7  ;;  %v1799_v17 = vsub.f32 0.0, %v1791_v56  ;;  %v1800_v56 = vsub.f32 0.0, %v1792_v45 }
 0xc92   :  { %v3076_v0 = vpop.eup %3075  ;;  %3087 = vtanh.f32 %v1793_v34 }
 0xc93   :  { %v3078_v43 = vpop.eup %3077  ;;  %1863 = vrot.lane.b32.xlu2 %v3076_v0, %s3420_s26  ;;  %3089 = vpow2.f32 %v1807_v13  ;;  %v1811_v0 = vmul.f32 1.442695, %v1799_v17  ;;  %v1813_v13 = vmul.f32 1.442695, %v1800_v56  ;;  %v1798_v17 = vsub.f32 0.0, %v1790_v9 }
 0xc94   :  { %1861 = vrot.lane.b32.xlu1 %v3078_v43, %s3420_s26  ;;  %v3080_v36 = vpop.eup %3079  ;;  %v1801_v9 = vsub.f32 0.0, %v1793_v34 }
 0xc95   :  { %v3082_v62 = vpop.eup %3081  ;;  %3091 = vpow2.f32 %v1811_v0 }
 0xc96   :  { %v3084_v63 = vpop.eup %3083 }
 0xc97   :  { %v3086_v43 = vpop.eup %3085 }
 0xc98   :  { %v3088_v54 = vpop.eup %3087 }
 0xc99   :  { %1869 = vrot.lane.b32.xlu0 %v3080_v36, %s3420_s26  ;;  %v3090_v61 = vpop.eup %3089  ;;  %v1802_v36 = vsub.f32 0.0, %v1794_v7 }
 0xc9a   :  { %v1821_v50 = vadd.f32 1.0, %v3090_v61 }
 0xc9b   :  { %1867 = vrot.lane.b32.xlu2 %v3082_v62, %s3420_s26  ;;  %v1817_v38 = vmul.f32 1.442695, %v1802_v36  ;;  %v3092_v53 = vpop.eup %3091  ;;  %v1795_v62 = vsub.f32 0.0, %v1787_v22  ;;  %v1809_v36 = vmul.f32 1.442695, %v1798_v17 }
 0xc9c   :  { %1865 = vrot.lane.b32.xlu1 %v3084_v63, %s3420_s26  ;;  %3093 = vrcp.f32 %v1821_v50  ;;  %v1796_v63 = vsub.f32 0.0, %v1788_v6  ;;  %v1823_v37 = vadd.f32 1.0, %v3092_v53 }
 0xc9d   :  { %3095 = vpow2.f32 %v1817_v38 }
 0xc9e   :  { %v1805_v26 = vmul.f32 1.442695, %v1796_v63  ;;  %3097 = vrcp.f32 %v1823_v37 }
 0xca2   :  { %v4187_v31 = vpop.eup %3093 }
 0xca3   :  { %1873 = vrot.lane.b32.xlu2 %v3086_v43, %s3420_s26  ;;  %v1803_v43 = vmul.f32 1.442695, %v1795_v62  ;;  %v3096_v7 = vpop.eup %3095 }
 0xca4   :  { %1871 = vrot.lane.b32.xlu1 %v3088_v54, %s3420_s26  ;;  %v1826_v22 = vadd.f32 1.0, %v3096_v7  ;;  %v4191_v6 = vpop.eup %3097 }
 0xca5   :  { %3099 = vpow2.f32 %v1803_v43 }
 0xca6   :  { %3101 = vpow2.f32 %v1805_v26  ;;  %v1815_v26 = vmul.f32 1.442695, %v1801_v9 }
 0xca7   :  { %3103 = vpow2.f32 %v1813_v13 }
 0xca8   :  { %3105 = vrcp.f32 %v1826_v22 }
 0xca9   :  { %3107 = vpow2.f32 %v1809_v36 }
 0xcab   :  { %v3100_v61 = vpop.eup %3099 }
 0xcac   :  { %v3102_v37 = vpop.eup %3101  ;;  %v1819_v45 = vadd.f32 1.0, %v3100_v61 }
 0xcad   :  { %v1820_v38 = vadd.f32 1.0, %v3102_v37  ;;  %v3104_v53 = vpop.eup %3103 }
 0xcae   :  { %3109 = vrcp.f32 %v1819_v45  ;;  %v4195_v62 = vpop.eup %3105 }
 0xcaf   :  { %3111 = vrcp.f32 %v1820_v38 }
 0xced   :  { %v1864_v54 = vpop.permute.xlu2 %1863 }
 0xcee   :  { %v1885_v1 = vmul.f32 %v4187_v31, %v1864_v54  ;;  %v1824_v54 = vadd.f32 1.0, %v3104_v53 }
 0xcf0   :  { %1903 = vrot.lane.b32.xlu1 %v1885_v1, %s3427_s2  ;;  %v3108_v1 = vpop.eup %3107  ;;  %3113 = vrcp.f32 %v1824_v54 }
 0xcf1   :  { %v4199_v56 = vpop.eup %3109  ;;  %v1822_v17 = vadd.f32 1.0, %v3108_v1  ;;  %3115 = vpow2.f32 %v1815_v26 }
 0xcf2   :  { %v4202_v22 = vpop.eup %3111  ;;  %v1843_v1 = vmul.f32 %v4199_v56, %v4084_v11  ;;  %v1847_v11 = vmul.f32 %v4191_v6, %v4119_v5 }
 0xcf3   :  { %3117 = vrcp.f32 %v1822_v17 }
 0xcf5   :  { %v1868_v0 = vpop.permute.xlu2 %1867 }
 0xcf6   :  { %v1887_v50 = vmul.f32 %v4191_v6, %v1868_v0  ;;  %v4207_v61 = vpop.eup %3113 }
 0xcf7   :  { %v3116_v36 = vpop.eup %3115 }
 0xcf8   :  { %1907 = vrot.lane.b32.xlu1 %v1887_v50, %s3427_s2  ;;  %v1825_v38 = vadd.f32 1.0, %v3116_v36 }
 0xcf9   :  { %v4211_v45 = vpop.eup %3117 }
 0xcfa   :  { %3119 = vrcp.f32 %v1825_v38 }
 0xcfd   :  { %v1874_v63 = vpop.permute.xlu2 %1873 }
 0xcfe   :  { %v1890_v43 = vmul.f32 %v4195_v62, %v1874_v63 }
 0xd00   :  { %1913 = vrot.lane.b32.xlu1 %v1890_v43, %s3427_s2  ;;  %v4215_v63 = vpop.eup %3119 }
 0xd03   :  { %v1860_v7 = vpop.permute.xlu0 %1859 }
 0xd04   :  { %v1883_v13 = vmul.f32 %v4199_v56, %v1860_v7 }
 0xd06   :  { %v1862_v34 = vpop.permute.xlu1 %1861  ;;  %1899 = vrot.lane.b32.xlu2 %v1883_v13, %s3427_s2  ;;  %v1845_v13 = vmul.f32 %v4187_v31, %v4113_v55 }
 0xd07   :  { %v1884_v0 = vmul.f32 %v4202_v22, %v1862_v34 }
 0xd09   :  { %1901 = vrot.lane.b32.xlu0 %v1884_v0, %s3427_s2  ;;  %v1848_v0 = vmul.f32 %v4207_v61, %v4094_v27 }
 0xd0b   :  { %v1870_v50 = vpop.permute.xlu0 %1869 }
 0xd0c   :  { %v1888_v37 = vmul.f32 %v4207_v61, %v1870_v50 }
 0xd0e   :  { %1909 = vrot.lane.b32.xlu2 %v1888_v37, %s3427_s2  ;;  %v1866_v53 = vpop.permute.xlu1 %1865 }
 0xd0f   :  { %v1886_v9 = vmul.f32 %v4211_v45, %v1866_v53 }
 0xd11   :  { %1905 = vrot.lane.b32.xlu0 %v1886_v9, %s3427_s2  ;;  %v1850_v9 = vmul.f32 %v4195_v62, %v4125_v8  ;;  %v1846_v8 = vmul.f32 %v4211_v45, %v4100_v16 }
 0xd16   :  { %v1872_v43 = vpop.permute.xlu1 %1871 }
 0xd17   :  { %v1889_v54 = vmul.f32 %v4215_v63, %v1872_v43 }
 0xd19   :  { %1911 = vrot.lane.b32.xlu0 %v1889_v54, %s3427_s2 }
 0xd60   :  { %v1900_v26 = vpop.permute.xlu2 %1899 }
 0xd61   :  { %v4221_v7 = vadd.f32 %v1900_v26, %v1843_v1  ;;  %v1844_v1 = vmul.f32 %v4202_v22, %v4089_v33 }
 0xd62   :  { %v1904_v17 = vpop.permute.xlu1 %1903 }
 0xd63   :  { %3121 = vtanh.f32 %v4221_v7  ;;  %v4226_v34 = vadd.f32 %v1904_v17, %v1845_v13 }
 0xd65   :  { %3123 = vtanh.f32 %v4226_v34 }
 0xd68   :  { %v1910_v50 = vpop.permute.xlu2 %1909 }
 0xd69   :  { %v3122_v36 = vpop.eup %3121  ;;  %v4231_v37 = vadd.f32 %v1910_v50, %v1848_v0 }
 0xd6a   :  { %1947 = vrot.lane.b32.xlu1 %v3122_v36, %s3420_s26  ;;  %v1908_v55 = vpop.permute.xlu1 %1907 }
 0xd6b   :  { %v3124_v38 = vpop.eup %3123  ;;  %3125 = vtanh.f32 %v4231_v37  ;;  %v4237_v53 = vadd.f32 %v1908_v55, %v1847_v11  ;;  %v1849_v11 = vmul.f32 %v4215_v63, %v4108_v21 }
 0xd6c   :  { %1951 = vrot.lane.b32.xlu0 %v3124_v38, %s3420_s26 }
 0xd6d   :  { %3127 = vtanh.f32 %v4237_v53 }
 0xd71   :  { %v3126_v27 = vpop.eup %3125 }
 0xd72   :  { %1957 = vrot.lane.b32.xlu1 %v3126_v27, %s3420_s26  ;;  %v1914_v5 = vpop.permute.xlu1 %1913 }
 0xd73   :  { %v3128_v43 = vpop.eup %3127  ;;  %v4244_v54 = vadd.f32 %v1914_v5, %v1850_v9 }
 0xd74   :  { %1955 = vrot.lane.b32.xlu0 %v3128_v43, %s3420_s26 }
 0xd75   :  { %3129 = vtanh.f32 %v4244_v54 }
 0xd7b   :  { %v1902_v26 = vpop.permute.xlu0 %1901  ;;  %v3130_v13 = vpop.eup %3129 }
 0xd7c   :  { %v4250_v17 = vadd.f32 %v1902_v26, %v1844_v1  ;;  %1961 = vrot.lane.b32.xlu0 %v3130_v13, %s3420_s26 }
 0xd7e   :  { %3131 = vtanh.f32 %v4250_v17 }
 0xd83   :  { %v1906_v50 = vpop.permute.xlu0 %1905 }
 0xd84   :  { %v3132_v0 = vpop.eup %3131  ;;  %v4256_v36 = vadd.f32 %v1906_v50, %v1846_v8 }
 0xd85   :  { %1949 = vrot.lane.b32.xlu2 %v3132_v0, %s3420_s26 }
 0xd86   :  { %3133 = vtanh.f32 %v4256_v36 }
 0xd8b   :  { %v1912_v55 = vpop.permute.xlu0 %1911 }
 0xd8c   :  { %v3134_v33 = vpop.eup %3133  ;;  %v4263_v38 = vadd.f32 %v1912_v55, %v1849_v11 }
 0xd8d   :  { %1953 = vrot.lane.b32.xlu2 %v3134_v33, %s3420_s26 }
 0xd8e   :  { %3135 = vtanh.f32 %v4263_v38 }
 0xd94   :  { %v3136_v16 = vpop.eup %3135 }
 0xd95   :  { %1959 = vrot.lane.b32.xlu2 %v3136_v16, %s3420_s26 }
 0xddc   :  { %v1948_v9 = vpop.permute.xlu1 %1947 }
 0xddd   :  { %v4276_v26 = vmul.f32 %v4199_v56, %v1948_v9 }
 0xdde   :  { %v1952_v27 = vpop.permute.xlu0 %1951 }
 0xddf   :  { %v1950_v43 = vpop.permute.xlu2 %1949  ;;  %v4271_v1 = vmul.f32 %v4187_v31, %v1952_v27  ;;  %4833 = vst [vmem:[#allocation27_spill] sm:$0xff] %v4276_v26  ;;  %v2035_v31 = vpack.c.bf16 %v4276_v26, %v4276_v26 }
 0xde0   :  { %v4268_v5 = vmul.f32 %v4202_v22, %v1950_v43 }
 0xde1   :  { %4832 = vst [vmem:[#allocation26_spill] sm:$0xff] %v4271_v1  ;;  %v2037_v8 = vpack.c.bf16 %v4271_v1, %v4271_v1  ;;  %v2051_v43 = vunpack.c.l.b16 %v2035_v31 }
 0xde2   :  { %4831 = vst [vmem:[#allocation25_spill] sm:$0xff] %v4268_v5  ;;  %v2036_v21 = vpack.c.bf16 %v4268_v5, %v4268_v5 }
 0xde3   :  { %v2053_v55 = vunpack.c.l.b16 %v2037_v8 }
 0xde4   :  { %v2052_v50 = vunpack.c.l.b16 %v2036_v21  ;;  %v1958_v22 = vpop.permute.xlu1 %1957 }
 0xde5   :  { %v2061_v21 = vrot.slane %v2053_v55, 6 }
 0xde6   :  { %v1956_v13 = vpop.permute.xlu0 %1955  ;;  %v2059_v27 = vrot.slane %v2052_v50, 7 }
 0xde7   :  { %v4281_v0 = vmul.f32 %v4191_v6, %v1956_v13  ;;  %v1954_v33 = vpop.permute.xlu2 %1953  ;;  %v4293_v6 = vmul.f32 %v4207_v61, %v1958_v22 }
 0xde8   :  { %v4284_v11 = vmul.f32 %v4211_v45, %v1954_v33  ;;  %v2060_v33 = vsel %vm448_vm1, %v2059_v27, %v2051_v43 }
 0xde9   :  { %4834 = vst [vmem:[#allocation28_spill] sm:$0xff] %v4281_v0  ;;  %v2039_v56 = vpack.c.bf16 %v4281_v0, %v4281_v0  ;;  %v2040_v8 = vpack.c.bf16 %v4293_v6, %v4293_v6  ;;  %v2062_v22 = vsel %vm451_vm2, %v2061_v21, %v2060_v33  ;;  %v2027_v33 = vld [vmem:[#allocation2 + $0x6] sm:$0x1] }
 0xdea   :  { %4835 = vst [vmem:[#allocation29_spill] sm:$0xff] %v4284_v11  ;;  %v2038_v16 = vpack.c.bf16 %v4284_v11, %v4284_v11 }
 0xdeb   :  { %4836 = vst [vmem:[#allocation30_spill] sm:$0xff] %v4293_v6  ;;  %v2055_v13 = vunpack.c.l.b16 %v2039_v56  ;;  %v2056_v55 = vunpack.c.l.b16 %v2040_v8 }
 0xdec   :  { %v2054_v9 = vunpack.c.l.b16 %v2038_v16 }
 0xded   :  { %v2065_v61 = vrot.slane %v2055_v13, 4  ;;  %v2067_v43 = vrot.slane %v2056_v55, 3 }
 0xdee   :  { %v1962_v45 = vpop.permute.xlu0 %1961  ;;  %v2063_v1 = vrot.slane %v2054_v9, 5 }
 0xdef   :  { %v4299_v0 = vmul.f32 %v4195_v62, %v1962_v45  ;;  %v1960_v11 = vpop.permute.xlu2 %1959 }
 0xdf0   :  { %v4305_v31 = vmul.f32 %v4215_v63, %v1960_v11  ;;  %v2064_v56 = vsel %vm454_vm3, %v2063_v1, %v2062_v22 }
 0xdf1   :  { %4837 = vst [vmem:[#allocation31_spill] sm:$0xff] %v4299_v0  ;;  %v2042_v50 = vpack.c.bf16 %v4299_v0, %v4299_v0  ;;  %v2066_v62 = vsel %vm457_vm4, %v2065_v61, %v2064_v56  ;;  %v2028_v61 = vld [vmem:[#allocation2 + $0xe] sm:$0x1] }
 0xdf2   :  { %4838 = vst [vmem:[#allocation32_spill] sm:$0xff] %v4305_v31  ;;  %v2041_v27 = vpack.c.bf16 %v4305_v31, %v4305_v31  ;;  %v2068_v13 = vsel %vm460_vm5, %v2067_v43, %v2066_v62  ;;  %v2031_v43 = vld [vmem:[#allocation2 + $0x26] sm:$0x1] }
 0xdf3   :  { %v2058_v16 = vunpack.c.l.b16 %v2042_v50  ;;  %v2029_v50 = vld [vmem:[#allocation2 + $0x16] sm:$0x1] }
 0xdf4   :  { %v2057_v9 = vunpack.c.l.b16 %v2041_v27 }
 0xdf5   :  { %v2071_v45 = vrot.slane %v2058_v16, 1 }
 0xdf6   :  { %v2069_v0 = vrot.slane %v2057_v9, 2 }
 0xdf8   :  { %v2070_v21 = vsel %vm463_vm6, %v2069_v0, %v2068_v13  ;;  %v2032_v0 = vld [vmem:[#allocation2 + $0x2e] sm:$0x1] }
 0xdf9   :  { %v2072_v63 = vsel %vm466_vm7, %v2071_v45, %v2070_v21  ;;  %v2030_v21 = vld [vmem:[#allocation2 + $0x1e] sm:$0x1] }
 0xdfa   :  { %v2073_v11 = vpack.c.b16 %v2072_v63, %v2072_v63 }
 0xdfc   :  { %2074 = vrot.lane.b32.xlu1 %v2073_v11, %s3427_s2 }
 0xe6e   :  { %v2075_v1 = vpop.permute.xlu1 %2074 }
 0xe6f   :  { %2738 = vmatmul.msk.bf16.vlgmr.msrb.gmra.mxu2 %vm108_vm0, %v2075_v1 }
 0xef2   :  { %v2088_v8 = vpop.f32.mrf.mxu2 }
 0xef3   :  { %v2108_v22 = vadd.f32 %v2088_v8, %v2027_v33  ;;  %v2094_v55 = vrot.slane %v2088_v8, 2  ;;  %v2093_v56 = vrot.slane %v2088_v8, 1  ;;  %v2097_v62 = vrot.slane %v2088_v8, 5 }
 0xef4   :  { %v2096_v9 = vrot.slane %v2088_v8, 4  ;;  %v2095_v45 = vrot.slane %v2088_v8, 3 }
 0xef5   :  { %3137 = vtanh.f32 %v2108_v22  ;;  %v2110_v16 = vadd.f32 %v2094_v55, %v2029_v50  ;;  %v2109_v27 = vadd.f32 %v2093_v56, %v2028_v61  ;;  %v2113_v13 = vadd.f32 %v2097_v62, %v2032_v0  ;;  %v2034_v61 = vld [vmem:[#allocation2 + $0x3e] sm:$0x1]  ;;  %v2033_v56 = vld [vmem:[#allocation2 + $0x36] sm:$0x1] }
 0xef6   :  { %v2112_v1 = vadd.f32 %v2096_v9, %v2031_v43  ;;  %v2111_v33 = vadd.f32 %v2095_v45, %v2030_v21  ;;  %v2099_v50 = vrot.slane %v2088_v8, 7  ;;  %v2098_v55 = vrot.slane %v2088_v8, 6 }
 0xef7   :  { %3139 = vtanh.f32 %v2110_v16  ;;  %v2117_v8 = vsub.f32 0.0, %v2109_v27 }
 0xef8   :  { %3141 = vtanh.f32 %v2109_v27  ;;  %v2115_v0 = vadd.f32 %v2099_v50, %v2034_v61  ;;  %v2114_v9 = vadd.f32 %v2098_v55, %v2033_v56  ;;  %v2116_v56 = vsub.f32 0.0, %v2108_v22 }
 0xef9   :  { %3143 = vtanh.f32 %v2113_v13  ;;  %v2126_v21 = vmul.f32 1.442695, %v2117_v8  ;;  %v2121_v8 = vsub.f32 0.0, %v2113_v13  ;;  %v2120_v22 = vsub.f32 0.0, %v2112_v1 }
 0xefa   :  { %v2090_v63 = vpop.f32.mrf.mxu2  ;;  %3145 = vtanh.f32 %v2112_v1  ;;  %v2122_v61 = vsub.f32 0.0, %v2114_v9  ;;  %v2124_v6 = vmul.f32 1.442695, %v2116_v56 }
 0xefb   :  { %v3138_v11 = vpop.eup %3137  ;;  %3147 = vtanh.f32 %v2111_v33  ;;  %v2119_v63 = vsub.f32 0.0, %v2111_v33 }
 0xefc   :  { %2180 = vrot.lane.b32.xlu1 %v3138_v11, %s3420_s26  ;;  %3149 = vtanh.f32 %v2115_v0 }
 0xefd   :  { %v3140_v31 = vpop.eup %3139  ;;  %3151 = vtanh.f32 %v2114_v9  ;;  %v2130_v11 = vmul.f32 1.442695, %v2119_v63 }
 0xefe   :  { %v3142_v26 = vpop.eup %3141  ;;  %2184 = vrot.lane.b32.xlu0 %v3140_v31, %s3420_s26  ;;  %3153 = vpow2.f32 %v2126_v21  ;;  %v2134_v21 = vmul.f32 1.442695, %v2121_v8 }
 0xeff   :  { %2182 = vrot.lane.b32.xlu2 %v3142_v26, %s3420_s26  ;;  %v3144_v62 = vpop.eup %3143  ;;  %3155 = vpow2.f32 %v2130_v11 }
 0xf00   :  { %v3146_v43 = vpop.eup %3145 }
 0xf01   :  { %v3148_v45 = vpop.eup %3147 }
 0xf02   :  { %v3150_v26 = vpop.eup %3149 }
 0xf03   :  { %v3152_v31 = vpop.eup %3151 }
 0xf04   :  { %2190 = vrot.lane.b32.xlu1 %v3144_v62, %s3420_s26  ;;  %v3154_v50 = vpop.eup %3153  ;;  %v2136_v62 = vmul.f32 1.442695, %v2122_v61  ;;  %v2132_v61 = vmul.f32 1.442695, %v2120_v22 }
 0xf05   :  { %v2141_v55 = vadd.f32 1.0, %v3154_v50 }
 0xf06   :  { %2188 = vrot.lane.b32.xlu0 %v3146_v43, %s3420_s26  ;;  %v3156_v43 = vpop.eup %3155 }
 0xf07   :  { %2186 = vrot.lane.b32.xlu2 %v3148_v45, %s3420_s26  ;;  %3157 = vrcp.f32 %v2141_v55  ;;  %v2118_v45 = vsub.f32 0.0, %v2110_v16  ;;  %v2143_v5 = vadd.f32 1.0, %v3156_v43 }
 0xf08   :  { %3159 = vpow2.f32 %v2136_v62 }
 0xf09   :  { %v2128_v27 = vmul.f32 1.442695, %v2118_v45  ;;  %3161 = vpow2.f32 %v2124_v6  ;;  %v2123_v6 = vsub.f32 0.0, %v2115_v0 }
 0xf0a   :  { %3163 = vrcp.f32 %v2143_v5 }
 0xf0b   :  { %3165 = vpow2.f32 %v2128_v27  ;;  %v2138_v45 = vmul.f32 1.442695, %v2123_v6 }
 0xf0c   :  { %3167 = vpow2.f32 %v2134_v21 }
 0xf0e   :  { %2194 = vrot.lane.b32.xlu0 %v3150_v26, %s3420_s26  ;;  %v4324_v26 = vpop.eup %3157 }
 0xf0f   :  { %2192 = vrot.lane.b32.xlu2 %v3152_v31, %s3420_s26  ;;  %v3160_v9 = vpop.eup %3159 }
 0xf10   :  { %v2146_v63 = vadd.f32 1.0, %v3160_v9  ;;  %v3162_v16 = vpop.eup %3161 }
 0xf11   :  { %v4328_v11 = vpop.eup %3163  ;;  %v2140_v5 = vadd.f32 1.0, %v3162_v16 }
 0xf12   :  { %v3166_v13 = vpop.eup %3165  ;;  %3169 = vrcp.f32 %v2146_v63 }
 0xf13   :  { %3171 = vpow2.f32 %v2132_v61  ;;  %v2142_v56 = vadd.f32 1.0, %v3166_v13  ;;  %v3168_v1 = vpop.eup %3167 }
 0xf14   :  { %3173 = vrcp.f32 %v2140_v5  ;;  %v2145_v8 = vadd.f32 1.0, %v3168_v1 }
 0xf15   :  { %3175 = vrcp.f32 %v2142_v56 }
 0xf16   :  { %3177 = vpow2.f32 %v2138_v45 }
 0xf17   :  { %3179 = vrcp.f32 %v2145_v8 }
 0xf18   :  { %v4332_v62 = vpop.eup %3169 }
 0xf19   :  { %v3172_v27 = vpop.eup %3171 }
 0xf1a   :  { %v2144_v0 = vadd.f32 1.0, %v3172_v27 }
 0xf1c   :  { %3181 = vrcp.f32 %v2144_v0 }
 0xf59   :  { %v2183_v31 = vpop.permute.xlu2 %2182 }
 0xf5a   :  { %v2205_v33 = vmul.f32 %v4324_v26, %v2183_v31 }
 0xf5c   :  { %2222 = vrot.lane.b32.xlu1 %v2205_v33, %s3427_s2  ;;  %v4336_v33 = vpop.eup %3173 }
 0xf5d   :  { %v4339_v21 = vpop.eup %3175 }
 0xf5e   :  { %v2166_v27 = vmul.f32 %v4339_v21, %v4226_v34  ;;  %v2167_v34 = vmul.f32 %v4328_v11, %v4256_v36  ;;  %v2170_v36 = vmul.f32 %v4332_v62, %v4263_v38 }
 0xf61   :  { %v2187_v50 = vpop.permute.xlu2 %2186 }
 0xf62   :  { %v2207_v55 = vmul.f32 %v4328_v11, %v2187_v50  ;;  %v3178_v50 = vpop.eup %3177 }
 0xf63   :  { %v4344_v61 = vpop.eup %3179  ;;  %v2147_v13 = vadd.f32 1.0, %v3178_v50 }
 0xf64   :  { %2226 = vrot.lane.b32.xlu1 %v2207_v55, %s3427_s2  ;;  %v4347_v6 = vpop.eup %3181 }
 0xf65   :  { %3183 = vrcp.f32 %v2147_v13 }
 0xf69   :  { %v2193_v43 = vpop.permute.xlu2 %2192 }
 0xf6a   :  { %v2210_v31 = vmul.f32 %v4332_v62, %v2193_v43 }
 0xf6b   :  { %v4352_v43 = vpop.eup %3183 }
 0xf6c   :  { %2232 = vrot.lane.b32.xlu1 %v2210_v31, %s3427_s2 }
 0xf6e   :  { %v2181_v9 = vpop.permute.xlu1 %2180 }
 0xf6f   :  { %v2204_v22 = vmul.f32 %v4336_v33, %v2181_v9  ;;  %v2165_v9 = vmul.f32 %v4324_v26, %v4250_v17 }
 0xf70   :  { %v2185_v63 = vpop.permute.xlu0 %2184 }
 0xf71   :  { %v2206_v16 = vmul.f32 %v4339_v21, %v2185_v63  ;;  %2220 = vrot.lane.b32.xlu0 %v2204_v22, %s3427_s2 }
 0xf73   :  { %2224 = vrot.lane.b32.xlu2 %v2206_v16, %s3427_s2  ;;  %v2168_v16 = vmul.f32 %v4347_v6, %v4237_v53  ;;  %v2171_v53 = vmul.f32 %v4352_v43, %v4244_v54  ;;  %v2164_v54 = vmul.f32 %v4336_v33, %v4221_v7 }
 0xf76   :  { %v2191_v55 = vpop.permute.xlu1 %2190 }
 0xf77   :  { %v2209_v5 = vmul.f32 %v4344_v61, %v2191_v55 }
 0xf78   :  { %v2189_v56 = vpop.permute.xlu0 %2188 }
 0xf79   :  { %v2208_v1 = vmul.f32 %v4347_v6, %v2189_v56  ;;  %2230 = vrot.lane.b32.xlu0 %v2209_v5, %s3427_s2 }
 0xf7b   :  { %2228 = vrot.lane.b32.xlu2 %v2208_v1, %s3427_s2 }
 0xf80   :  { %v2195_v45 = vpop.permute.xlu0 %2194 }
 0xf81   :  { %v2211_v31 = vmul.f32 %v4352_v43, %v2195_v45 }
 0xf83   :  { %2234 = vrot.lane.b32.xlu2 %v2211_v31, %s3427_s2 }
 0xfcd   :  { %v2225_v8 = vpop.permute.xlu2 %2224 }
 0xfce   :  { %v4360_v0 = vadd.f32 %v2225_v8, %v2166_v27  ;;  %v2223_v22 = vpop.permute.xlu1 %2222 }
 0xfcf   :  { %v4362_v63 = vadd.f32 %v2223_v22, %v2165_v9 }
 0xfd0   :  { %3185 = vtanh.f32 %v4360_v0 }
 0xfd1   :  { %3187 = vtanh.f32 %v4362_v63 }
 0xfd5   :  { %v2229_v50 = vpop.permute.xlu2 %2228 }
 0xfd6   :  { %v3186_v55 = vpop.eup %3185  ;;  %v4370_v13 = vadd.f32 %v2229_v50, %v2168_v16  ;;  %v2227_v17 = vpop.permute.xlu1 %2226 }
 0xfd7   :  { %v3188_v5 = vpop.eup %3187  ;;  %v4372_v56 = vadd.f32 %v2227_v17, %v2167_v34  ;;  %2272 = vrot.lane.b32.xlu1 %v3186_v55, %s3420_s26  ;;  %v2169_v34 = vmul.f32 %v4344_v61, %v4231_v37 }
 0xfd8   :  { %3189 = vtanh.f32 %v4370_v13  ;;  %2270 = vrot.lane.b32.xlu0 %v3188_v5, %s3420_s26 }
 0xfd9   :  { %3191 = vtanh.f32 %v4372_v56 }
 0xfdd   :  { %v2235_v1 = vpop.permute.xlu2 %2234 }
 0xfde   :  { %v3190_v45 = vpop.eup %3189  ;;  %v4382_v31 = vadd.f32 %v2235_v1, %v2171_v53  ;;  %v2233_v27 = vpop.permute.xlu1 %2232 }
 0xfdf   :  { %v3192_v8 = vpop.eup %3191  ;;  %v4384_v9 = vadd.f32 %v2233_v27, %v2170_v36  ;;  %2276 = vrot.lane.b32.xlu1 %v3190_v45, %s3420_s26 }
 0xfe0   :  { %3193 = vtanh.f32 %v4382_v31  ;;  %2274 = vrot.lane.b32.xlu0 %v3192_v8, %s3420_s26 }
 0xfe1   :  { %3195 = vtanh.f32 %v4384_v9 }
 0xfe3   :  { %v2221_v22 = vpop.permute.xlu0 %2220 }
 0xfe4   :  { %v4392_v38 = vadd.f32 %v2221_v22, %v2164_v54 }
 0xfe6   :  { %v3194_v16 = vpop.eup %3193  ;;  %3197 = vtanh.f32 %v4392_v38 }
 0xfe7   :  { %v3196_v50 = vpop.eup %3195  ;;  %2282 = vrot.lane.b32.xlu1 %v3194_v16, %s3420_s26 }
 0xfe8   :  { %2280 = vrot.lane.b32.xlu0 %v3196_v50, %s3420_s26 }
 0xfeb   :  { %v2231_v55 = vpop.permute.xlu0 %2230 }
 0xfec   :  { %v3198_v17 = vpop.eup %3197  ;;  %v4399_v5 = vadd.f32 %v2231_v55, %v2169_v34 }
 0xfed   :  { %2268 = vrot.lane.b32.xlu2 %v3198_v17, %s3420_s26 }
 0xfee   :  { %3199 = vtanh.f32 %v4399_v5 }
 0xfef   :  { %375 = vrot.lane.b32.xlu1 %v3583_v18, %s3427_s2 }
 0xff0   :  { %373 = vrot.lane.b32.xlu0 %v3591_v25, %s3427_s2 }
 0xff4   :  { %v3200_v7 = vpop.eup %3199 }
 0xff5   :  { %2278 = vrot.lane.b32.xlu2 %v3200_v7, %s3420_s26 }
 0xff7   :  { %381 = vrot.lane.b32.xlu1 %v3599_v32, %s3427_s2 }
 0xff8   :  { %379 = vrot.lane.b32.xlu0 %v3594_v28, %s3427_s2 }
 0xfff   :  { %387 = vrot.lane.b32.xlu1 %v3611_v15, %s3427_s2 }
0x1000   :  { %385 = vrot.lane.b32.xlu0 %v3620_v48, %s3427_s2 }
0x1007   :  { %707 = vrot.lane.b32.xlu1 %v3723_v41, %s3427_s2 }
0x1008   :  { %705 = vrot.lane.b32.xlu0 %v3720_v40, %s3427_s2 }
0x100f   :  { %713 = vrot.lane.b32.xlu1 %v3745_v42, %s3427_s2 }
0x1010   :  { %711 = vrot.lane.b32.xlu0 %v3733_v47, %s3427_s2 }
0x1017   :  { %1024 = vrot.lane.b32.xlu1 %v3865_v49, %s3427_s2 }
0x1018   :  { %717 = vrot.lane.b32.xlu0 %v3751_v51, %s3427_s2 }
0x101f   :  { %1030 = vrot.lane.b32.xlu1 %v3873_v46, %s3427_s2 }
0x1020   :  { %1028 = vrot.lane.b32.xlu0 %v3860_v35, %s3427_s2 }
0x1027   :  { %1036 = vrot.lane.b32.xlu1 %v3894_v10, %s3427_s2 }
0x1028   :  { %1034 = vrot.lane.b32.xlu0 %v3882_v29, %s3427_s2 }
0x102f   :  { %1347 = vrot.lane.b32.xlu1 %v3994_v3, %s3427_s2 }
0x1030   :  { %1345 = vrot.lane.b32.xlu0 %v4002_v23, %s3427_s2 }
0x1037   :  { %1353 = vrot.lane.b32.xlu1 %v4007_v39, %s3427_s2 }
0x1038   :  { %1351 = vrot.lane.b32.xlu0 %v4010_v19, %s3427_s2 }
0x1047   :  { %v2269_v18 = vpop.permute.xlu2 %2268 }
0x1048   :  { %v4453_v40 = vmul.f32 %v4336_v33, %v2269_v18 }
0x1049   :  { %v2273_v25 = vpop.permute.xlu1 %2272 }
0x104a   :  { %v2271_v28 = vpop.permute.xlu0 %2270  ;;  %v4445_v32 = vmul.f32 %v4339_v21, %v2273_v25  ;;  %v2356_v35 = vpack.c.bf16 %v4453_v40, %v4453_v40 }
0x104b   :  { %v4448_v15 = vmul.f32 %v4324_v26, %v2271_v28 }
0x104c   :  { %v2358_v41 = vpack.c.bf16 %v4445_v32, %v4445_v32  ;;  %v2372_v37 = vunpack.c.l.b16 %v2356_v35 }
0x104d   :  { %v2357_v48 = vpack.c.bf16 %v4448_v15, %v4448_v15 }
0x104e   :  { %v2374_v29 = vunpack.c.l.b16 %v2358_v41 }
0x104f   :  { %v2373_v47 = vunpack.c.l.b16 %v2357_v48  ;;  %v2279_v42 = vpop.permute.xlu2 %2278 }
0x1050   :  { %v4466_v23 = vmul.f32 %v4344_v61, %v2279_v42  ;;  %v2382_v26 = vrot.slane %v2374_v29, 6 }
0x1051   :  { %v2277_v51 = vpop.permute.xlu1 %2276  ;;  %v2380_v3 = vrot.slane %v2373_v47, 7 }
0x1052   :  { %v4460_v49 = vmul.f32 %v4347_v6, %v2277_v51  ;;  %v2275_v46 = vpop.permute.xlu0 %2274 }
0x1053   :  { %v4463_v10 = vmul.f32 %v4328_v11, %v2275_v46  ;;  %v2381_v6 = vsel %vm448_vm1, %v2380_v3, %v2372_v37  ;;  %v2361_v11 = vpack.c.bf16 %v4466_v23, %v4466_v23 }
0x1054   :  { %v2360_v39 = vpack.c.bf16 %v4460_v49, %v4460_v49  ;;  %v2383_v27 = vsel %vm451_vm2, %v2382_v26, %v2381_v6 }
0x1055   :  { %v2359_v19 = vpack.c.bf16 %v4463_v10, %v4463_v10  ;;  %v2377_v54 = vunpack.c.l.b16 %v2361_v11 }
0x1056   :  { %v2376_v33 = vunpack.c.l.b16 %v2360_v39 }
0x1057   :  { %v2375_v21 = vunpack.c.l.b16 %v2359_v19  ;;  %v2388_v17 = vrot.slane %v2377_v54, 3  ;;  %v2348_v54 = vld [vmem:[#allocation2 + $0x7] sm:$0x1] }
0x1058   :  { %v2386_v45 = vrot.slane %v2376_v33, 4 }
0x1059   :  { %v2384_v53 = vrot.slane %v2375_v21, 5  ;;  %v2283_v1 = vpop.permute.xlu1 %2282 }
0x105a   :  { %v4476_v61 = vmul.f32 %v4352_v43, %v2283_v1  ;;  %v2281_v36 = vpop.permute.xlu0 %2280 }
0x105b   :  { %v4480_v8 = vmul.f32 %v4332_v62, %v2281_v36  ;;  %v2385_v22 = vsel %vm454_vm3, %v2384_v53, %v2383_v27 }
0x105c   :  { %v2363_v16 = vpack.c.bf16 %v4476_v61, %v4476_v61  ;;  %v2387_v43 = vsel %vm457_vm4, %v2386_v45, %v2385_v22 }
0x105d   :  { %v2362_v50 = vpack.c.bf16 %v4480_v8, %v4480_v8  ;;  %v2389_v25 = vsel %vm460_vm5, %v2388_v17, %v2387_v43 }
0x105e   :  { %v2379_v34 = vunpack.c.l.b16 %v2363_v16  ;;  %v2350_v16 = vld [vmem:[#allocation2 + $0x17] sm:$0x1] }
0x105f   :  { %v2378_v55 = vunpack.c.l.b16 %v2362_v50  ;;  %v2349_v50 = vld [vmem:[#allocation2 + $0xf] sm:$0x1] }
0x1060   :  { %v2392_v7 = vrot.slane %v2379_v34, 1 }
0x1061   :  { %v2390_v18 = vrot.slane %v2378_v55, 2  ;;  %v376_v62 = vpop.permute.xlu1 %375 }
0x1062   :  { %399 = vst.msk [vmem:[#allocation10 + $0x8] sm:$0x1] %vm397_vm8, %v376_v62  ;;  %v374_v28 = vpop.permute.xlu0 %373 }
0x1063   :  { %v2391_v48 = vsel %vm463_vm6, %v2390_v18, %v2389_v25  ;;  %408 = vst.msk [vmem:[#allocation10 + $0xf] sm:$0x1] %vm406_vm9, %v376_v62  ;;  %v2353_v62 = vld [vmem:[#allocation2 + $0x2f] sm:$0x1] }
0x1064   :  { %398 = vst.msk [vmem:[#allocation10] sm:$0x1] %vm397_vm8, %v374_v28  ;;  %v2393_v41 = vsel %vm466_vm7, %v2392_v7, %v2391_v48 }
0x1065   :  { %407 = vst.msk [vmem:[#allocation10 + $0x7] sm:$0x1] %vm406_vm9, %v374_v28  ;;  %v2394_v47 = vpack.c.b16 %v2393_v41, %v2393_v41  ;;  %v2352_v28 = vld [vmem:[#allocation2 + $0x27] sm:$0x1] }
0x1067   :  { %2395 = vrot.lane.b32.xlu2 %v2394_v47, %s3427_s2  ;;  %v2351_v47 = vld [vmem:[#allocation2 + $0x1f] sm:$0x1] }
0x1069   :  { %v382_v42 = vpop.permute.xlu1 %381 }
0x106a   :  { %402 = vst.msk [vmem:[#allocation10 + $0x20] sm:$0x1] %vm397_vm8, %v382_v42  ;;  %v380_v51 = vpop.permute.xlu0 %379 }
0x106b   :  { %411 = vst.msk [vmem:[#allocation10 + $0x27] sm:$0x1] %vm406_vm9, %v382_v42 }
0x106c   :  { %401 = vst.msk [vmem:[#allocation10 + $0x18] sm:$0x1] %vm397_vm8, %v380_v51 }
0x106d   :  { %410 = vst.msk [vmem:[#allocation10 + $0x1f] sm:$0x1] %vm406_vm9, %v380_v51 }
0x106f   :  { %377 = vrot.lane.b32.xlu2 %v3588_v24, %s3427_s2 }
0x1071   :  { %v388_v35 = vpop.permute.xlu1 %387 }
0x1072   :  { %405 = vst.msk [vmem:[#allocation10 + $0x38] sm:$0x1] %vm397_vm8, %v388_v35  ;;  %v386_v46 = vpop.permute.xlu0 %385 }
0x1073   :  { %414 = vst.msk [vmem:[#allocation10 + $0x3f] sm:$0x1] %vm406_vm9, %v388_v35 }
0x1074   :  { %404 = vst.msk [vmem:[#allocation10 + $0x30] sm:$0x1] %vm397_vm8, %v386_v46 }
0x1075   :  { %413 = vst.msk [vmem:[#allocation10 + $0x37] sm:$0x1] %vm406_vm9, %v386_v46 }
0x1077   :  { %383 = vrot.lane.b32.xlu2 %v3606_v4, %s3427_s2 }
0x1079   :  { %v708_v29 = vpop.permute.xlu1 %707 }
0x107a   :  { %729 = vst.msk [vmem:[#allocation10 + $0x11] sm:$0x1] %vm397_vm8, %v708_v29  ;;  %v706_v3 = vpop.permute.xlu0 %705 }
0x107b   :  { %737 = vst.msk [vmem:[#allocation10 + $0x16] sm:$0x1] %vm406_vm9, %v708_v29 }
0x107c   :  { %728 = vst.msk [vmem:[#allocation10 + $0x9] sm:$0x1] %vm397_vm8, %v706_v3 }
0x107d   :  { %736 = vst.msk [vmem:[#allocation10 + $0xe] sm:$0x1] %vm406_vm9, %v706_v3 }
0x107f   :  { %703 = vrot.lane.b32.xlu2 %v3728_v20, %s3427_s2 }
0x1081   :  { %v714_v24 = vpop.permute.xlu1 %713 }
0x1082   :  { %732 = vst.msk [vmem:[#allocation10 + $0x29] sm:$0x1] %vm397_vm8, %v714_v24  ;;  %v712_v39 = vpop.permute.xlu0 %711 }
0x1083   :  { %740 = vst.msk [vmem:[#allocation10 + $0x2e] sm:$0x1] %vm406_vm9, %v714_v24 }
0x1084   :  { %731 = vst.msk [vmem:[#allocation10 + $0x21] sm:$0x1] %vm397_vm8, %v712_v39 }
0x1085   :  { %739 = vst.msk [vmem:[#allocation10 + $0x26] sm:$0x1] %vm406_vm9, %v712_v39  ;;  %v2355_v39 = vld [vmem:[#allocation2 + $0x3f] sm:$0x1] }
0x1087   :  { %709 = vrot.lane.b32.xlu2 %v3736_v52, %s3427_s2 }
0x1089   :  { %v1025_v4 = vpop.permute.xlu1 %1024 }
0x108a   :  { %1048 = vst.msk [vmem:[#allocation10 + $0x2] sm:$0x1] %vm397_vm8, %v1025_v4  ;;  %v718_v19 = vpop.permute.xlu0 %717 }
0x108b   :  { %1056 = vst.msk [vmem:[#allocation10 + $0x5] sm:$0x1] %vm406_vm9, %v1025_v4 }
0x108c   :  { %734 = vst.msk [vmem:[#allocation10 + $0x39] sm:$0x1] %vm397_vm8, %v718_v19 }
0x108d   :  { %742 = vst.msk [vmem:[#allocation10 + $0x3e] sm:$0x1] %vm406_vm9, %v718_v19  ;;  %v2354_v19 = vld [vmem:[#allocation2 + $0x37] sm:$0x1] }
0x108f   :  { %715 = vrot.lane.b32.xlu2 %v3757_v14, %s3427_s2 }
0x1091   :  { %v1031_v20 = vpop.permute.xlu1 %1030 }
0x1092   :  { %1051 = vst.msk [vmem:[#allocation10 + $0x1a] sm:$0x1] %vm397_vm8, %v1031_v20  ;;  %v1029_v37 = vpop.permute.xlu0 %1028 }
0x1093   :  { %1059 = vst.msk [vmem:[#allocation10 + $0x1d] sm:$0x1] %vm406_vm9, %v1031_v20 }
0x1094   :  { %1050 = vst.msk [vmem:[#allocation10 + $0x12] sm:$0x1] %vm397_vm8, %v1029_v37 }
0x1095   :  { %1058 = vst.msk [vmem:[#allocation10 + $0x15] sm:$0x1] %vm406_vm9, %v1029_v37 }
0x1097   :  { %1026 = vrot.lane.b32.xlu2 %v3857_v44, %s3427_s2 }
0x1099   :  { %v1037_v52 = vpop.permute.xlu1 %1036 }
0x109a   :  { %1054 = vst.msk [vmem:[#allocation10 + $0x32] sm:$0x1] %vm397_vm8, %v1037_v52  ;;  %v1035_v26 = vpop.permute.xlu0 %1034 }
0x109b   :  { %1062 = vst.msk [vmem:[#allocation10 + $0x35] sm:$0x1] %vm406_vm9, %v1037_v52 }
0x109c   :  { %1053 = vst.msk [vmem:[#allocation10 + $0x2a] sm:$0x1] %vm397_vm8, %v1035_v26 }
0x109d   :  { %1061 = vst.msk [vmem:[#allocation10 + $0x2d] sm:$0x1] %vm406_vm9, %v1035_v26 }
0x109f   :  { %1032 = vrot.lane.b32.xlu2 %v3870_v58, %s3427_s2 }
0x10a1   :  { %v1348_v14 = vpop.permute.xlu1 %1347 }
0x10a2   :  { %1370 = vst.msk [vmem:[#allocation10 + $0xb] sm:$0x1] %vm397_vm8, %v1348_v14  ;;  %v1346_v33 = vpop.permute.xlu0 %1345 }
0x10a3   :  { %1378 = vst.msk [vmem:[#allocation10 + $0xc] sm:$0x1] %vm406_vm9, %v1348_v14 }
0x10a4   :  { %1369 = vst.msk [vmem:[#allocation10 + $0x3] sm:$0x1] %vm397_vm8, %v1346_v33 }
0x10a5   :  { %1377 = vst.msk [vmem:[#allocation10 + $0x4] sm:$0x1] %vm406_vm9, %v1346_v33 }
0x10a7   :  { %1038 = vrot.lane.b32.xlu2 %v3888_v60, %s3427_s2 }
0x10a9   :  { %v1354_v44 = vpop.permute.xlu1 %1353 }
0x10aa   :  { %1373 = vst.msk [vmem:[#allocation10 + $0x23] sm:$0x1] %vm397_vm8, %v1354_v44  ;;  %v1352_v21 = vpop.permute.xlu0 %1351 }
0x10ab   :  { %1381 = vst.msk [vmem:[#allocation10 + $0x24] sm:$0x1] %vm406_vm9, %v1354_v44 }
0x10ac   :  { %1372 = vst.msk [vmem:[#allocation10 + $0x1b] sm:$0x1] %vm397_vm8, %v1352_v21 }
0x10ad   :  { %1380 = vst.msk [vmem:[#allocation10 + $0x1c] sm:$0x1] %vm406_vm9, %v1352_v21  ;;  %v4839_v21 = vld [vmem:[#allocation18_spill] sm:$0xff] }
0x10af   :  { %1349 = vrot.lane.b32.xlu2 %v3997_v57, %s3427_s2 }
0x10b7   :  { %1355 = vrot.lane.b32.xlu2 %v4019_v2, %s3427_s2 }
0x10c1   :  { %v2396_v58 = vpop.permute.xlu2 %2395 }
0x10c2   :  { %2739 = vmatmul.msk.bf16.vlgmr.msrb.gmra.mxu3 %vm108_vm0, %v2396_v58  ;;  %v4840_v58 = vld [vmem:[#allocation20_spill] sm:$0xff] }
0x10c9   :  { %v378_v60 = vpop.permute.xlu2 %377 }
0x10ca   :  { %400 = vst.msk [vmem:[#allocation10 + $0x10] sm:$0x1] %vm397_vm8, %v378_v60 }
0x10cb   :  { %409 = vst.msk [vmem:[#allocation10 + $0x17] sm:$0x1] %vm406_vm9, %v378_v60  ;;  %v4842_v60 = vld [vmem:[#allocation21_spill] sm:$0xff] }
0x10d1   :  { %v384_v6 = vpop.permute.xlu2 %383 }
0x10d2   :  { %403 = vst.msk [vmem:[#allocation10 + $0x28] sm:$0x1] %vm397_vm8, %v384_v6 }
0x10d3   :  { %412 = vst.msk [vmem:[#allocation10 + $0x2f] sm:$0x1] %vm406_vm9, %v384_v6 }
0x10d9   :  { %v704_v11 = vpop.permute.xlu2 %703 }
0x10da   :  { %727 = vst.msk [vmem:[#allocation10 + $0x1] sm:$0x1] %vm397_vm8, %v704_v11 }
0x10db   :  { %735 = vst.msk [vmem:[#allocation10 + $0x6] sm:$0x1] %vm406_vm9, %v704_v11 }
0x10e1   :  { %v710_v57 = vpop.permute.xlu2 %709 }
0x10e2   :  { %730 = vst.msk [vmem:[#allocation10 + $0x19] sm:$0x1] %vm397_vm8, %v710_v57 }
0x10e3   :  { %738 = vst.msk [vmem:[#allocation10 + $0x1e] sm:$0x1] %vm406_vm9, %v710_v57 }
0x10e9   :  { %v716_v2 = vpop.permute.xlu2 %715 }
0x10ea   :  { %733 = vst.msk [vmem:[#allocation10 + $0x31] sm:$0x1] %vm397_vm8, %v716_v2 }
0x10eb   :  { %741 = vst.msk [vmem:[#allocation10 + $0x36] sm:$0x1] %vm406_vm9, %v716_v2 }
0x10f1   :  { %v1027_v53 = vpop.permute.xlu2 %1026 }
0x10f2   :  { %1049 = vst.msk [vmem:[#allocation10 + $0xa] sm:$0x1] %vm397_vm8, %v1027_v53 }
0x10f3   :  { %1057 = vst.msk [vmem:[#allocation10 + $0xd] sm:$0x1] %vm406_vm9, %v1027_v53 }
0x10f9   :  { %v1033_v1 = vpop.permute.xlu2 %1032 }
0x10fa   :  { %1052 = vst.msk [vmem:[#allocation10 + $0x22] sm:$0x1] %vm397_vm8, %v1033_v1 }
0x10fb   :  { %1060 = vst.msk [vmem:[#allocation10 + $0x25] sm:$0x1] %vm406_vm9, %v1033_v1 }
0x1101   :  { %v1039_v36 = vpop.permute.xlu2 %1038 }
0x1102   :  { %1055 = vst.msk [vmem:[#allocation10 + $0x3a] sm:$0x1] %vm397_vm8, %v1039_v36 }
0x1103   :  { %1063 = vst.msk [vmem:[#allocation10 + $0x3d] sm:$0x1] %vm406_vm9, %v1039_v36 }
0x1109   :  { %v1350_v45 = vpop.permute.xlu2 %1349 }
0x110a   :  { %1371 = vst.msk [vmem:[#allocation10 + $0x13] sm:$0x1] %vm397_vm8, %v1350_v45 }
0x110b   :  { %1379 = vst.msk [vmem:[#allocation10 + $0x14] sm:$0x1] %vm406_vm9, %v1350_v45 }
0x1111   :  { %v1356_v27 = vpop.permute.xlu2 %1355 }
0x1112   :  { %1374 = vst.msk [vmem:[#allocation10 + $0x2b] sm:$0x1] %vm397_vm8, %v1356_v27 }
0x1113   :  { %1382 = vst.msk [vmem:[#allocation10 + $0x2c] sm:$0x1] %vm406_vm9, %v1356_v27 }
0x1145   :  { %v2409_v22 = vpop.f32.mrf.mxu3 }
0x1146   :  { %v2429_v34 = vadd.f32 %v2409_v22, %v2348_v54  ;;  %v2415_v43 = vrot.slane %v2409_v22, 2  ;;  %v2414_v55 = vrot.slane %v2409_v22, 1  ;;  %v2418_v18 = vrot.slane %v2409_v22, 5 }
0x1147   :  { %v2417_v25 = vrot.slane %v2409_v22, 4  ;;  %v2416_v48 = vrot.slane %v2409_v22, 3  ;;  %v2420_v24 = vrot.slane %v2409_v22, 7  ;;  %v2419_v4 = vrot.slane %v2409_v22, 6 }
0x1148   :  { %3201 = vtanh.f32 %v2429_v34  ;;  %v4573_v17 = vadd.f32 %v2415_v43, %v2350_v16  ;;  %v4575_v7 = vadd.f32 %v2414_v55, %v2349_v50  ;;  %v2434_v41 = vadd.f32 %v2418_v18, %v2353_v62 }
0x1149   :  { %v4579_v35 = vadd.f32 %v2417_v25, %v2352_v28  ;;  %v2432_v46 = vadd.f32 %v2416_v48, %v2351_v47  ;;  %v2436_v37 = vadd.f32 %v2420_v24, %v2355_v39  ;;  %v2435_v52 = vadd.f32 %v2419_v4, %v2354_v19 }
0x114a   :  { %3203 = vtanh.f32 %v4573_v17  ;;  %v2437_v6 = vsub.f32 0.0, %v2429_v34  ;;  %v2442_v57 = vsub.f32 0.0, %v2434_v41  ;;  %v2439_v36 = vsub.f32 0.0, %v4573_v17 }
0x114b   :  { %3205 = vtanh.f32 %v4575_v7  ;;  %v2438_v27 = vsub.f32 0.0, %v4575_v7  ;;  %v2441_v34 = vsub.f32 0.0, %v4579_v35  ;;  %v2440_v55 = vsub.f32 0.0, %v2432_v46 }
0x114c   :  { %3207 = vtanh.f32 %v2434_v41  ;;  %v2445_v11 = vmul.f32 1.442695, %v2437_v6  ;;  %v2449_v16 = vmul.f32 1.442695, %v2439_v36  ;;  %v2444_v48 = vsub.f32 0.0, %v2436_v37 }
0x114d   :  { %v2411_v42 = vpop.f32.mrf.mxu3  ;;  %3209 = vtanh.f32 %v4579_v35  ;;  %v2447_v50 = vmul.f32 1.442695, %v2438_v27  ;;  %v2453_v7 = vmul.f32 1.442695, %v2441_v34  ;;  %v2451_v62 = vmul.f32 1.442695, %v2440_v55 }
0x114e   :  { %v3202_v51 = vpop.eup %3201  ;;  %3211 = vtanh.f32 %v2432_v46  ;;  %v2443_v41 = vsub.f32 0.0, %v2435_v52  ;;  %v4843_v35 = vld [vmem:[#allocation24_spill] sm:$0xff]  ;;  %v2459_v46 = vmul.f32 1.442695, %v2444_v48  ;;  %v4846_v55 = vld [vmem:[#allocation22_spill] sm:$0xff] }
0x114f   :  { %2501 = vrot.lane.b32.xlu2 %v3202_v51, %s3420_s26  ;;  %3213 = vtanh.f32 %v2436_v37  ;;  %v4850_v48 = vld [vmem:[#allocation28_spill] sm:$0xff] }
0x1150   :  { %v3204_v29 = vpop.eup %3203  ;;  %3215 = vtanh.f32 %v2435_v52 }
0x1151   :  { %v3206_v3 = vpop.eup %3205  ;;  %2505 = vrot.lane.b32.xlu1 %v3204_v29, %s3420_s26  ;;  %3217 = vpow2.f32 %v2445_v11  ;;  %v2457_v29 = vmul.f32 1.442695, %v2443_v41  ;;  %v4851_v41 = vld [vmem:[#allocation29_spill] sm:$0xff] }
0x1152   :  { %2503 = vrot.lane.b32.xlu0 %v3206_v3, %s3420_s26  ;;  %v3208_v20 = vpop.eup %3207 }
0x1153   :  { %v3210_v26 = vpop.eup %3209 }
0x1154   :  { %v3212_v14 = vpop.eup %3211 }
0x1155   :  { %v3214_v33 = vpop.eup %3213 }
0x1156   :  { %v3216_v44 = vpop.eup %3215 }
0x1157   :  { %2511 = vrot.lane.b32.xlu2 %v3208_v20, %s3420_s26  ;;  %v3218_v2 = vpop.eup %3217 }
0x1159   :  { %2509 = vrot.lane.b32.xlu1 %v3210_v26, %s3420_s26 }
0x115a   :  { %2507 = vrot.lane.b32.xlu0 %v3212_v14, %s3420_s26 }
0x115f   :  { %1357 = vrot.lane.b32.xlu2 %v4031_v12, %s3427_s2  ;;  %v4841_v12 = vld [vmem:[#allocation19_spill] sm:$0xff] }
0x1161   :  { %2515 = vrot.lane.b32.xlu1 %v3214_v33, %s3420_s26  ;;  %v4844_v33 = vld [vmem:[#allocation25_spill] sm:$0xff] }
0x1162   :  { %2513 = vrot.lane.b32.xlu0 %v3216_v44, %s3420_s26 }
0x1167   :  { %1668 = vrot.lane.b32.xlu2 %v4131_v59, %s3427_s2  ;;  %v2455_v59 = vmul.f32 1.442695, %v2442_v57 }
0x1169   :  { %1666 = vrot.lane.b32.xlu1 %v4139_v30, %s3427_s2  ;;  %3219 = vpow2.f32 %v2455_v59  ;;  %v2461_v30 = vadd.f32 1.0, %v3218_v2 }
0x116a   :  { %1359 = vrot.lane.b32.xlu0 %v4839_v21, %s3427_s2 }
0x116b   :  { %3221 = vrcp.f32 %v2461_v30  ;;  %v4845_v30 = vld [vmem:[#allocation30_spill] sm:$0xff] }
0x116f   :  { %v3220_v53 = vpop.eup %3219 }
0x1170   :  { %v2466_v1 = vadd.f32 1.0, %v3220_v53 }
0x1171   :  { %1674 = vrot.lane.b32.xlu1 %v4840_v58, %s3427_s2  ;;  %v4605_v45 = vpop.eup %3221 }
0x1172   :  { %1670 = vrot.lane.b32.xlu0 %v4841_v12, %s3427_s2  ;;  %3223 = vrcp.f32 %v2466_v1 }
0x1173   :  { %3225 = vpow2.f32 %v2449_v16 }
0x1174   :  { %3227 = vpow2.f32 %v2447_v50 }
0x1175   :  { %3229 = vpow2.f32 %v2453_v7 }
0x1176   :  { %3231 = vpow2.f32 %v2451_v62  ;;  %v4848_v62 = vld [vmem:[#allocation27_spill] sm:$0xff] }
0x1178   :  { %v4611_v43 = vpop.eup %3223 }
0x1179   :  { %v3226_v25 = vpop.eup %3225 }
0x117a   :  { %1672 = vrot.lane.b32.xlu0 %v4842_v60, %s3427_s2  ;;  %v3228_v28 = vpop.eup %3227  ;;  %v2463_v42 = vadd.f32 1.0, %v3226_v25  ;;  %v4849_v25 = vld [vmem:[#allocation26_spill] sm:$0xff] }
0x117b   :  { %v2462_v51 = vadd.f32 1.0, %v3228_v28  ;;  %v3230_v3 = vpop.eup %3229 }
0x117c   :  { %3233 = vrcp.f32 %v2463_v42  ;;  %v3232_v24 = vpop.eup %3231  ;;  %v2465_v4 = vadd.f32 1.0, %v3230_v3  ;;  %v2485_v42 = vmul.f32 %v4605_v45, %v4392_v38 }
0x117d   :  { %3235 = vrcp.f32 %v2462_v51  ;;  %v2464_v19 = vadd.f32 1.0, %v3232_v24  ;;  %v2490_v24 = vmul.f32 %v4611_v43, %v4399_v5 }
0x117e   :  { %3237 = vpow2.f32 %v2459_v46 }
0x117f   :  { %3239 = vpow2.f32 %v2457_v29 }
0x1180   :  { %3241 = vrcp.f32 %v2465_v4 }
0x1181   :  { %3243 = vrcp.f32 %v2464_v19 }
0x1182   :  { %v4620_v20 = vpop.eup %3233 }
0x1183   :  { %v4623_v52 = vpop.eup %3235  ;;  %v2487_v46 = vmul.f32 %v4620_v20, %v4360_v0 }
0x1184   :  { %v3238_v21 = vpop.eup %3237 }
0x1185   :  { %v3240_v58 = vpop.eup %3239  ;;  %v2468_v12 = vadd.f32 1.0, %v3238_v21 }
0x1186   :  { %v2467_v60 = vadd.f32 1.0, %v3240_v58  ;;  %v4631_v6 = vpop.eup %3241 }
0x1187   :  { %v4633_v57 = vpop.eup %3243  ;;  %3245 = vrcp.f32 %v2468_v12 }
0x1188   :  { %3247 = vrcp.f32 %v2467_v60  ;;  %v2486_v60 = vmul.f32 %v4623_v52, %v4362_v63  ;;  %v2488_v63 = vmul.f32 %v4633_v57, %v4372_v56 }
0x118d   :  { %v4641_v1 = vpop.eup %3245 }
0x118e   :  { %v4643_v27 = vpop.eup %3247  ;;  %v2492_v5 = vmul.f32 %v4641_v1, %v4382_v31 }
0x118f   :  { %v2491_v56 = vmul.f32 %v4643_v27, %v4384_v9 }
0x11a9   :  { %v2502_v54 = vpop.permute.xlu2 %2501 }
0x11aa   :  { %v2525_v22 = vmul.f32 %v4605_v45, %v2502_v54 }
0x11ac   :  { %2541 = vrot.lane.b32.xlu0 %v2525_v22, %s3427_s2 }
0x11b1   :  { %v2512_v18 = vpop.permute.xlu2 %2511 }
0x11b2   :  { %v2530_v17 = vmul.f32 %v4611_v43, %v2512_v18  ;;  %v4847_v18 = vld [vmem:[#allocation23_spill] sm:$0xff] }
0x11b4   :  { %2551 = vrot.lane.b32.xlu0 %v2530_v17, %s3427_s2 }
0x11b9   :  { %v1358_v47 = vpop.permute.xlu2 %1357 }
0x11ba   :  { %1375 = vst.msk [vmem:[#allocation10 + $0x33] sm:$0x1] %vm397_vm8, %v1358_v47 }
0x11bb   :  { %1383 = vst.msk [vmem:[#allocation10 + $0x34] sm:$0x1] %vm406_vm9, %v1358_v47  ;;  %v4852_v47 = vld [vmem:[#allocation32_spill] sm:$0xff] }
0x11bc   :  { %1678 = vrot.lane.b32.xlu0 %v4843_v35, %s3427_s2 }
0x11c1   :  { %v1669_v39 = vpop.permute.xlu2 %1668 }
0x11c2   :  { %1691 = vst.msk [vmem:[#allocation10 + $0xc] sm:$0x1] %vm397_vm8, %v1669_v39 }
0x11c3   :  { %1699 = vst.msk [vmem:[#allocation10 + $0xb] sm:$0x1] %vm406_vm9, %v1669_v39  ;;  %v2506_v37 = vpop.permute.xlu1 %2505 }
0x11c4   :  { %v2527_v26 = vmul.f32 %v4620_v20, %v2506_v37  ;;  %v2504_v14 = vpop.permute.xlu0 %2503  ;;  %1989 = vrot.lane.b32.xlu0 %v4844_v33, %s3427_s2  ;;  %v2489_v37 = vmul.f32 %v4631_v6, %v4370_v13 }
0x11c5   :  { %v2526_v44 = vmul.f32 %v4623_v52, %v2504_v14 }
0x11c6   :  { %2545 = vrot.lane.b32.xlu2 %v2527_v26, %s3427_s2 }
0x11c7   :  { %2543 = vrot.lane.b32.xlu1 %v2526_v44, %s3427_s2 }
0x11cb   :  { %v2510_v11 = vpop.permute.xlu1 %2509 }
0x11cc   :  { %v2529_v59 = vmul.f32 %v4631_v6, %v2510_v11  ;;  %v2508_v2 = vpop.permute.xlu0 %2507  ;;  %1997 = vrot.lane.b32.xlu0 %v4845_v30, %s3427_s2 }
0x11cd   :  { %v2528_v53 = vmul.f32 %v4633_v57, %v2508_v2 }
0x11ce   :  { %2549 = vrot.lane.b32.xlu2 %v2529_v59, %s3427_s2 }
0x11cf   :  { %2547 = vrot.lane.b32.xlu1 %v2528_v53, %s3427_s2 }
0x11d3   :  { %v2516_v36 = vpop.permute.xlu1 %2515 }
0x11d4   :  { %v2532_v54 = vmul.f32 %v4641_v1, %v2516_v36  ;;  %v2514_v22 = vpop.permute.xlu0 %2513 }
0x11d5   :  { %v2531_v16 = vmul.f32 %v4643_v27, %v2514_v22 }
0x11d6   :  { %2555 = vrot.lane.b32.xlu2 %v2532_v54, %s3427_s2 }
0x11d7   :  { %2553 = vrot.lane.b32.xlu1 %v2531_v16, %s3427_s2 }
0x11db   :  { %v1667_v50 = vpop.permute.xlu1 %1666 }
0x11dc   :  { %1690 = vst.msk [vmem:[#allocation10 + $0x4] sm:$0x1] %vm397_vm8, %v1667_v50  ;;  %v1360_v34 = vpop.permute.xlu0 %1359 }
0x11dd   :  { %1698 = vst.msk [vmem:[#allocation10 + $0x3] sm:$0x1] %vm406_vm9, %v1667_v50 }
0x11de   :  { %1376 = vst.msk [vmem:[#allocation10 + $0x3b] sm:$0x1] %vm397_vm8, %v1360_v34  ;;  %1676 = vrot.lane.b32.xlu2 %v4846_v55, %s3427_s2 }
0x11df   :  { %1384 = vst.msk [vmem:[#allocation10 + $0x3c] sm:$0x1] %vm406_vm9, %v1360_v34  ;;  %1680 = vrot.lane.b32.xlu1 %v4847_v18, %s3427_s2 }
0x11e3   :  { %v1675_v17 = vpop.permute.xlu1 %1674 }
0x11e4   :  { %1694 = vst.msk [vmem:[#allocation10 + $0x24] sm:$0x1] %vm397_vm8, %v1675_v17  ;;  %v1671_v7 = vpop.permute.xlu0 %1670 }
0x11e5   :  { %1702 = vst.msk [vmem:[#allocation10 + $0x23] sm:$0x1] %vm406_vm9, %v1675_v17 }
0x11e6   :  { %1692 = vst.msk [vmem:[#allocation10 + $0x14] sm:$0x1] %vm397_vm8, %v1671_v7  ;;  %1987 = vrot.lane.b32.xlu2 %v4848_v62, %s3427_s2 }
0x11e7   :  { %1700 = vst.msk [vmem:[#allocation10 + $0x13] sm:$0x1] %vm406_vm9, %v1671_v7  ;;  %1991 = vrot.lane.b32.xlu1 %v4849_v25, %s3427_s2 }
0x11ec   :  { %v1673_v28 = vpop.permute.xlu0 %1672 }
0x11ed   :  { %1693 = vst.msk [vmem:[#allocation10 + $0x1c] sm:$0x1] %vm397_vm8, %v1673_v28 }
0x11ee   :  { %1701 = vst.msk [vmem:[#allocation10 + $0x1b] sm:$0x1] %vm406_vm9, %v1673_v28  ;;  %1995 = vrot.lane.b32.xlu2 %v4850_v48, %s3427_s2 }
0x11ef   :  { %1993 = vrot.lane.b32.xlu1 %v4851_v41, %s3427_s2 }
0x11f7   :  { %1999 = vrot.lane.b32.xlu1 %v4852_v47, %s3427_s2 }
0x121e   :  { %v2542_v51 = vpop.permute.xlu0 %2541 }
0x121f   :  { %v2565_v35 = vadd.f32 %v2542_v51, %v2485_v42 }
0x1220   :  { %v2546_v29 = vpop.permute.xlu2 %2545 }
0x1221   :  { %3249 = vtanh.f32 %v2565_v35  ;;  %v2567_v3 = vadd.f32 %v2546_v29, %v2487_v46 }
0x1223   :  { %3251 = vtanh.f32 %v2567_v3 }
0x1226   :  { %v2552_v39 = vpop.permute.xlu0 %2551 }
0x1227   :  { %v3250_v4 = vpop.eup %3249  ;;  %v2570_v19 = vadd.f32 %v2552_v39, %v2490_v24 }
0x1228   :  { %v2550_v26 = vpop.permute.xlu2 %2549  ;;  %2589 = vrot.lane.b32.xlu1 %v3250_v4, %s3420_s26 }
0x1229   :  { %v3252_v38 = vpop.eup %3251  ;;  %3253 = vtanh.f32 %v2570_v19  ;;  %v2569_v14 = vadd.f32 %v2550_v26, %v2489_v37 }
0x122a   :  { %2593 = vrot.lane.b32.xlu0 %v3252_v38, %s3420_s26 }
0x122b   :  { %3255 = vtanh.f32 %v2569_v14 }
0x122e   :  { %v1679_v0 = vpop.permute.xlu0 %1678 }
0x122f   :  { %v3254_v33 = vpop.eup %3253  ;;  %1696 = vst.msk [vmem:[#allocation10 + $0x34] sm:$0x1] %vm397_vm8, %v1679_v0 }
0x1230   :  { %1704 = vst.msk [vmem:[#allocation10 + $0x33] sm:$0x1] %vm406_vm9, %v1679_v0  ;;  %v2556_v44 = vpop.permute.xlu2 %2555  ;;  %2599 = vrot.lane.b32.xlu1 %v3254_v33, %s3420_s26 }
0x1231   :  { %v3256_v13 = vpop.eup %3255  ;;  %v2572_v21 = vadd.f32 %v2556_v44, %v2492_v5 }
0x1232   :  { %2597 = vrot.lane.b32.xlu0 %v3256_v13, %s3420_s26 }
0x1233   :  { %3257 = vtanh.f32 %v2572_v21 }
0x1236   :  { %v1990_v58 = vpop.permute.xlu0 %1989 }
0x1237   :  { %2012 = vst.msk [vmem:[#allocation10 + $0xd] sm:$0x1] %vm397_vm8, %v1990_v58 }
0x1238   :  { %2020 = vst.msk [vmem:[#allocation10 + $0xa] sm:$0x1] %vm406_vm9, %v1990_v58  ;;  %v1677_v12 = vpop.permute.xlu2 %1676  ;;  %2310 = vrot.lane.b32.xlu1 %v4448_v15, %s3427_s2 }
0x1239   :  { %v3258_v31 = vpop.eup %3257  ;;  %1695 = vst.msk [vmem:[#allocation10 + $0x2c] sm:$0x1] %vm397_vm8, %v1677_v12  ;;  %v2544_v11 = vpop.permute.xlu1 %2543 }
0x123a   :  { %1703 = vst.msk [vmem:[#allocation10 + $0x2b] sm:$0x1] %vm406_vm9, %v1677_v12  ;;  %v2566_v59 = vadd.f32 %v2544_v11, %v2486_v60  ;;  %2603 = vrot.lane.b32.xlu0 %v3258_v31, %s3420_s26 }
0x123c   :  { %3259 = vtanh.f32 %v2566_v59 }
0x123e   :  { %v1998_v2 = vpop.permute.xlu0 %1997 }
0x123f   :  { %2016 = vst.msk [vmem:[#allocation10 + $0x2d] sm:$0x1] %vm397_vm8, %v1998_v2 }
0x1240   :  { %2024 = vst.msk [vmem:[#allocation10 + $0x2a] sm:$0x1] %vm406_vm9, %v1998_v2  ;;  %v1988_v30 = vpop.permute.xlu2 %1987  ;;  %2316 = vrot.lane.b32.xlu1 %v4460_v49, %s3427_s2 }
0x1241   :  { %2011 = vst.msk [vmem:[#allocation10 + $0x5] sm:$0x1] %vm397_vm8, %v1988_v30  ;;  %v2548_v15 = vpop.permute.xlu1 %2547 }
0x1242   :  { %v3260_v53 = vpop.eup %3259  ;;  %2019 = vst.msk [vmem:[#allocation10 + $0x2] sm:$0x1] %vm406_vm9, %v1988_v30  ;;  %v2568_v36 = vadd.f32 %v2548_v15, %v2488_v63  ;;  %2308 = vrot.lane.b32.xlu0 %v4453_v40, %s3427_s2 }
0x1243   :  { %2591 = vrot.lane.b32.xlu2 %v3260_v53, %s3420_s26 }
0x1244   :  { %3261 = vtanh.f32 %v2568_v36 }
0x1248   :  { %v1996_v54 = vpop.permute.xlu2 %1995  ;;  %2322 = vrot.lane.b32.xlu1 %v4476_v61, %s3427_s2 }
0x1249   :  { %2015 = vst.msk [vmem:[#allocation10 + $0x25] sm:$0x1] %vm397_vm8, %v1996_v54  ;;  %v2554_v49 = vpop.permute.xlu1 %2553 }
0x124a   :  { %v3262_v22 = vpop.eup %3261  ;;  %2023 = vst.msk [vmem:[#allocation10 + $0x22] sm:$0x1] %vm406_vm9, %v1996_v54  ;;  %v2571_v16 = vadd.f32 %v2554_v49, %v2491_v56  ;;  %2314 = vrot.lane.b32.xlu0 %v4463_v10, %s3427_s2  ;;  %v4853_v10 = vld [vmem:[#allocation31_spill] sm:$0xff] }
0x124b   :  { %2595 = vrot.lane.b32.xlu2 %v3262_v22, %s3420_s26 }
0x124c   :  { %3263 = vtanh.f32 %v2571_v16 }
0x1251   :  { %v1681_v40 = vpop.permute.xlu1 %1680 }
0x1252   :  { %v3264_v50 = vpop.eup %3263  ;;  %1697 = vst.msk [vmem:[#allocation10 + $0x3c] sm:$0x1] %vm397_vm8, %v1681_v40  ;;  %2320 = vrot.lane.b32.xlu0 %v4480_v8, %s3427_s2 }
0x1253   :  { %1705 = vst.msk [vmem:[#allocation10 + $0x3b] sm:$0x1] %vm406_vm9, %v1681_v40  ;;  %2601 = vrot.lane.b32.xlu2 %v3264_v50, %s3420_s26 }
0x1259   :  { %v1992_v9 = vpop.permute.xlu1 %1991 }
0x125a   :  { %2013 = vst.msk [vmem:[#allocation10 + $0x15] sm:$0x1] %vm397_vm8, %v1992_v9 }
0x125b   :  { %2021 = vst.msk [vmem:[#allocation10 + $0x12] sm:$0x1] %vm406_vm9, %v1992_v9  ;;  %2001 = vrot.lane.b32.xlu2 %v4853_v10, %s3427_s2 }
0x1261   :  { %v1994_v61 = vpop.permute.xlu1 %1993 }
0x1262   :  { %2014 = vst.msk [vmem:[#allocation10 + $0x1d] sm:$0x1] %vm397_vm8, %v1994_v61 }
0x1263   :  { %2022 = vst.msk [vmem:[#allocation10 + $0x1a] sm:$0x1] %vm406_vm9, %v1994_v61  ;;  %2312 = vrot.lane.b32.xlu2 %v4445_v32, %s3427_s2 }
0x1269   :  { %v2000_v8 = vpop.permute.xlu1 %1999 }
0x126a   :  { %2017 = vst.msk [vmem:[#allocation10 + $0x35] sm:$0x1] %vm397_vm8, %v2000_v8 }
0x126b   :  { %2025 = vst.msk [vmem:[#allocation10 + $0x32] sm:$0x1] %vm406_vm9, %v2000_v8  ;;  %2318 = vrot.lane.b32.xlu2 %v4466_v23, %s3427_s2 }
0x129a   :  { %v2590_v34 = vpop.permute.xlu1 %2589 }
0x129b   :  { %v2613_v55 = vmul.f32 %v4605_v45, %v2590_v34 }
0x129c   :  { %v2594_v18 = vpop.permute.xlu0 %2593 }
0x129d   :  { %v2592_v17 = vpop.permute.xlu2 %2591  ;;  %v2615_v7 = vmul.f32 %v4620_v20, %v2594_v18  ;;  %2629 = vrot.lane.b32.xlu2 %v2613_v55, %s3427_s2 }
0x129e   :  { %v2614_v62 = vmul.f32 %v4623_v52, %v2592_v17 }
0x129f   :  { %2633 = vrot.lane.b32.xlu1 %v2615_v7, %s3427_s2  ;;  %v2671_v41 = vrot.slane %v2615_v7, 6 }
0x12a0   :  { %2631 = vrot.lane.b32.xlu0 %v2614_v62, %s3427_s2  ;;  %v2669_v25 = vrot.slane %v2614_v62, 7 }
0x12a2   :  { %v2600_v32 = vpop.permute.xlu1 %2599  ;;  %v2670_v20 = vsel %vm448_vm1, %v2669_v25, %v2613_v55 }
0x12a3   :  { %v2618_v23 = vmul.f32 %v4611_v43, %v2600_v32  ;;  %v2672_v42 = vsel %vm451_vm2, %v2671_v41, %v2670_v20 }
0x12a4   :  { %v2598_v28 = vpop.permute.xlu0 %2597 }
0x12a5   :  { %v2596_v48 = vpop.permute.xlu2 %2595  ;;  %v2617_v45 = vmul.f32 %v4631_v6, %v2598_v28  ;;  %v2677_v24 = vrot.slane %v2618_v23, 3 }
0x12a6   :  { %v2616_v47 = vmul.f32 %v4633_v57, %v2596_v48 }
0x12a7   :  { %2639 = vrot.lane.b32.xlu1 %v2618_v23, %s3427_s2  ;;  %v2675_v51 = vrot.slane %v2617_v45, 4 }
0x12a8   :  { %v2673_v52 = vrot.slane %v2616_v47, 5  ;;  %2635 = vrot.lane.b32.xlu2 %v2616_v47, %s3427_s2  ;;  %2637 = vrot.lane.b32.xlu0 %v2617_v45, %s3427_s2 }
0x12aa   :  { %v2311_v35 = vpop.permute.xlu1 %2310  ;;  %v2674_v43 = vsel %vm454_vm3, %v2673_v52, %v2672_v42 }
0x12ab   :  { %2333 = vst.msk [vmem:[#allocation10 + $0xe] sm:$0x1] %vm397_vm8, %v2311_v35  ;;  %v2676_v29 = vsel %vm457_vm4, %v2675_v51, %v2674_v43 }
0x12ac   :  { %2341 = vst.msk [vmem:[#allocation10 + $0x9] sm:$0x1] %vm406_vm9, %v2311_v35  ;;  %v2604_v6 = vpop.permute.xlu0 %2603  ;;  %v2678_v19 = vsel %vm460_vm5, %v2677_v24, %v2676_v29 }
0x12ad   :  { %v2602_v57 = vpop.permute.xlu2 %2601  ;;  %v2620_v46 = vmul.f32 %v4641_v1, %v2604_v6 }
0x12ae   :  { %v2619_v3 = vmul.f32 %v4643_v27, %v2602_v57 }
0x12af   :  { %v2681_v39 = vrot.slane %v2620_v46, 1 }
0x12b0   :  { %v2679_v4 = vrot.slane %v2619_v3, 2  ;;  %2641 = vrot.lane.b32.xlu2 %v2619_v3, %s3427_s2  ;;  %2643 = vrot.lane.b32.xlu0 %v2620_v46, %s3427_s2 }
0x12b2   :  { %v2317_v37 = vpop.permute.xlu1 %2316  ;;  %v2680_v26 = vsel %vm463_vm6, %v2679_v4, %v2678_v19 }
0x12b3   :  { %2336 = vst.msk [vmem:[#allocation10 + $0x26] sm:$0x1] %vm397_vm8, %v2317_v37  ;;  %v2682_v1 = vsel %vm466_vm7, %v2681_v39, %v2680_v26 }
0x12b4   :  { %2344 = vst.msk [vmem:[#allocation10 + $0x21] sm:$0x1] %vm406_vm9, %v2317_v37  ;;  %2683 = vrot.lane.b32.xlu1 %v2682_v1, %s3427_s2  ;;  %v2309_v27 = vpop.permute.xlu0 %2308 }
0x12b5   :  { %v2002_v38 = vpop.permute.xlu2 %2001  ;;  %2332 = vst.msk [vmem:[#allocation10 + $0x6] sm:$0x1] %vm397_vm8, %v2309_v27 }
0x12b6   :  { %2018 = vst.msk [vmem:[#allocation10 + $0x3d] sm:$0x1] %vm397_vm8, %v2002_v38 }
0x12b7   :  { %2026 = vst.msk [vmem:[#allocation10 + $0x3a] sm:$0x1] %vm406_vm9, %v2002_v38 }
0x12b8   :  { %2340 = vst.msk [vmem:[#allocation10 + $0x1] sm:$0x1] %vm406_vm9, %v2309_v27 }
0x12ba   :  { %v2323_v14 = vpop.permute.xlu1 %2322 }
0x12bb   :  { %2339 = vst.msk [vmem:[#allocation10 + $0x3e] sm:$0x1] %vm397_vm8, %v2323_v14 }
0x12bc   :  { %2347 = vst.msk [vmem:[#allocation10 + $0x39] sm:$0x1] %vm406_vm9, %v2323_v14  ;;  %v2315_v0 = vpop.permute.xlu0 %2314 }
0x12bd   :  { %v2313_v33 = vpop.permute.xlu2 %2312  ;;  %2335 = vst.msk [vmem:[#allocation10 + $0x1e] sm:$0x1] %vm397_vm8, %v2315_v0 }
0x12be   :  { %2334 = vst.msk [vmem:[#allocation10 + $0x16] sm:$0x1] %vm397_vm8, %v2313_v33 }
0x12bf   :  { %2342 = vst.msk [vmem:[#allocation10 + $0x11] sm:$0x1] %vm406_vm9, %v2313_v33 }
0x12c0   :  { %2343 = vst.msk [vmem:[#allocation10 + $0x19] sm:$0x1] %vm406_vm9, %v2315_v0 }
0x12c4   :  { %v2321_v5 = vpop.permute.xlu0 %2320 }
0x12c5   :  { %v2319_v44 = vpop.permute.xlu2 %2318  ;;  %2338 = vst.msk [vmem:[#allocation10 + $0x36] sm:$0x1] %vm397_vm8, %v2321_v5 }
0x12c6   :  { %2337 = vst.msk [vmem:[#allocation10 + $0x2e] sm:$0x1] %vm397_vm8, %v2319_v44 }
0x12c7   :  { %2345 = vst.msk [vmem:[#allocation10 + $0x29] sm:$0x1] %vm406_vm9, %v2319_v44 }
0x12c8   :  { %2346 = vst.msk [vmem:[#allocation10 + $0x31] sm:$0x1] %vm406_vm9, %v2321_v5 }
0x12f7   :  { %v2630_v13 = vpop.permute.xlu2 %2629 }
0x12f8   :  { %2653 = vst.msk [vmem:[#allocation10 + $0x7] sm:$0x1] %vm397_vm8, %v2630_v13 }
0x12f9   :  { %2661 = vst.msk [vmem:[#allocation10] sm:$0x1] %vm406_vm9, %v2630_v13 }
0x1302   :  { %v2636_v21 = vpop.permute.xlu2 %2635 }
0x1303   :  { %2656 = vst.msk [vmem:[#allocation10 + $0x1f] sm:$0x1] %vm397_vm8, %v2636_v21 }
0x1304   :  { %2664 = vst.msk [vmem:[#allocation10 + $0x18] sm:$0x1] %vm406_vm9, %v2636_v21 }
0x130a   :  { %v2642_v58 = vpop.permute.xlu2 %2641 }
0x130b   :  { %2659 = vst.msk [vmem:[#allocation10 + $0x37] sm:$0x1] %vm397_vm8, %v2642_v58 }
0x130c   :  { %2667 = vst.msk [vmem:[#allocation10 + $0x30] sm:$0x1] %vm406_vm9, %v2642_v58 }
0x1311   :  { %v2634_v12 = vpop.permute.xlu1 %2633 }
0x1312   :  { %2655 = vst.msk [vmem:[#allocation10 + $0x17] sm:$0x1] %vm397_vm8, %v2634_v12  ;;  %v2632_v60 = vpop.permute.xlu0 %2631 }
0x1313   :  { %2663 = vst.msk [vmem:[#allocation10 + $0x10] sm:$0x1] %vm406_vm9, %v2634_v12 }
0x1314   :  { %2654 = vst.msk [vmem:[#allocation10 + $0xf] sm:$0x1] %vm397_vm8, %v2632_v60 }
0x1315   :  { %2662 = vst.msk [vmem:[#allocation10 + $0x8] sm:$0x1] %vm406_vm9, %v2632_v60 }
0x1319   :  { %v2640_v31 = vpop.permute.xlu1 %2639 }
0x131a   :  { %2658 = vst.msk [vmem:[#allocation10 + $0x2f] sm:$0x1] %vm397_vm8, %v2640_v31  ;;  %v2638_v11 = vpop.permute.xlu0 %2637 }
0x131b   :  { %2666 = vst.msk [vmem:[#allocation10 + $0x28] sm:$0x1] %vm406_vm9, %v2640_v31 }
0x131c   :  { %2657 = vst.msk [vmem:[#allocation10 + $0x27] sm:$0x1] %vm397_vm8, %v2638_v11 }
0x131d   :  { %2665 = vst.msk [vmem:[#allocation10 + $0x20] sm:$0x1] %vm406_vm9, %v2638_v11 }
0x1322   :  { %v2644_v59 = vpop.permute.xlu0 %2643 }
0x1323   :  { %2660 = vst.msk [vmem:[#allocation10 + $0x3f] sm:$0x1] %vm397_vm8, %v2644_v59 }
0x1324   :  { %2668 = vst.msk [vmem:[#allocation10 + $0x38] sm:$0x1] %vm406_vm9, %v2644_v59 }
0x1325   :  { %2699 = dma.vmem_to_hbm [thread:$0]  %s2692_s15, 1024, %s2694_s18, [#allocation4], %s3423_s30, %s3423_s30, %s3424_s1  }
0x1326   :  { %v2684_v2 = vpop.permute.xlu1 %2683 }
0x1327   :  { %2686 = vst.msk [vmem:[#allocation11] sm:$0xff] %vm108_vm0, %v2684_v2 }
0x1328   :  { %2710 = dma.vmem_to_hbm [thread:$0]  %s2706_s20, 128, %s2708_s23, [#allocation12]  }
0x1329   :  { %3415 = dma.done.wait [#allocation4], 1024  }
0x132a   :  { %3416 = vsyncadd [#allocation4], 4294966272 }
0x132b   :  { %3417 = dma.done.wait [#allocation12], 128  }
0x132c   :  { %3418 = vsyncadd [#allocation12], 4294967168 }
0x132d   :  { %2719 = vsyncpa [#allocation3], 1 }
0x132e   :  { %2720 = vsyncpa [#allocation6], 1 }
0x132f   :  { %2721 = vsyncpa [#allocation9], 1 }
0x1330   :  { %2722 = vsyncpa [#allocation4], 1 }
0x1331   :  { %2723 = vsyncpa [#allocation12], 1 }

</bundles_post_ra>
